<compile_context>
chip_gen: v5e
topology: v5e:2x2
jax: 0.10.0
libtpu: 0.0.40
codegen_flags: <defaults>
</compile_context>

<pallas_src>
import functools

import jax
import jax.numpy as jnp
from jax.experimental import pallas as pl
from jax.experimental.pallas import tpu as pltpu


MAX_BATCH_TILE = 256   # fills the MXU M dimension on v6e/v7x
MIN_BATCH_TILE = 16    # bf16 packed-sublane multiple


def _round_up(x, m):
    return ((x + m - 1) // m) * m


def _choose_batch_tile(total_batch):
    return min(MAX_BATCH_TILE, max(MIN_BATCH_TILE, _round_up(total_batch, MIN_BATCH_TILE)))


# ----------------------------------------------------------------------------
# Fused kernel: global-avg-pool (XLU) -> 1x1-conv (K=8 MXU) -> ReLU ->
#               Linear -> ReLU -> Linear -> ReLU -> Linear
# ----------------------------------------------------------------------------
def siamese_fused_kernel(x_ref, wc_ref, bc_ref, w1_ref, b1_ref,
                         w2_ref, b2_ref, w3_ref, b3_ref, o_ref):
    # x_ref : (BT, C_pad, HW) bf16
    # wc    : (C_pad, 2048) bf16   bc: (1, 2048) f32
    # w1    : (2048, 512)  bf16    b1: (1, 512)  f32
    # w2    : (512, 512)   bf16    b2: (1, 512)  f32
    # w3    : (512, 128)   bf16    b3: (1, 128)  f32   (padded cols/rows are 0)
    cd = wc_ref.dtype
    hw = x_ref.shape[-1]

    # Global average pool over HW: cross-lane XLU reduce with f32 accumulation
    # (free slot, hidden under the resident-weight DMA of the first iteration).
    pooled = jnp.sum(x_ref[...].astype(jnp.float32), axis=-1) * (1.0 / hw)   # (BT, C_pad)

    feat = jnp.dot(pooled.astype(cd), wc_ref[...], preferred_element_type=jnp.float32)
    feat = jnp.maximum(feat + bc_ref[...], 0.0)                               # (BT, 2048)

    h = jnp.dot(feat.astype(cd), w1_ref[...], preferred_element_type=jnp.float32)
    h = jnp.maximum(h + b1_ref[...], 0.0)                                     # (BT, 512)

    h = jnp.dot(h.astype(cd), w2_ref[...], preferred_element_type=jnp.float32)
    h = jnp.maximum(h + b2_ref[...], 0.0)                                     # (BT, 512)

    out = jnp.dot(h.astype(cd), w3_ref[...], preferred_element_type=jnp.float32)
    o_ref[...] = (out + b3_ref[...]).astype(o_ref.dtype)                      # (BT, 128)


def _fused_forward(prep, x, batch_tile):
    """x: (Bp, C_pad, HW) bf16 with Bp a multiple of batch_tile. Returns (Bp, OUT_PAD) f32."""
    Bp, c_pad, hw = x.shape
    feat_dim = prep["wc"].shape[1]
    fc_pad = prep["w1"].shape[1]
    out_pad = prep["w3"].shape[1]
    grid = (Bp // batch_tile,)

    def resident(arr):
        # Constant index_map -> DMA'd once; single-buffered to halve VMEM use.
        nd = arr.ndim
        return pl.BlockSpec(arr.shape, lambda i, _n=nd: (0,) * _n,
                            pipeline_mode=pl.Buffered(1))

    weight_elems = c_pad * feat_dim + feat_dim * fc_pad + fc_pad * fc_pad + fc_pad * out_pad
    bias_elems = feat_dim + fc_pad + fc_pad + out_pad
    cost = pl.CostEstimate(
        flops=2 * Bp * weight_elems,
        transcendentals=0,
        bytes_accessed=(x.size * x.dtype.itemsize
                        + weight_elems * 2 + bias_elems * 4
                        + Bp * out_pad * 4),
    )

    return pl.pallas_call(
        siamese_fused_kernel,
        out_shape=jax.ShapeDtypeStruct((Bp, out_pad), jnp.float32),
        grid=grid,
        in_specs=[
            pl.BlockSpec((batch_tile, c_pad, hw), lambda i: (i, 0, 0)),
            resident(prep["wc"]), resident(prep["bc"]),
            resident(prep["w1"]), resident(prep["b1"]),
            resident(prep["w2"]), resident(prep["b2"]),
            resident(prep["w3"]), resident(prep["b3"]),
        ],
        out_specs=pl.BlockSpec((batch_tile, out_pad), lambda i: (i, 0)),
        compiler_params=pltpu.CompilerParams(
            # Weight-DMA-bound at small batch: keep the batch axis "arbitrary"
            # so it is not sharded across v7x's two TensorCores (which would
            # duplicate the full weight stream per core).
            dimension_semantics=("arbitrary",),
            vmem_limit_bytes=48 * 1024 * 1024,   # < v7x 64 MiB physical
        ),
        cost_estimate=cost,
    )(x, prep["wc"], prep["bc"], prep["w1"], prep["b1"],
      prep["w2"], prep["b2"], prep["w3"], prep["b3"])


# ----------------------------------------------------------------------------
# Parameter construction / preparation (done once, outside jit)
# ----------------------------------------------------------------------------
def init_params(key, c_in=4, feat_dim=2048, fc_dim=500, out_dim=32):
    ks = jax.random.split(key, 5)
    s = lambda fan_in: 1.0 / jnp.sqrt(fan_in)
    return {
        "wc": jax.random.normal(ks[0], (c_in, feat_dim), jnp.float32) * s(c_in),
        "bc": jax.random.normal(ks[1], (1, feat_dim), jnp.float32) * 0.01,
        "w1": jax.random.normal(ks[2], (feat_dim, fc_dim), jnp.float32) * s(feat_dim),
        "b1": jnp.zeros((1, fc_dim), jnp.float32),
        "w2": jax.random.normal(ks[3], (fc_dim, fc_dim), jnp.float32) * s(fc_dim),
        "b2": jnp.zeros((1, fc_dim), jnp.float32),
        "w3": jax.random.normal(ks[4], (fc_dim, out_dim), jnp.float32) * s(fc_dim),
        "b3": jnp.zeros((1, out_dim), jnp.float32),
    }


def prepare_params(params, c_pad=8, fc_pad=512, out_pad=128, compute_dtype=jnp.bfloat16):
    """Zero-pad channel/FC/OUT dims to sublane/lane-friendly sizes and cast weights
    to the MXU compute dtype. Padded rows/cols are zero, so results are exact."""
    def pad_cols(a, n):
        return jnp.pad(a, ((0, 0), (0, n - a.shape[1])))

    def pad_rows(a, n):
        return jnp.pad(a, ((0, n - a.shape[0]), (0, 0)))

    return {
        "wc": pad_rows(params["wc"], c_pad).astype(compute_dtype),            # (8, 2048)
        "bc": params["bc"].astype(jnp.float32),                               # (1, 2048)
        "w1": pad_cols(params["w1"], fc_pad).astype(compute_dtype),           # (2048, 512)
        "b1": pad_cols(params["b1"], fc_pad).astype(jnp.float32),             # (1, 512)
        "w2": pad_cols(pad_rows(params["w2"], fc_pad), fc_pad).astype(compute_dtype),
        "b2": pad_cols(params["b2"], fc_pad).astype(jnp.float32),
        "w3": pad_cols(pad_rows(params["w3"], fc_pad), out_pad).astype(compute_dtype),
        "b3": pad_cols(params["b3"], out_pad).astype(jnp.float32),            # (1, 128)
    }


# ----------------------------------------------------------------------------
# SiameseNetwork forward: both inputs batched through ONE fused kernel call
# ----------------------------------------------------------------------------
@functools.partial(jax.jit, static_argnames=("out_dim",))
def siamese_forward(prep, input1, input2, *, out_dim=32):
    B, C, H, W = input1.shape
    hw = H * W
    c_pad = prep["wc"].shape[0]
    # Shared weights => run both inputs in one batched kernel call.
    # TODO(synk): for large B, feed input1/input2 as two separate kernel inputs
    # (two BlockSpecs) to avoid materializing this concat copy in HBM.
    x = jnp.concatenate([input1, input2], axis=0)              # (2B, C, H, W)
    x = x.reshape(2 * B, C, hw).astype(jnp.bfloat16)            # bf16 activation stream
    if c_pad > C:
        x = jnp.pad(x, ((0, 0), (0, c_pad - C), (0, 0)))        # zero channels -> exact
    bt = _choose_batch_tile(2 * B)
    pad = (-x.shape[0]) % bt
    if pad:
        x = jnp.pad(x, ((0, pad), (0, 0), (0, 0)))               # sublane-align the batch
    out = _fused_forward(prep, x, bt)                            # (Bp, 128) f32
    out = out[: 2 * B, :out_dim]                                 # drop batch + lane padding
    return out[:B], out[B:]


# ----------------------------------------------------------------------------
# References for sanity checks
# ----------------------------------------------------------------------------
def _ref_forward_once_prepared(prep, x, out_dim):
    """Mirrors the kernel math exactly (bf16 x / weights, f32 pool + accumulation)."""
    cd = prep["wc"].dtype
    B, C, H, W = x.shape
    c_pad = prep["wc"].shape[0]
    xb = x.reshape(B, C, H * W).astype(cd)
    if c_pad > C:
        xb = jnp.pad(xb, ((0, 0), (0, c_pad - C), (0, 0)))
    pooled = jnp.sum(xb.astype(jnp.float32), axis=-1) * (1.0 / (H * W))
    feat = jnp.maximum(
        jnp.dot(pooled.astype(cd), prep["wc"], preferred_element_type=jnp.float32)
        + prep["bc"], 0.0)
    h = jnp.maximum(
        jnp.dot(feat.astype(cd), prep["w1"], preferred_element_type=jnp.float32)
        + prep["b1"], 0.0)
    h = jnp.maximum(
        jnp.dot(h.astype(cd), prep["w2"], preferred_element_type=jnp.float32)
        + prep["b2"], 0.0)
    out = jnp.dot(h.astype(cd), prep["w3"], preferred_element_type=jnp.float32) + prep["b3"]
    return out[:, :out_dim]


def _ref_forward_once_f32(params, x):
    """Original (unpadded, f32) math."""
    B, C, H, W = x.shape
    pooled = jnp.mean(x.reshape(B, C, H * W), axis=-1)
    feat = jnp.maximum(pooled @ params["wc"] + params["bc"], 0.0)
    h = jnp.maximum(feat @ params["w1"] + params["b1"], 0.0)
    h = jnp.maximum(h @ params["w2"] + params["b2"], 0.0)
    return h @ params["w3"] + params["b3"]


if __name__ == "__main__":
    B, C, H, W = 2, 4, 16, 16
    key = jax.random.PRNGKey(0)
    kp, k1, k2 = jax.random.split(key, 3)

    params = init_params(kp, c_in=C, feat_dim=2048, fc_dim=500, out_dim=32)
    prep = prepare_params(params)

    input1 = jax.random.normal(k1, (B, C, H, W), jnp.float32)
    input2 = jax.random.normal(k2, (B, C, H, W), jnp.float32)

    out1, out2 = siamese_forward(prep, input1, input2, out_dim=32)
    jax.block_until_ready((out1, out2))

    assert out1.shape == (B, 32) and out2.shape == (B, 32)

    # exact-math mirror (same bf16 casts / padding / f32 pool) -> tight tolerance
    ref1 = _ref_forward_once_prepared(prep, input1, 32)
    ref2 = _ref_forward_once_prepared(prep, input2, 32)
    assert jnp.allclose(out1, ref1, atol=1e-3, rtol=1e-3)
    assert jnp.allclose(out2, ref2, atol=1e-3, rtol=1e-3)

    # original f32 semantics -> loose tolerance (bf16 weight+activation quantization)
    f1 = _ref_forward_once_f32(params, input1)
    f2 = _ref_forward_once_f32(params, input2)
    assert jnp.allclose(out1, f1, atol=5e-2, rtol=2e-1)
    assert jnp.allclose(out2, f2, atol=5e-2, rtol=2e-1)

    print("KERNEL_OK")
</pallas_src>

<mosaic_0001>
module attributes {stable_mosaic.version = 11 : i64} {
  func.func @siamese_fused_kernel(%arg0: i32, %arg1: memref<16x8x256xbf16, #tpu.memory_space<vmem>>, %arg2: memref<8x2048xbf16, #tpu.memory_space<vmem>>, %arg3: memref<1x2048xf32, #tpu.memory_space<vmem>>, %arg4: memref<2048x512xbf16, #tpu.memory_space<vmem>>, %arg5: memref<1x512xf32, #tpu.memory_space<vmem>>, %arg6: memref<512x512xbf16, #tpu.memory_space<vmem>>, %arg7: memref<1x512xf32, #tpu.memory_space<vmem>>, %arg8: memref<512x128xbf16, #tpu.memory_space<vmem>>, %arg9: memref<1x128xf32, #tpu.memory_space<vmem>>, %arg10: memref<16x128xf32, #tpu.memory_space<vmem>>) attributes {dimension_semantics = [#tpu.dimension_semantics<arbitrary>], iteration_bounds = array<i64: 1>, scalar_prefetch = 0 : i64, scratch_operands = 0 : i64, tpu.core_type = #tpu.core_type<tc>, window_params = [{transform_indices = @transform_0, window_bounds = array<i64: 16, 8, 256>}, {pipeline_mode = #tpu.pipeline_mode<synchronous>, transform_indices = @transform_1, window_bounds = array<i64: 8, 2048>}, {pipeline_mode = #tpu.pipeline_mode<synchronous>, transform_indices = @transform_2, window_bounds = array<i64: 1, 2048>}, {pipeline_mode = #tpu.pipeline_mode<synchronous>, transform_indices = @transform_3, window_bounds = array<i64: 2048, 512>}, {pipeline_mode = #tpu.pipeline_mode<synchronous>, transform_indices = @transform_4, window_bounds = array<i64: 1, 512>}, {pipeline_mode = #tpu.pipeline_mode<synchronous>, transform_indices = @transform_5, window_bounds = array<i64: 512, 512>}, {pipeline_mode = #tpu.pipeline_mode<synchronous>, transform_indices = @transform_6, window_bounds = array<i64: 1, 512>}, {pipeline_mode = #tpu.pipeline_mode<synchronous>, transform_indices = @transform_7, window_bounds = array<i64: 512, 128>}, {pipeline_mode = #tpu.pipeline_mode<synchronous>, transform_indices = @transform_8, window_bounds = array<i64: 1, 128>}, {transform_indices = @transform_9, window_bounds = array<i64: 16, 128>}]} {
    %c0 = arith.constant 0 : index
    %c0_0 = arith.constant 0 : index
    %c0_1 = arith.constant 0 : index
    %0 = vector.load %arg1[%c0, %c0_0, %c0_1] : memref<16x8x256xbf16, #tpu.memory_space<vmem>>, vector<16x8x256xbf16>
    %1 = arith.extf %0 : vector<16x8x256xbf16> to vector<16x8x256xf32>
    %cst = arith.constant dense<0.000000e+00> : vector<16x8xf32>
    %2 = vector.multi_reduction <add>, %1, %cst [2] : vector<16x8x256xf32> to vector<16x8xf32>
    %cst_2 = arith.constant 3.906250e-03 : f32
    %3 = vector.broadcast %cst_2 : f32 to vector<16x8xf32>
    %4 = arith.mulf %2, %3 : vector<16x8xf32>
    %5 = arith.truncf %4 : vector<16x8xf32> to vector<16x8xbf16>
    %c0_3 = arith.constant 0 : index
    %c0_4 = arith.constant 0 : index
    %6 = vector.load %arg2[%c0_3, %c0_4] : memref<8x2048xbf16, #tpu.memory_space<vmem>>, vector<8x2048xbf16>
    %cst_5 = arith.constant dense<0.000000e+00> : vector<16x2048xf32>
    %7 = tpu.matmul %5, %6, %cst_5 {dimension_numbers = #tpu.dot_dimension_numbers<[1], [0], [0], [1], [0, 0, 1, 1], [], []>} : vector<16x8xbf16>, vector<8x2048xbf16>, vector<16x2048xf32> -> vector<16x2048xf32>
    %c0_6 = arith.constant 0 : index
    %c0_7 = arith.constant 0 : index
    %8 = vector.load %arg3[%c0_6, %c0_7] : memref<1x2048xf32, #tpu.memory_space<vmem>>, vector<1x2048xf32>
    %9 = vector.broadcast %8 : vector<1x2048xf32> to vector<16x2048xf32>
    %10 = arith.addf %7, %9 : vector<16x2048xf32>
    %cst_8 = arith.constant 0.000000e+00 : f32
    %11 = vector.broadcast %cst_8 : f32 to vector<16x2048xf32>
    %12 = arith.maximumf %10, %11 : vector<16x2048xf32>
    %13 = arith.truncf %12 : vector<16x2048xf32> to vector<16x2048xbf16>
    %c0_9 = arith.constant 0 : index
    %c0_10 = arith.constant 0 : index
    %14 = vector.load %arg4[%c0_9, %c0_10] : memref<2048x512xbf16, #tpu.memory_space<vmem>>, vector<2048x512xbf16>
    %cst_11 = arith.constant dense<0.000000e+00> : vector<16x512xf32>
    %15 = tpu.matmul %13, %14, %cst_11 {dimension_numbers = #tpu.dot_dimension_numbers<[1], [0], [0], [1], [0, 0, 1, 1], [], []>} : vector<16x2048xbf16>, vector<2048x512xbf16>, vector<16x512xf32> -> vector<16x512xf32>
    %c0_12 = arith.constant 0 : index
    %c0_13 = arith.constant 0 : index
    %16 = vector.load %arg5[%c0_12, %c0_13] : memref<1x512xf32, #tpu.memory_space<vmem>>, vector<1x512xf32>
    %17 = vector.broadcast %16 : vector<1x512xf32> to vector<16x512xf32>
    %18 = arith.addf %15, %17 : vector<16x512xf32>
    %cst_14 = arith.constant 0.000000e+00 : f32
    %19 = vector.broadcast %cst_14 : f32 to vector<16x512xf32>
    %20 = arith.maximumf %18, %19 : vector<16x512xf32>
    %21 = arith.truncf %20 : vector<16x512xf32> to vector<16x512xbf16>
    %c0_15 = arith.constant 0 : index
    %c0_16 = arith.constant 0 : index
    %22 = vector.load %arg6[%c0_15, %c0_16] : memref<512x512xbf16, #tpu.memory_space<vmem>>, vector<512x512xbf16>
    %cst_17 = arith.constant dense<0.000000e+00> : vector<16x512xf32>
    %23 = tpu.matmul %21, %22, %cst_17 {dimension_numbers = #tpu.dot_dimension_numbers<[1], [0], [0], [1], [0, 0, 1, 1], [], []>} : vector<16x512xbf16>, vector<512x512xbf16>, vector<16x512xf32> -> vector<16x512xf32>
    %c0_18 = arith.constant 0 : index
    %c0_19 = arith.constant 0 : index
    %24 = vector.load %arg7[%c0_18, %c0_19] : memref<1x512xf32, #tpu.memory_space<vmem>>, vector<1x512xf32>
    %25 = vector.broadcast %24 : vector<1x512xf32> to vector<16x512xf32>
    %26 = arith.addf %23, %25 : vector<16x512xf32>
    %cst_20 = arith.constant 0.000000e+00 : f32
    %27 = vector.broadcast %cst_20 : f32 to vector<16x512xf32>
    %28 = arith.maximumf %26, %27 : vector<16x512xf32>
    %29 = arith.truncf %28 : vector<16x512xf32> to vector<16x512xbf16>
    %c0_21 = arith.constant 0 : index
    %c0_22 = arith.constant 0 : index
    %30 = vector.load %arg8[%c0_21, %c0_22] : memref<512x128xbf16, #tpu.memory_space<vmem>>, vector<512x128xbf16>
    %cst_23 = arith.constant dense<0.000000e+00> : vector<16x128xf32>
    %31 = tpu.matmul %29, %30, %cst_23 {dimension_numbers = #tpu.dot_dimension_numbers<[1], [0], [0], [1], [0, 0, 1, 1], [], []>} : vector<16x512xbf16>, vector<512x128xbf16>, vector<16x128xf32> -> vector<16x128xf32>
    %c0_24 = arith.constant 0 : index
    %c0_25 = arith.constant 0 : index
    %32 = vector.load %arg9[%c0_24, %c0_25] : memref<1x128xf32, #tpu.memory_space<vmem>>, vector<1x128xf32>
    %33 = vector.broadcast %32 : vector<1x128xf32> to vector<16x128xf32>
    %34 = arith.addf %31, %33 : vector<16x128xf32>
    %c0_26 = arith.constant 0 : index
    %c0_27 = arith.constant 0 : index
    %35 = vector.load %arg10[%c0_26, %c0_27] : memref<16x128xf32, #tpu.memory_space<vmem>>, vector<16x128xf32>
    tpu.vector_store %arg10[%c0_26, %c0_27], %34 {strides = array<i32>} : memref<16x128xf32, #tpu.memory_space<vmem>>, vector<16x128xf32>,
    return
  }
  func.func @transform_0(%arg0: i32) -> (i32, i32, i32) {
    %c0_i32 = arith.constant 0 : i32
    %c0_i32_0 = arith.constant 0 : i32
    %c0_i32_1 = arith.constant 0 : i32
    return %arg0, %c0_i32, %c0_i32_0 : i32, i32, i32
  }
  func.func @transform_1(%arg0: i32) -> (i32, i32) {
    %c0_i32 = arith.constant 0 : i32
    %c0_i32_0 = arith.constant 0 : i32
    %c0_i32_1 = arith.constant 0 : i32
    return %c0_i32, %c0_i32_0 : i32, i32
  }
  func.func @transform_2(%arg0: i32) -> (i32, i32) {
    %c0_i32 = arith.constant 0 : i32
    %c0_i32_0 = arith.constant 0 : i32
    %c0_i32_1 = arith.constant 0 : i32
    return %c0_i32, %c0_i32_0 : i32, i32
  }
  func.func @transform_3(%arg0: i32) -> (i32, i32) {
    %c0_i32 = arith.constant 0 : i32
    %c0_i32_0 = arith.constant 0 : i32
    %c0_i32_1 = arith.constant 0 : i32
    return %c0_i32, %c0_i32_0 : i32, i32
  }
  func.func @transform_4(%arg0: i32) -> (i32, i32) {
    %c0_i32 = arith.constant 0 : i32
    %c0_i32_0 = arith.constant 0 : i32
    %c0_i32_1 = arith.constant 0 : i32
    return %c0_i32, %c0_i32_0 : i32, i32
  }
  func.func @transform_5(%arg0: i32) -> (i32, i32) {
    %c0_i32 = arith.constant 0 : i32
    %c0_i32_0 = arith.constant 0 : i32
    %c0_i32_1 = arith.constant 0 : i32
    return %c0_i32, %c0_i32_0 : i32, i32
  }
  func.func @transform_6(%arg0: i32) -> (i32, i32) {
    %c0_i32 = arith.constant 0 : i32
    %c0_i32_0 = arith.constant 0 : i32
    %c0_i32_1 = arith.constant 0 : i32
    return %c0_i32, %c0_i32_0 : i32, i32
  }
  func.func @transform_7(%arg0: i32) -> (i32, i32) {
    %c0_i32 = arith.constant 0 : i32
    %c0_i32_0 = arith.constant 0 : i32
    %c0_i32_1 = arith.constant 0 : i32
    return %c0_i32, %c0_i32_0 : i32, i32
  }
  func.func @transform_8(%arg0: i32) -> (i32, i32) {
    %c0_i32 = arith.constant 0 : i32
    %c0_i32_0 = arith.constant 0 : i32
    %c0_i32_1 = arith.constant 0 : i32
    return %c0_i32, %c0_i32_0 : i32, i32
  }
  func.func @transform_9(%arg0: i32) -> (i32, i32) {
    %c0_i32 = arith.constant 0 : i32
    %c0_i32_0 = arith.constant 0 : i32
    return %arg0, %c0_i32 : i32, i32
  }
}

</mosaic_0001>

<bundles_post_ra>
// kernel: siamese_forward.1
= control target key start
LH: loop header
LB: loop body
LE: loop exit
PB: predicated region body
PF: predicated region fallthrough
CT: control target
= control target key end

     0   :  { %14 = vsyncpa [#allocation3], 0  ;;  %s10289_s0 = inlined_call_operand.vmem [shape: bf16[16,8,256], index: 0, kind: input, shape index: {}]   ;;  %s10290_s1 = inlined_call_operand.hbm [shape: bf16[8,2048], index: 1, kind: input, shape index: {}]   ;;  %s10291_s2 = inlined_call_operand.hbm [shape: f32[1,2048], index: 2, kind: input, shape index: {}]   ;;  %s10292_s3 = inlined_call_operand.hbm [shape: bf16[2048,512], index: 3, kind: input, shape index: {}]   ;;  %s10293_s4 = inlined_call_operand.hbm [shape: f32[1,512], index: 4, kind: input, shape index: {}]   ;;  %s10294_s5 = inlined_call_operand.hbm [shape: bf16[512,512], index: 5, kind: input, shape index: {}]   ;;  %s10295_s6 = inlined_call_operand.hbm [shape: f32[1,512], index: 6, kind: input, shape index: {}]   ;;  %s10296_s7 = inlined_call_operand.hbm [shape: bf16[512,128], index: 7, kind: input, shape index: {}]   ;;  %s10297_s8 = inlined_call_operand.hbm [shape: f32[1,128], index: 8, kind: input, shape index: {}]   ;;  %s10298_s9 = inlined_call_operand.vmem [shape: f32[16,128], index: 9, kind: output, shape index: {}]  }
   0x1   :  { %15 = vsyncpa [#allocation5], 0 }
   0x2   :  { %16 = vsyncpa [#allocation8], 0 }
   0x3   :  { %17 = vsyncpa [#allocation11], 0  ;;  %s37_s11 = sshll.u32 %s10291_s2, 4  ;;  %s38_s11 = int_to_ptr.hbm [resolvable:$true] %s37_s11 }
   0x4   :  { %18 = vsyncpa [#allocation14], 0  ;;  %s9681_s12 = smov [#allocation4]   ;;  %s61_s16 = sshll.u32 %s10293_s4, 4  ;;  %s62_s16 = int_to_ptr.hbm [resolvable:$true] %s61_s16 }
   0x5   :  { %s39_s13 = sshll.u32 %s9681_s12, 4  ;;  %s9682_s17 = smov [#allocation7]   ;;  %s40_s13 = int_to_ptr.vmem [resolvable:$true] %s39_s13 }
   0x6   :  { %42 = dma.hbm_to_vmem [thread:$0]  %s38_s11, 256, %s40_s13, [#allocation5]  }
   0x7   :  { %s63_s18 = sshll.u32 %s9682_s17, 4  ;;  %s85_s21 = sshll.u32 %s10295_s6, 4  ;;  %s64_s18 = int_to_ptr.vmem [resolvable:$true] %s63_s18  ;;  %s86_s21 = int_to_ptr.hbm [resolvable:$true] %s85_s21 }
   0x8   :  { %66 = dma.hbm_to_vmem [thread:$0]  %s62_s16, 64, %s64_s18, [#allocation8]  }
   0x9   :  { %s26_s23 = sshll.u32 %s10290_s1, 4  ;;  %s9683_s24 = smov [#allocation10]   ;;  %s27_s23 = int_to_ptr.hbm [resolvable:$true] %s26_s23 }
   0xa   :  { %s87_s25 = sshll.u32 %s9683_s24, 4  ;;  %s9684_s4 = smov [#allocation2]   ;;  %s88_s25 = int_to_ptr.vmem [resolvable:$true] %s87_s25 }
   0xb   :  { %90 = dma.hbm_to_vmem [thread:$0]  %s86_s21, 64, %s88_s25, [#allocation11]  }
   0xc   :  { %s28_s26 = sshll.u32 %s9684_s4, 4  ;;  %s47_s29 = sshll.u32 %s10292_s3, 4  ;;  %s29_s26 = int_to_ptr.vmem [resolvable:$true] %s28_s26  ;;  %s48_s29 = int_to_ptr.hbm [resolvable:$true] %s47_s29 }
   0xd   :  { %31 = dma.hbm_to_vmem [thread:$0]  %s27_s23, 1024, %s29_s26, [#allocation3]  }
   0xe   :  { %s9685_s6 = smov [#allocation6]   ;;  %s71_s1 = sshll.u32 %s10294_s5, 4  ;;  %s72_s1 = int_to_ptr.hbm [resolvable:$true] %s71_s1 }
   0xf   :  { %s49_s30 = sshll.u32 %s9685_s6, 4  ;;  %s9686_s12 = smov 256   ;;  %s50_s30 = int_to_ptr.vmem [resolvable:$true] %s49_s30 }
  0x10   :  { %s9687_s13 = smov 16   ;;  %s9688_s14 = smov [#allocation9]  }
  0x11   :  { %55 = dma.hbm_to_vmem [thread:$0]  %s48_s29, 65536, %s50_s30, [#allocation5], %s9686_s12, %s9686_s12, %s9687_s13  }
  0x12   :  { %s73_s15 = sshll.u32 %s9688_s14, 4  ;;  %s95_s3 = sshll.u32 %s10296_s7, 4  ;;  %s74_s15 = int_to_ptr.vmem [resolvable:$true] %s73_s15  ;;  %s96_s3 = int_to_ptr.hbm [resolvable:$true] %s95_s3 }
  0x13   :  { %79 = dma.hbm_to_vmem [thread:$0]  %s72_s1, 16384, %s74_s15, [#allocation8], %s9686_s12, %s9686_s12, %s9687_s13  }
  0x14   :  { %s9689_s18 = smov [#allocation12]   ;;  %s109_s5 = sshll.u32 %s10297_s8, 4  ;;  %s110_s5 = int_to_ptr.hbm [resolvable:$true] %s109_s5 }
  0x15   :  { %s97_s19 = sshll.u32 %s9689_s18, 4  ;;  %s9690_s2 = smov 64   ;;  %s98_s19 = int_to_ptr.vmem [resolvable:$true] %s97_s19 }
  0x16   :  { %s9691_s22 = smov 4   ;;  %s9692_s23 = smov [#allocation13]  }
  0x17   :  { %103 = dma.hbm_to_vmem [thread:$0]  %s96_s3, 4096, %s98_s19, [#allocation11], %s9690_s2, %s9690_s2, %s9691_s22  }
  0x18   :  { %s111_s24 = sshll.u32 %s9692_s23, 4  ;;  %s112_s24 = int_to_ptr.vmem [resolvable:$true] %s111_s24 }
  0x19   :  { %114 = dma.hbm_to_vmem [thread:$0]  %s110_s5, 16, %s112_s24, [#allocation14]  }
  0x1a   :  { %9671 = dma.done.wait [#allocation3], 1024  }
  0x1b   :  { %9672 = vsyncadd [#allocation3], 4294966272 }
  0x1c   :  { %9673 = dma.done.wait [#allocation5], 65792  }
  0x1d   :  { %9674 = vsyncadd [#allocation5], 4294901504 }
  0x1e   :  { %9675 = dma.done.wait [#allocation8], 16448  }
  0x1f   :  { %9676 = vsyncadd [#allocation8], 4294950848 }
  0x20   :  { %9677 = dma.done.wait [#allocation11], 4160  }
  0x21   :  { %9678 = vsyncadd [#allocation11], 4294963136 }
  0x22   :  { %9679 = dma.done.wait [#allocation14], 16  }
  0x23   :  { %9680 = vsyncadd [#allocation14], 4294967280  ;;  %v156_v0 = vld [vmem:[%s10289_s0 + $0x40] sm:$0xff]  ;;  %v150_v2 = vld [vmem:[%s10289_s0 + $0x10] sm:$0xff]  ;;  %vm436_vm0 = vcmask 1043456   ;;  %vm370_vm1 = vcmask 1041409  }
  0x24   :  { %v148_v1 = vld [vmem:[%s10289_s0] sm:$0xff]  ;;  %v180_v3 = vunpack.c.l.bf16 %v156_v0  ;;  %v181_v4 = vunpack.c.h.bf16 %v156_v0  ;;  %v168_v7 = vunpack.c.l.bf16 %v150_v2  ;;  %v169_v8 = vunpack.c.h.bf16 %v150_v2  ;;  %v157_v9 = vld [vmem:[%s10289_s0 + $0x48] sm:$0xff]  ;;  %v158_v13 = vld [vmem:[%s10289_s0 + $0x50] sm:$0xff] }
  0x25   :  { %v164_v5 = vunpack.c.l.bf16 %v148_v1  ;;  %v165_v6 = vunpack.c.h.bf16 %v148_v1  ;;  %v149_v10 = vld [vmem:[%s10289_s0 + $0x8] sm:$0xff]  ;;  %v182_v15 = vunpack.c.l.bf16 %v157_v9  ;;  %v183_v16 = vunpack.c.h.bf16 %v157_v9  ;;  %v159_v24 = vld [vmem:[%s10289_s0 + $0x58] sm:$0xff]  ;;  %v152_v26 = vld [vmem:[%s10289_s0 + $0x20] sm:$0xff] }
  0x26   :  { %v220_v11 = vadd.f32 %v181_v4, %v180_v3  ;;  %v202_v14 = vadd.f32 %v169_v8, %v168_v7  ;;  %v166_v17 = vunpack.c.l.bf16 %v149_v10  ;;  %v167_v18 = vunpack.c.h.bf16 %v149_v10  ;;  %v151_v25 = vld [vmem:[%s10289_s0 + $0x18] sm:$0xff]  ;;  %v153_v36 = vld [vmem:[%s10289_s0 + $0x28] sm:$0xff]  ;;  %v160_v37 = vld [vmem:[%s10289_s0 + $0x60] sm:$0xff] }
  0x27   :  { %v196_v12 = vadd.f32 %v165_v6, %v164_v5  ;;  %v184_v19 = vunpack.c.l.bf16 %v158_v13  ;;  %v185_v20 = vunpack.c.h.bf16 %v158_v13  ;;  %v223_v21 = vadd.f32 %v183_v16, %v182_v15  ;;  %v161_v38 = vld [vmem:[%s10289_s0 + $0x68] sm:$0xff]  ;;  %v162_v48 = vld [vmem:[%s10289_s0 + $0x70] sm:$0xff]  ;;  %v155_v50 = vld [vmem:[%s10289_s0 + $0x38] sm:$0xff] }
  0x28   :  { %221 = vadd.xlane.f32.xlu1 %v220_v11  ;;  %203 = vadd.xlane.f32.xlu2 %v202_v14  ;;  %v199_v22 = vadd.f32 %v167_v18, %v166_v17  ;;  %v186_v27 = vunpack.c.l.bf16 %v159_v24  ;;  %v187_v28 = vunpack.c.h.bf16 %v159_v24  ;;  %v170_v29 = vunpack.c.l.bf16 %v151_v25  ;;  %v154_v49 = vld [vmem:[%s10289_s0 + $0x30] sm:$0xff]  ;;  %v163_v60 = vld [vmem:[%s10289_s0 + $0x78] sm:$0xff]  ;;  %v276_v6 = vld [vmem:[#allocation2] sm:$0xff] }
  0x29   :  { %197 = vadd.xlane.f32.xlu0 %v196_v12  ;;  %v226_v23 = vadd.f32 %v185_v20, %v184_v19  ;;  %v171_v30 = vunpack.c.h.bf16 %v151_v25  ;;  %v172_v31 = vunpack.c.l.bf16 %v152_v26  ;;  %v173_v32 = vunpack.c.h.bf16 %v152_v26  ;;  %v277_v7 = vld [vmem:[#allocation2 + $0x8] sm:$0xff] }
  0x2a   :  { %v229_v33 = vadd.f32 %v187_v28, %v186_v27  ;;  %v174_v39 = vunpack.c.l.bf16 %v153_v36  ;;  %v175_v40 = vunpack.c.h.bf16 %v153_v36  ;;  %v188_v41 = vunpack.c.l.bf16 %v160_v37 }
  0x2b   :  { %v205_v34 = vadd.f32 %v171_v30, %v170_v29  ;;  %v208_v35 = vadd.f32 %v173_v32, %v172_v31  ;;  %v189_v42 = vunpack.c.h.bf16 %v160_v37  ;;  %v190_v43 = vunpack.c.l.bf16 %v161_v38  ;;  %v278_v29 = vld [vmem:[#allocation2 + $0x10] sm:$0xff]  ;;  %v279_v30 = vld [vmem:[#allocation2 + $0x18] sm:$0xff] }
  0x2c   :  { %v191_v44 = vunpack.c.h.bf16 %v161_v38  ;;  %v211_v45 = vadd.f32 %v175_v40, %v174_v39  ;;  %v192_v51 = vunpack.c.l.bf16 %v162_v48  ;;  %v193_v52 = vunpack.c.h.bf16 %v162_v48 }
  0x2d   :  { %v232_v46 = vadd.f32 %v189_v42, %v188_v41  ;;  %v176_v53 = vunpack.c.l.bf16 %v154_v49  ;;  %v177_v54 = vunpack.c.h.bf16 %v154_v49  ;;  %v178_v55 = vunpack.c.l.bf16 %v155_v50 }
  0x2e   :  { %v235_v47 = vadd.f32 %v191_v44, %v190_v43  ;;  %v179_v56 = vunpack.c.h.bf16 %v155_v50  ;;  %v238_v57 = vadd.f32 %v193_v52, %v192_v51  ;;  %v194_v61 = vunpack.c.l.bf16 %v163_v60 }
  0x2f   :  { %v214_v58 = vadd.f32 %v177_v54, %v176_v53  ;;  %v195_v62 = vunpack.c.h.bf16 %v163_v60  ;;  %v400_v8 = vunpack.c.l.b16 %v276_v6  ;;  %v401_v9 = vunpack.c.h.b16 %v276_v6 }
  0x30   :  { %224 = vadd.xlane.f32.xlu1 %v223_v21  ;;  %227 = vadd.xlane.f32.xlu2 %v226_v23  ;;  %v217_v59 = vadd.f32 %v179_v56, %v178_v55  ;;  %v402_v10 = vunpack.c.l.b16 %v277_v7  ;;  %v403_v11 = vunpack.c.h.b16 %v277_v7  ;;  %v352_v26 = vlaneseq }
  0x31   :  { %200 = vadd.xlane.f32.xlu0 %v199_v22  ;;  %v241_v63 = vadd.f32 %v195_v62, %v194_v61  ;;  %v416_v12 = vpack.c.b16 %v400_v8, %v400_v8  ;;  %v417_v13 = vpack.c.b16 %v401_v9, %v401_v9  ;;  %v404_v32 = vunpack.c.l.b16 %v278_v29 }
  0x32   :  { %v418_v14 = vpack.c.b16 %v402_v10, %v402_v10  ;;  %v419_v15 = vpack.c.b16 %v403_v11, %v403_v11  ;;  %v407_v38 = vunpack.c.h.b16 %v279_v30  ;;  %vm372_vm2 = vcmask 1042434  }
  0x33   :  { %v438_v18 = vsel %vm436_vm0, %v416_v12, 0  ;;  %v441_v19 = vsel %vm436_vm0, %v417_v13, 0  ;;  %v420_v42 = vpack.c.b16 %v404_v32, %v404_v32  ;;  %vm374_vm3 = vcmask 1043459  }
  0x34   :  { %v444_v20 = vsel %vm436_vm0, %v418_v14, 0  ;;  %492 = vmatpush.bf16.msra.mxu0 %v438_v18  ;;  %506 = vmatpush.bf16.msra.mxu1 %v441_v19  ;;  %v447_v23 = vsel %vm436_vm0, %v419_v15, 0  ;;  %v423_v56 = vpack.c.b16 %v407_v38, %v407_v38  ;;  %vm376_vm4 = vcmask 1044484  }
  0x35   :  { %520 = vmatpush.bf16.msra.mxu2 %v444_v20  ;;  %534 = vmatpush.bf16.msra.mxu3 %v447_v23  ;;  %v450_v51 = vsel %vm436_vm0, %v420_v42, 0  ;;  %vm378_vm5 = vcmask 1045509   ;;  %vm380_vm6 = vcmask 1046534   ;;  %vm382_vm7 = vcmask 1047559  }
  0x36   :  { %vm432_vm8 = vcmask 64512  }
  0x38   :  { %230 = vadd.xlane.f32.xlu1 %v229_v33  ;;  %209 = vadd.xlane.f32.xlu2 %v208_v35  ;;  %v405_v33 = vunpack.c.h.b16 %v278_v29 }
  0x39   :  { %206 = vadd.xlane.f32.xlu0 %v205_v34  ;;  %v406_v34 = vunpack.c.l.b16 %v279_v30  ;;  %548 = vmatpush.bf16.msrb.mxu0 %v450_v51 }
  0x3a   :  { %v421_v43 = vpack.c.b16 %v405_v33, %v405_v33 }
  0x3b   :  { %v422_v44 = vpack.c.b16 %v406_v34, %v406_v34 }
  0x3c   :  { %v453_v52 = vsel %vm436_vm0, %v421_v43, 0 }
  0x3d   :  { %562 = vmatpush.bf16.msrb.mxu1 %v453_v52  ;;  %v456_v55 = vsel %vm436_vm0, %v422_v44, 0 }
  0x3e   :  { %576 = vmatpush.bf16.msrb.mxu2 %v456_v55 }
  0x40   :  { %212 = vadd.xlane.f32.xlu1 %v211_v45  ;;  %236 = vadd.xlane.f32.xlu2 %v235_v47  ;;  %v9819_v45 = vand.u32 127, %v352_v26 }
  0x41   :  { %233 = vadd.xlane.f32.xlu0 %v232_v46 }
  0x48   :  { %239 = vadd.xlane.f32.xlu1 %v238_v57  ;;  %218 = vadd.xlane.f32.xlu2 %v217_v59 }
  0x49   :  { %215 = vadd.xlane.f32.xlu0 %v214_v58 }
  0x51   :  { %242 = vadd.xlane.f32.xlu0 %v241_v63  ;;  %v459_v63 = vsel %vm436_vm0, %v423_v56, 0 }
  0x52   :  { %590 = vmatpush.bf16.msrb.mxu3 %v459_v63 }
  0x9b   :  { %v222_v0 = vpop.xlane.xlu1 %221  ;;  %v204_v2 = vpop.xlane.xlu2 %203 }
  0x9c   :  { %v198_v1 = vpop.xlane.xlu0 %197  ;;  %v252_v22 = vmul.f32 0.00390625, %v222_v0  ;;  %v246_v27 = vmul.f32 0.00390625, %v204_v2 }
  0x9d   :  { %v244_v24 = vmul.f32 0.00390625, %v198_v1 }
  0x9e   :  { %v268_v31 = vpack.c.bf16 %v252_v22, %v252_v22  ;;  %v262_v46 = vpack.c.bf16 %v246_v27, %v246_v27 }
  0x9f   :  { %v260_v35 = vpack.c.bf16 %v244_v24, %v244_v24 }
  0xa0   :  { %v344_v57 = vunpack.c.l.b16 %v268_v31  ;;  %v338_v0 = vunpack.c.l.b16 %v262_v46  ;;  %v281_v46 = vld [vmem:[#allocation2 + $0x28] sm:$0xff] }
  0xa1   :  { %v336_v58 = vunpack.c.l.b16 %v260_v35  ;;  %v410_v56 = vunpack.c.l.b16 %v281_v46 }
  0xa2   :  { %v362_v6 = vperm.slane %v344_v57, %v9819_v45  ;;  %v411_v57 = vunpack.c.h.b16 %v281_v46 }
  0xa3   :  { %v225_v3 = vpop.xlane.xlu1 %224  ;;  %v228_v5 = vpop.xlane.xlu2 %227  ;;  %v354_v7 = vperm.slane %v336_v58, %v9819_v45 }
  0xa4   :  { %v201_v4 = vpop.xlane.xlu0 %200  ;;  %v253_v28 = vmul.f32 0.00390625, %v225_v3  ;;  %v254_v39 = vmul.f32 0.00390625, %v228_v5 }
  0xa5   :  { %v245_v25 = vmul.f32 0.00390625, %v201_v4 }
  0xa6   :  { %v269_v47 = vpack.c.bf16 %v253_v28, %v253_v28  ;;  %v270_v59 = vpack.c.bf16 %v254_v39, %v254_v39 }
  0xa7   :  { %v261_v36 = vpack.c.bf16 %v245_v25, %v245_v25 }
  0xa8   :  { %v345_v61 = vunpack.c.l.b16 %v269_v47  ;;  %v346_v8 = vunpack.c.l.b16 %v270_v59 }
  0xa9   :  { %v337_v53 = vunpack.c.l.b16 %v261_v36 }
  0xaa   :  { %v363_v12 = vperm.slane %v345_v61, %v9819_v45  ;;  %v364_v28 = vperm.slane %v346_v8, %v9819_v45 }
  0xab   :  { %v231_v16 = vpop.xlane.xlu1 %230  ;;  %v210_v21 = vpop.xlane.xlu2 %209  ;;  %v355_v3 = vperm.slane %v337_v53, %v9819_v45 }
  0xac   :  { %v207_v17 = vpop.xlane.xlu0 %206  ;;  %v255_v49 = vmul.f32 0.00390625, %v231_v16  ;;  %v248_v50 = vmul.f32 0.00390625, %v210_v21  ;;  %v384_v27 = vsel %vm370_vm1, %v363_v12, %v362_v6  ;;  %v283_v12 = vld [vmem:[#allocation2 + $0x38] sm:$0xff] }
  0xad   :  { %v247_v37 = vmul.f32 0.00390625, %v207_v17  ;;  %v356_v17 = vperm.slane %v338_v0, %v9819_v45  ;;  %v371_v21 = vsel %vm370_vm1, %v355_v3, %v354_v7  ;;  %v426_v3 = vpack.c.b16 %v410_v56, %v410_v56  ;;  %v6570_v56 = vld [vmem:[#allocation6 + $0x3a0] sm:$0xf] }
  0xae   :  { %v271_v1 = vpack.c.bf16 %v255_v49, %v255_v49  ;;  %v264_v2 = vpack.c.bf16 %v248_v50, %v248_v50 }
  0xaf   :  { %v263_v54 = vpack.c.bf16 %v247_v37, %v247_v37  ;;  %v373_v32 = vsel %vm372_vm2, %v356_v17, %v371_v21 }
  0xb0   :  { %v347_v18 = vunpack.c.l.b16 %v271_v1  ;;  %v340_v19 = vunpack.c.l.b16 %v264_v2 }
  0xb1   :  { %v339_v4 = vunpack.c.l.b16 %v263_v54 }
  0xb2   :  { %v365_v31 = vperm.slane %v347_v18, %v9819_v45  ;;  %v358_v33 = vperm.slane %v340_v19, %v9819_v45 }
  0xb3   :  { %v213_v40 = vpop.xlane.xlu1 %212  ;;  %v237_v48 = vpop.xlane.xlu2 %236  ;;  %v357_v22 = vperm.slane %v339_v4, %v9819_v45  ;;  %v427_v4 = vpack.c.b16 %v411_v57, %v411_v57  ;;  %v8910_v57 = vld [vmem:[#allocation6 + $0x3ac] sm:$0xf0] }
  0xb4   :  { %v234_v41 = vpop.xlane.xlu0 %233  ;;  %v249_v62 = vmul.f32 0.00390625, %v213_v40  ;;  %v257_v5 = vmul.f32 0.00390625, %v237_v48  ;;  %v280_v40 = vld [vmem:[#allocation2 + $0x20] sm:$0xff] }
  0xb5   :  { %v256_v60 = vmul.f32 0.00390625, %v234_v41  ;;  %v375_v35 = vsel %vm374_vm3, %v357_v22, %v373_v32  ;;  %v385_v41 = vsel %vm372_vm2, %v364_v28, %v384_v27  ;;  %v408_v52 = vunpack.c.l.b16 %v280_v40  ;;  %v6346_v27 = vld [vmem:[#allocation6 + $0x1e0] sm:$0xf]  ;;  %v8854_v28 = vld [vmem:[#allocation6 + $0x1ec] sm:$0xf0] }
  0xb6   :  { %v265_v13 = vpack.c.bf16 %v249_v62, %v249_v62  ;;  %v273_v23 = vpack.c.bf16 %v257_v5, %v257_v5  ;;  %v386_v47 = vsel %vm374_vm3, %v365_v31, %v385_v41  ;;  %v377_v48 = vsel %vm376_vm4, %v358_v33, %v375_v35  ;;  %v6602_v31 = vld [vmem:[#allocation6 + $0x3e0] sm:$0xf]  ;;  %v8918_v32 = vld [vmem:[#allocation6 + $0x3ec] sm:$0xf0] }
  0xb7   :  { %v272_v9 = vpack.c.bf16 %v256_v60, %v256_v60  ;;  %v409_v53 = vunpack.c.h.b16 %v280_v40  ;;  %v424_v0 = vpack.c.b16 %v408_v52, %v408_v52  ;;  %v6202_v35 = vld [vmem:[#allocation6 + $0xc0] sm:$0xf]  ;;  %v6603_v40 = vor.u32 %v8918_v32, %v6602_v31 }
  0xb8   :  { %v341_v29 = vunpack.c.l.b16 %v265_v13  ;;  %v349_v36 = vunpack.c.l.b16 %v273_v23  ;;  %v6458_v41 = vld [vmem:[#allocation6 + $0x2c0] sm:$0xf] }
  0xb9   :  { %v348_v25 = vunpack.c.l.b16 %v272_v9  ;;  %v425_v1 = vpack.c.b16 %v409_v53, %v409_v53  ;;  %v462_v8 = vsel %vm436_vm0, %v424_v0, 0  ;;  %v6122_v32 = vld [vmem:[#allocation6 + $0x20] sm:$0xf] }
  0xba   :  { %v359_v42 = vperm.slane %v341_v29, %v9819_v45  ;;  %v367_v50 = vperm.slane %v349_v36, %v9819_v45  ;;  %v6474_v29 = vld [vmem:[#allocation6 + $0x2e0] sm:$0xf]  ;;  %v8818_v36 = vld [vmem:[#allocation6 + $0xcc] sm:$0xf0] }
  0xbb   :  { %v240_v10 = vpop.xlane.xlu1 %239  ;;  %v219_v16 = vpop.xlane.xlu2 %218  ;;  %v366_v37 = vperm.slane %v348_v25, %v9819_v45  ;;  %v465_v9 = vsel %vm436_vm0, %v425_v1, 0  ;;  %v6218_v25 = vld [vmem:[#allocation6 + $0xe0] sm:$0xf]  ;;  %v6203_v46 = vor.u32 %v8818_v36, %v6202_v35  ;;  %v6571_v1 = vor.u32 %v8910_v57, %v6570_v56  ;;  %v8830_v35 = vld [vmem:[#allocation6 + $0x12c] sm:$0xf0] }
  0xbc   :  { %v216_v11 = vpop.xlane.xlu0 %215  ;;  %v258_v14 = vmul.f32 0.00390625, %v240_v10  ;;  %v251_v20 = vmul.f32 0.00390625, %v219_v16  ;;  %v379_v58 = vsel %vm378_vm5, %v359_v42, %v377_v48  ;;  %v471_v10 = vsel %vm436_vm0, %v427_v4, 0  ;;  %v8882_v42 = vld [vmem:[#allocation6 + $0x2cc] sm:$0xf0] }
  0xbd   :  { %v250_v15 = vmul.f32 0.00390625, %v216_v11  ;;  %v387_v54 = vsel %vm376_vm4, %v366_v37, %v386_v47  ;;  %v282_v11 = vld [vmem:[#allocation2 + $0x30] sm:$0xff]  ;;  %v415_v16 = vunpack.c.h.b16 %v283_v12  ;;  %v6459_v52 = vor.u32 %v8882_v42, %v6458_v41  ;;  %v8894_v41 = vld [vmem:[#allocation6 + $0x32c] sm:$0xf0] }
  0xbe   :  { %v274_v26 = vpack.c.bf16 %v258_v14, %v258_v14  ;;  %v267_v30 = vpack.c.bf16 %v251_v20, %v251_v20  ;;  %v388_v62 = vsel %vm378_vm5, %v367_v50, %v387_v54  ;;  %v412_v13 = vunpack.c.l.b16 %v282_v11  ;;  %v6330_v37 = vld [vmem:[#allocation6 + $0x1c0] sm:$0xf]  ;;  %v8890_v57 = vld [vmem:[#allocation6 + $0x30c] sm:$0xf0] }
  0xbf   :  { %v266_v24 = vpack.c.bf16 %v250_v15, %v250_v15  ;;  %v413_v14 = vunpack.c.h.b16 %v282_v11  ;;  %v414_v15 = vunpack.c.l.b16 %v283_v12  ;;  %v431_v20 = vpack.c.b16 %v415_v16, %v415_v16  ;;  %v6186_v48 = vld [vmem:[#allocation6 + $0xa0] sm:$0xf]  ;;  %v8838_v11 = vld [vmem:[#allocation6 + $0x16c] sm:$0xf0] }
  0xc0   :  { %v350_v38 = vunpack.c.l.b16 %v274_v26  ;;  %v343_v43 = vunpack.c.l.b16 %v267_v30  ;;  %v428_v17 = vpack.c.b16 %v412_v13, %v412_v13  ;;  %v8822_v26 = vld [vmem:[#allocation6 + $0xec] sm:$0xf0]  ;;  %v6314_v50 = vld [vmem:[#allocation6 + $0x1a0] sm:$0xf] }
  0xc1   :  { %v342_v34 = vunpack.c.l.b16 %v266_v24  ;;  %v429_v18 = vpack.c.b16 %v413_v14, %v413_v14  ;;  %v430_v19 = vpack.c.b16 %v414_v15, %v414_v15  ;;  %v483_v24 = vsel %vm436_vm0, %v431_v20, 0  ;;  %v8886_v30 = vld [vmem:[#allocation6 + $0x2ec] sm:$0xf0]  ;;  %v6442_v54 = vld [vmem:[#allocation6 + $0x2a0] sm:$0xf] }
  0xc2   :  { %v368_v55 = vperm.slane %v350_v38, %v9819_v45  ;;  %v361_v59 = vperm.slane %v343_v43, %v9819_v45  ;;  %v474_v21 = vsel %vm436_vm0, %v428_v17, 0  ;;  %v6219_v33 = vor.u32 %v8822_v26, %v6218_v25  ;;  %v8850_v38 = vld [vmem:[#allocation6 + $0x1cc] sm:$0xf0]  ;;  %v6586_v43 = vld [vmem:[#allocation6 + $0x3c0] sm:$0xf] }
  0xc3   :  { %v360_v49 = vperm.slane %v342_v34, %v9819_v45  ;;  %v477_v22 = vsel %vm436_vm0, %v429_v18, 0  ;;  %v480_v23 = vsel %vm436_vm0, %v430_v19, 0  ;;  %v6347_v34 = vor.u32 %v8854_v28, %v6346_v27  ;;  %v6554_v4 = vld [vmem:[#allocation6 + $0x380] sm:$0xf]  ;;  %v8870_v15 = vld [vmem:[#allocation6 + $0x26c] sm:$0xf0] }
  0xc4   :  { %v243_v39 = vpop.xlane.xlu0 %242  ;;  %v389_v2 = vsel %vm380_vm6, %v368_v55, %v388_v62  ;;  %v6331_v47 = vor.u32 %v8850_v38, %v6330_v37  ;;  %v8878_v55 = vld [vmem:[#allocation6 + $0x2ac] sm:$0xf0]  ;;  %v6298_v62 = vld [vmem:[#allocation6 + $0x180] sm:$0xf] }
  0xc5   :  { %v259_v44 = vmul.f32 0.00390625, %v243_v39  ;;  %v381_v61 = vsel %vm380_vm6, %v360_v49, %v379_v58  ;;  %v6475_v39 = vor.u32 %v8886_v30, %v6474_v29  ;;  %v8814_v49 = vld [vmem:[#allocation6 + $0xac] sm:$0xf0]  ;;  %v6443_v0 = vor.u32 %v8878_v55, %v6442_v54  ;;  %v6410_v14 = vld [vmem:[#allocation6 + $0x260] sm:$0xf] }
  0xc6   :  { %v383_v5 = vsel %vm382_vm7, %v361_v59, %v381_v61  ;;  %v6187_v58 = vor.u32 %v8814_v49, %v6186_v48  ;;  %v8810_v61 = vld [vmem:[#allocation6 + $0x8c] sm:$0xf0]  ;;  %v6538_v16 = vld [vmem:[#allocation6 + $0x360] sm:$0xf] }
  0xc7   :  { %v275_v51 = vpack.c.bf16 %v259_v44, %v259_v44  ;;  %v8914_v44 = vld [vmem:[#allocation6 + $0x3cc] sm:$0xf0]  ;;  %v6138_v20 = vld [vmem:[#allocation6 + $0x40] sm:$0xf] }
  0xc8   :  { %v6587_v53 = vor.u32 %v8914_v44, %v6586_v43  ;;  %v8902_v17 = vld [vmem:[#allocation6 + $0x36c] sm:$0xf0]  ;;  %v6394_v26 = vld [vmem:[#allocation6 + $0x240] sm:$0xf] }
  0xc9   :  { %v351_v60 = vunpack.c.l.b16 %v275_v51  ;;  %v8846_v51 = vld [vmem:[#allocation6 + $0x1ac] sm:$0xf0]  ;;  %v6539_v25 = vor.u32 %v8902_v17, %v6538_v16  ;;  %v6522_v28 = vld [vmem:[#allocation6 + $0x340] sm:$0xf] }
  0xca   :  { %v6315_v59 = vor.u32 %v8846_v51, %v6314_v50  ;;  %v8866_v27 = vld [vmem:[#allocation6 + $0x24c] sm:$0xf0]  ;;  %v6378_v38 = vld [vmem:[#allocation6 + $0x220] sm:$0xf] }
  0xcb   :  { %v369_v63 = vperm.slane %v351_v60, %v9819_v45  ;;  %v468_v45 = vsel %vm436_vm0, %v426_v3, 0  ;;  %v6170_v60 = vld [vmem:[#allocation6 + $0x80] sm:$0xf]  ;;  %v8874_v3 = vld [vmem:[#allocation6 + $0x28c] sm:$0xf0]  ;;  %v6395_v36 = vor.u32 %v8866_v27, %v6394_v26 }
  0xcc   :  { %v8898_v29 = vld [vmem:[#allocation6 + $0x34c] sm:$0xf0]  ;;  %v6106_v42 = vld [vmem:[#allocation6] sm:$0xf] }
  0xcd   :  { %v390_v6 = vsel %vm382_vm7, %v369_v63, %v389_v2  ;;  %v8842_v63 = vld [vmem:[#allocation6 + $0x18c] sm:$0xf0]  ;;  %v6426_v2 = vld [vmem:[#allocation6 + $0x280] sm:$0xf]  ;;  %v6523_v37 = vor.u32 %v8898_v29, %v6522_v28 }
  0xce   :  { %v9853_v7 = vpack.c.b16 %v390_v6, %v383_v5  ;;  %v8906_v5 = vld [vmem:[#allocation6 + $0x38c] sm:$0xf0]  ;;  %v6171_v6 = vor.u32 %v8810_v61, %v6170_v60  ;;  %v6427_v12 = vor.u32 %v8874_v3, %v6426_v2  ;;  %v6730_v48 = vld [vmem:[#allocation6 + $0x4e0] sm:$0xf] }
  0xcf   :  { %v6555_v13 = vor.u32 %v8906_v5, %v6554_v4  ;;  %v8794_v44 = vld [vmem:[#allocation6 + $0xc] sm:$0xf0]  ;;  %v6858_v50 = vld [vmem:[#allocation6 + $0x5e0] sm:$0xf] }
  0xd0   :  { %6088 = vmatmul.msk.bf16.vlgmr.msra.gmra.mxu0 %vm432_vm8, %v9853_v7  ;;  %6089 = vmatmul.msk.bf16.vlgmr.msra.gmra.mxu1 %vm432_vm8, %v9853_v7  ;;  %v8950_v49 = vld [vmem:[#allocation6 + $0x4ec] sm:$0xf0]  ;;  %v6362_v54 = vld [vmem:[#allocation6 + $0x200] sm:$0xf] }
  0xd1   :  { %6090 = vmatmul.msk.bf16.vlgmr.msra.gmra.mxu2 %vm432_vm8, %v9853_v7  ;;  %6091 = vmatmul.msk.bf16.vlgmr.msra.gmra.mxu3 %vm432_vm8, %v9853_v7  ;;  %v8858_v55 = vld [vmem:[#allocation6 + $0x20c] sm:$0xf0]  ;;  %v6490_v56 = vld [vmem:[#allocation6 + $0x300] sm:$0xf] }
  0xd2   :  { %604 = vmatpush.bf16.msra.mxu0 %v462_v8  ;;  %618 = vmatpush.bf16.msra.mxu1 %v465_v9  ;;  %v6299_v8 = vor.u32 %v8842_v63, %v6298_v62  ;;  %v6154_v9 = vld [vmem:[#allocation6 + $0x60] sm:$0xf]  ;;  %v9014_v61 = vld [vmem:[#allocation6 + $0x6ec] sm:$0xf0] }
  0xd3   :  { %632 = vmatpush.bf16.msra.mxu2 %v468_v45  ;;  %646 = vmatpush.bf16.msra.mxu3 %v471_v10  ;;  %v8806_v45 = vld [vmem:[#allocation6 + $0x6c] sm:$0xf0]  ;;  %v6282_v10 = vld [vmem:[#allocation6 + $0x160] sm:$0xf] }
  0xd4   :  { %v6155_v18 = vor.u32 %v8806_v45, %v6154_v9  ;;  %v6283_v19 = vor.u32 %v8838_v11, %v6282_v10  ;;  %v7114_v62 = vld [vmem:[#allocation6 + $0x7e0] sm:$0xf]  ;;  %v9046_v63 = vld [vmem:[#allocation6 + $0x7ec] sm:$0xf0] }
  0xd5   :  { %v6714_v2 = vld [vmem:[#allocation6 + $0x4c0] sm:$0xf]  ;;  %v8946_v3 = vld [vmem:[#allocation6 + $0x4cc] sm:$0xf0]  ;;  %v7115_v45 = vor.u32 %v9046_v63, %v7114_v62 }
  0xd6   :  { %v6842_v4 = vld [vmem:[#allocation6 + $0x5c0] sm:$0xf]  ;;  %v8978_v5 = vld [vmem:[#allocation6 + $0x5cc] sm:$0xf0] }
  0xd7   :  { %v6970_v10 = vld [vmem:[#allocation6 + $0x6c0] sm:$0xf]  ;;  %v9010_v11 = vld [vmem:[#allocation6 + $0x6cc] sm:$0xf0] }
  0xd8   :  { %v6698_v16 = vld [vmem:[#allocation6 + $0x4a0] sm:$0xf]  ;;  %v8942_v17 = vld [vmem:[#allocation6 + $0x4ac] sm:$0xf0] }
  0xd9   :  { %v6810_v26 = vld [vmem:[#allocation6 + $0x580] sm:$0xf]  ;;  %v8970_v27 = vld [vmem:[#allocation6 + $0x58c] sm:$0xf0] }
  0xda   :  { %v6811_v29 = vor.u32 %v8970_v27, %v6810_v26  ;;  %v6762_v62 = vld [vmem:[#allocation6 + $0x520] sm:$0xf]  ;;  %v9895_v26 = vld [vmem:[#allocation4] sm:$0xff] }
  0xe0   :  { %6092 = vmatmul.msk.bf16.vlgmr.msrb.gmra.mxu0 %vm432_vm8, %v9853_v7  ;;  %6093 = vmatmul.msk.bf16.vlgmr.msrb.gmra.mxu1 %vm432_vm8, %v9853_v7 }
  0xe1   :  { %6094 = vmatmul.msk.bf16.vlgmr.msrb.gmra.mxu2 %vm432_vm8, %v9853_v7  ;;  %6095 = vmatmul.msk.bf16.vlgmr.msrb.gmra.mxu3 %vm432_vm8, %v9853_v7 }
  0xe2   :  { %660 = vmatpush.bf16.msrb.mxu0 %v474_v21  ;;  %674 = vmatpush.bf16.msrb.mxu1 %v477_v22  ;;  %v8802_v21 = vld [vmem:[#allocation6 + $0x4c] sm:$0xf0]  ;;  %v6266_v22 = vld [vmem:[#allocation6 + $0x140] sm:$0xf] }
  0xe3   :  { %688 = vmatpush.bf16.msrb.mxu2 %v480_v23  ;;  %702 = vmatpush.bf16.msrb.mxu3 %v483_v24  ;;  %v8834_v23 = vld [vmem:[#allocation6 + $0x14c] sm:$0xf0]  ;;  %v6411_v24 = vor.u32 %v8870_v15, %v6410_v14  ;;  %v6139_v30 = vor.u32 %v8802_v21, %v6138_v20  ;;  %v6715_v14 = vor.u32 %v8946_v3, %v6714_v2  ;;  %v6906_v2 = vld [vmem:[#allocation6 + $0x640] sm:$0xf] }
  0xe4   :  { %v6267_v31 = vor.u32 %v8834_v23, %v6266_v22  ;;  %v6843_v15 = vor.u32 %v8978_v5, %v6842_v4  ;;  %v6971_v20 = vor.u32 %v9010_v11, %v6970_v10  ;;  %v6699_v22 = vor.u32 %v8942_v17, %v6698_v16  ;;  %v8994_v3 = vld [vmem:[#allocation6 + $0x64c] sm:$0xf0]  ;;  %v7034_v4 = vld [vmem:[#allocation6 + $0x740] sm:$0xf] }
  0xe5   :  { %v6907_v5 = vor.u32 %v8994_v3, %v6906_v2  ;;  %v6746_v10 = vld [vmem:[#allocation6 + $0x500] sm:$0xf]  ;;  %v9022_v17 = vld [vmem:[#allocation6 + $0x72c] sm:$0xf0] }
  0xe6   :  { %v7018_v16 = vld [vmem:[#allocation6 + $0x720] sm:$0xf] }
  0xf0   :  { %6096 = vmatmul.msk.bf16.vlgmr.msra.gmra.mxu0 %vm432_vm8, %v9853_v7  ;;  %6097 = vmatmul.msk.bf16.vlgmr.msra.gmra.mxu1 %vm432_vm8, %v9853_v7 }
  0xf1   :  { %6098 = vmatmul.msk.bf16.vlgmr.msra.gmra.mxu2 %vm432_vm8, %v9853_v7  ;;  %6099 = vmatmul.msk.bf16.vlgmr.msra.gmra.mxu3 %vm432_vm8, %v9853_v7 }
  0xf2   :  { %3839 = vmatpush.bf16.msra.mxu0 %v6219_v33  ;;  %3853 = vmatpush.bf16.msra.mxu1 %v6347_v34  ;;  %v8798_v33 = vld [vmem:[#allocation6 + $0x2c] sm:$0xf0]  ;;  %v6250_v34 = vld [vmem:[#allocation6 + $0x120] sm:$0xf] }
  0xf3   :  { %3867 = vmatpush.bf16.msra.mxu2 %v6475_v39  ;;  %3881 = vmatpush.bf16.msra.mxu3 %v6603_v40  ;;  %v8862_v39 = vld [vmem:[#allocation6 + $0x22c] sm:$0xf0]  ;;  %v6506_v40 = vld [vmem:[#allocation6 + $0x320] sm:$0xf]  ;;  %v6251_v43 = vor.u32 %v8830_v35, %v6250_v34 }
  0xf4   :  { %v6379_v51 = vor.u32 %v8862_v39, %v6378_v38  ;;  %v9038_v34 = vld [vmem:[#allocation6 + $0x7ac] sm:$0xf0]  ;;  %v6794_v39 = vld [vmem:[#allocation6 + $0x560] sm:$0xf] }
  0xf6   :  { %3840 = vmatpush.bf16.msra.mxu0 %v6203_v46  ;;  %3854 = vmatpush.bf16.msra.mxu1 %v6331_v47  ;;  %v6234_v46 = vld [vmem:[#allocation6 + $0x100] sm:$0xf]  ;;  %v8826_v47 = vld [vmem:[#allocation6 + $0x10c] sm:$0xf0] }
  0xf7   :  { %3868 = vmatpush.bf16.msra.mxu2 %v6459_v52  ;;  %3882 = vmatpush.bf16.msra.mxu3 %v6587_v53  ;;  %v6507_v52 = vor.u32 %v8894_v41, %v6506_v40  ;;  %v8982_v53 = vld [vmem:[#allocation6 + $0x5ec] sm:$0xf0]  ;;  %v6235_v60 = vor.u32 %v8826_v47, %v6234_v46 }
  0xf8   :  { %v8966_v40 = vld [vmem:[#allocation6 + $0x56c] sm:$0xf0] }
  0xf9   :  { %v6795_v41 = vor.u32 %v8966_v40, %v6794_v39  ;;  %v9034_v46 = vld [vmem:[#allocation6 + $0x78c] sm:$0xf0] }
  0xfa   :  { %3841 = vmatpush.bf16.msra.mxu0 %v6187_v58  ;;  %3855 = vmatpush.bf16.msra.mxu1 %v6315_v59  ;;  %v6986_v58 = vld [vmem:[#allocation6 + $0x6e0] sm:$0xf]  ;;  %v6107_v59 = vor.u32 %v8794_v44, %v6106_v42  ;;  %v9078_v40 = vld [vmem:[#allocation6 + $0x8ec] sm:$0xf0] }
  0xfb   :  { %3869 = vmatpush.bf16.msra.mxu2 %v6443_v0  ;;  %3883 = vmatpush.bf16.msra.mxu3 %v6571_v1  ;;  %v6731_v0 = vor.u32 %v8950_v49, %v6730_v48  ;;  %v6859_v1 = vor.u32 %v8982_v53, %v6858_v50  ;;  %v6987_v9 = vor.u32 %v9014_v61, %v6986_v58  ;;  %v6938_v42 = vld [vmem:[#allocation6 + $0x680] sm:$0xf]  ;;  %v8930_v49 = vld [vmem:[#allocation6 + $0x44c] sm:$0xf0] }
  0xfc   :  { %v6650_v48 = vld [vmem:[#allocation6 + $0x440] sm:$0xf]  ;;  %v9030_v58 = vld [vmem:[#allocation6 + $0x76c] sm:$0xf0] }
  0xfd   :  { %v6778_v50 = vld [vmem:[#allocation6 + $0x540] sm:$0xf]  ;;  %v8926_v61 = vld [vmem:[#allocation6 + $0x42c] sm:$0xf0] }
  0xfe   :  { %3842 = vmatpush.bf16.msra.mxu0 %v6171_v6  ;;  %3856 = vmatpush.bf16.msra.mxu1 %v6299_v8  ;;  %v6363_v6 = vor.u32 %v8858_v55, %v6362_v54  ;;  %v6491_v8 = vor.u32 %v8890_v57, %v6490_v56  ;;  %v6922_v54 = vld [vmem:[#allocation6 + $0x660] sm:$0xf]  ;;  %v8998_v55 = vld [vmem:[#allocation6 + $0x66c] sm:$0xf0] }
  0xff   :  { %3870 = vmatpush.bf16.msra.mxu2 %v6427_v12  ;;  %3884 = vmatpush.bf16.msra.mxu3 %v6555_v13  ;;  %v7098_v12 = vld [vmem:[#allocation6 + $0x7c0] sm:$0xf]  ;;  %v9042_v13 = vld [vmem:[#allocation6 + $0x7cc] sm:$0xf0]  ;;  %v6923_v56 = vor.u32 %v8998_v55, %v6922_v54 }
 0x100   :  { %6100 = vmatmul.msk.bf16.vlgmr.msrb.gmra.mxu0 %vm432_vm8, %v9853_v7  ;;  %6101 = vmatmul.msk.bf16.vlgmr.msrb.gmra.mxu1 %vm432_vm8, %v9853_v7  ;;  %v7099_v21 = vor.u32 %v9042_v13, %v7098_v12  ;;  %v7050_v57 = vld [vmem:[#allocation6 + $0x760] sm:$0xf]  ;;  %v8954_v12 = vld [vmem:[#allocation6 + $0x50c] sm:$0xf0] }
 0x101   :  { %6102 = vmatmul.msk.bf16.vlgmr.msrb.gmra.mxu2 %vm432_vm8, %v9853_v7  ;;  %6103 = vmatmul.msk.bf16.vlgmr.msrb.gmra.mxu3 %vm432_vm8, %v9853_v7  ;;  %v6123_v7 = vor.u32 %v8798_v33, %v6122_v32  ;;  %v7082_v32 = vld [vmem:[#allocation6 + $0x7a0] sm:$0xf]  ;;  %v6747_v13 = vor.u32 %v8954_v12, %v6746_v10 }
 0x102   :  { %3843 = vmatpush.bf16.msra.mxu0 %v6155_v18  ;;  %3857 = vmatpush.bf16.msra.mxu1 %v6283_v19  ;;  %v6826_v18 = vld [vmem:[#allocation6 + $0x5a0] sm:$0xf]  ;;  %v8974_v19 = vld [vmem:[#allocation6 + $0x5ac] sm:$0xf0]  ;;  %v7083_v35 = vor.u32 %v9038_v34, %v7082_v32 }
 0x103   :  { %3871 = vmatpush.bf16.msra.mxu2 %v6411_v24  ;;  %3885 = vmatpush.bf16.msra.mxu3 %v6539_v25  ;;  %v6827_v23 = vor.u32 %v8974_v19, %v6826_v18  ;;  %v6682_v24 = vld [vmem:[#allocation6 + $0x480] sm:$0xf]  ;;  %v8938_v25 = vld [vmem:[#allocation6 + $0x48c] sm:$0xf0]  ;;  %v7019_v19 = vor.u32 %v9022_v17, %v7018_v16  ;;  %v293_v16 = vperm.slane %v9895_v26, 5 }
 0x104   :  { %v6683_v28 = vor.u32 %v8938_v25, %v6682_v24  ;;  %v9018_v24 = vld [vmem:[#allocation6 + $0x70c] sm:$0xf0]  ;;  %v7354_v55 = vld [vmem:[#allocation6 + $0x9c0] sm:$0xf] }
 0x105   :  { %v7338_v10 = vld [vmem:[#allocation6 + $0x9a0] sm:$0xf] }
 0x106   :  { %3844 = vmatpush.bf16.msra.mxu0 %v6139_v30  ;;  %3858 = vmatpush.bf16.msra.mxu1 %v6267_v31  ;;  %v6954_v30 = vld [vmem:[#allocation6 + $0x6a0] sm:$0xf]  ;;  %v9006_v31 = vld [vmem:[#allocation6 + $0x6ac] sm:$0xf0] }
 0x107   :  { %3872 = vmatpush.bf16.msra.mxu2 %v6395_v36  ;;  %3886 = vmatpush.bf16.msra.mxu3 %v6523_v37  ;;  %v6955_v33 = vor.u32 %v9006_v31, %v6954_v30  ;;  %v6666_v36 = vld [vmem:[#allocation6 + $0x460] sm:$0xf]  ;;  %v8934_v37 = vld [vmem:[#allocation6 + $0x46c] sm:$0xf0]  ;;  %v289_v30 = vperm.slane %v9895_v26, 1 }
 0x108   :  { %v6667_v38 = vor.u32 %v8934_v37, %v6666_v36  ;;  %v7242_v37 = vld [vmem:[#allocation6 + $0x8e0] sm:$0xf] }
 0x10a   :  { %3845 = vmatpush.bf16.msra.mxu0 %v6123_v7  ;;  %3859 = vmatpush.bf16.msra.mxu1 %v6251_v43  ;;  %v9002_v7 = vld [vmem:[#allocation6 + $0x68c] sm:$0xf0]  ;;  %v7066_v43 = vld [vmem:[#allocation6 + $0x780] sm:$0xf] }
 0x10b   :  { %3873 = vmatpush.bf16.msra.mxu2 %v6379_v51  ;;  %3887 = vmatpush.bf16.msra.mxu3 %v6507_v52  ;;  %v6939_v44 = vor.u32 %v9002_v7, %v6938_v42  ;;  %v7067_v47 = vor.u32 %v9034_v46, %v7066_v43  ;;  %v6651_v51 = vor.u32 %v8930_v49, %v6650_v48  ;;  %v8962_v52 = vld [vmem:[#allocation6 + $0x54c] sm:$0xf0]  ;;  %v290_v7 = vperm.slane %v9895_v26, 2 }
 0x10c   :  { %v6779_v53 = vor.u32 %v8962_v52, %v6778_v50  ;;  %v9110_v42 = vld [vmem:[#allocation6 + $0x9ec] sm:$0xf0]  ;;  %v291_v43 = vperm.slane %v9895_v26, 3  ;;  %v7243_v49 = vor.u32 %v9078_v40, %v7242_v37  ;;  %v7594_v40 = vld [vmem:[#allocation6 + $0xba0] sm:$0xf] }
 0x10d   :  { %v9074_v52 = vld [vmem:[#allocation6 + $0x8cc] sm:$0xf0] }
 0x10e   :  { %3846 = vmatpush.bf16.msra.mxu0 %v6107_v59  ;;  %3860 = vmatpush.bf16.msra.mxu1 %v6235_v60  ;;  %v7051_v59 = vor.u32 %v9030_v58, %v7050_v57  ;;  %v6634_v60 = vld [vmem:[#allocation6 + $0x420] sm:$0xf] }
 0x10f   :  { %3874 = vmatpush.bf16.msra.mxu2 %v6363_v6  ;;  %3888 = vmatpush.bf16.msra.mxu3 %v6491_v8  ;;  %v6635_v63 = vor.u32 %v8926_v61, %v6634_v60  ;;  %v9026_v6 = vld [vmem:[#allocation6 + $0x74c] sm:$0xf0] }
 0x110   :  { %v7035_v8 = vor.u32 %v9026_v6, %v7034_v4  ;;  %v9174_v6 = vld [vmem:[#allocation6 + $0xbec] sm:$0xf0] }
 0x112   :  { %3895 = vmatpush.bf16.msrb.mxu0 %v6731_v0  ;;  %3909 = vmatpush.bf16.msrb.mxu1 %v6859_v1  ;;  %v8958_v0 = vld [vmem:[#allocation6 + $0x52c] sm:$0xf0] }
 0x113   :  { %3923 = vmatpush.bf16.msrb.mxu2 %v6987_v9  ;;  %3937 = vmatpush.bf16.msrb.mxu3 %v7115_v45  ;;  %v6763_v1 = vor.u32 %v8958_v0, %v6762_v62  ;;  %v6618_v9 = vld [vmem:[#allocation6 + $0x400] sm:$0xf]  ;;  %v8922_v45 = vld [vmem:[#allocation6 + $0x40c] sm:$0xf0] }
 0x114   :  { %v6619_v11 = vor.u32 %v8922_v45, %v6618_v9  ;;  %v7498_v62 = vld [vmem:[#allocation6 + $0xae0] sm:$0xf]  ;;  %v9070_v9 = vld [vmem:[#allocation6 + $0x8ac] sm:$0xf0]  ;;  %v292_v45 = vperm.slane %v9895_v26, 4 }
 0x115   :  { %v7626_v0 = vld [vmem:[#allocation6 + $0xbe0] sm:$0xf] }
 0x116   :  { %3896 = vmatpush.bf16.msrb.mxu0 %v6715_v14  ;;  %3910 = vmatpush.bf16.msrb.mxu1 %v6843_v15  ;;  %v6890_v14 = vld [vmem:[#allocation6 + $0x620] sm:$0xf]  ;;  %v8990_v15 = vld [vmem:[#allocation6 + $0x62c] sm:$0xf0] }
 0x117   :  { %3924 = vmatpush.bf16.msrb.mxu2 %v6971_v20  ;;  %3938 = vmatpush.bf16.msrb.mxu3 %v7099_v21  ;;  %v6891_v18 = vor.u32 %v8990_v15, %v6890_v14  ;;  %v6874_v20 = vld [vmem:[#allocation6 + $0x600] sm:$0xf]  ;;  %v8986_v21 = vld [vmem:[#allocation6 + $0x60c] sm:$0xf0] }
 0x11a   :  { %3897 = vmatpush.bf16.msrb.mxu0 %v6699_v22  ;;  %3911 = vmatpush.bf16.msrb.mxu1 %v6827_v23  ;;  %v6875_v22 = vor.u32 %v8986_v21, %v6874_v20  ;;  %v7002_v23 = vld [vmem:[#allocation6 + $0x700] sm:$0xf]  ;;  %v9138_v21 = vld [vmem:[#allocation6 + $0xacc] sm:$0xf0] }
 0x11b   :  { %3925 = vmatpush.bf16.msrb.mxu2 %v6955_v33  ;;  %3939 = vmatpush.bf16.msrb.mxu3 %v7083_v35  ;;  %v7003_v25 = vor.u32 %v9018_v24, %v7002_v23  ;;  %v7482_v20 = vld [vmem:[#allocation6 + $0xac0] sm:$0xf] }
 0x11e   :  { %3898 = vmatpush.bf16.msrb.mxu0 %v6683_v28  ;;  %3912 = vmatpush.bf16.msrb.mxu1 %v6811_v29  ;;  %v288_v29 = vperm.slane %v9895_v26, 0 }
 0x11f   :  { %3926 = vmatpush.bf16.msrb.mxu2 %v6939_v44  ;;  %3940 = vmatpush.bf16.msrb.mxu3 %v7067_v47 }
 0x122   :  { %3899 = vmatpush.bf16.msrb.mxu0 %v6667_v38  ;;  %3913 = vmatpush.bf16.msrb.mxu1 %v6795_v41  ;;  %v7370_v41 = vld [vmem:[#allocation6 + $0x9e0] sm:$0xf] }
 0x123   :  { %3927 = vmatpush.bf16.msrb.mxu2 %v6923_v56  ;;  %3941 = vmatpush.bf16.msrb.mxu3 %v7051_v59  ;;  %v7371_v50 = vor.u32 %v9110_v42, %v7370_v41  ;;  %v9106_v56 = vld [vmem:[#allocation6 + $0x9cc] sm:$0xf0] }
 0x124   :  { %v9166_v41 = vld [vmem:[#allocation6 + $0xbac] sm:$0xf0] }
 0x126   :  { %3900 = vmatpush.bf16.msrb.mxu0 %v6651_v51  ;;  %3914 = vmatpush.bf16.msrb.mxu1 %v6779_v53  ;;  %v7226_v51 = vld [vmem:[#allocation6 + $0x8c0] sm:$0xf] }
 0x127   :  { %3928 = vmatpush.bf16.msrb.mxu2 %v6907_v5  ;;  %3942 = vmatpush.bf16.msrb.mxu3 %v7035_v8  ;;  %v7227_v61 = vor.u32 %v9074_v52, %v7226_v51  ;;  %v7355_v5 = vor.u32 %v9106_v56, %v7354_v55  ;;  %v7210_v8 = vld [vmem:[#allocation6 + $0x8a0] sm:$0xf]  ;;  %v295_v51 = vperm.slane %v9895_v26, 7  ;;  %v7595_v55 = vor.u32 %v9166_v41, %v7594_v40 }
 0x128   :  { %v7306_v56 = vld [vmem:[#allocation6 + $0x960] sm:$0xf] }
 0x12a   :  { %3901 = vmatpush.bf16.msrb.mxu0 %v6635_v63  ;;  %3915 = vmatpush.bf16.msrb.mxu1 %v6763_v1  ;;  %v9142_v63 = vld [vmem:[#allocation6 + $0xaec] sm:$0xf0] }
 0x12b   :  { %3929 = vmatpush.bf16.msrb.mxu2 %v6891_v18  ;;  %3943 = vmatpush.bf16.msrb.mxu3 %v7019_v19  ;;  %v7499_v17 = vor.u32 %v9142_v63, %v7498_v62  ;;  %v7627_v18 = vor.u32 %v9174_v6, %v7626_v0  ;;  %v7211_v19 = vor.u32 %v9070_v9, %v7210_v8  ;;  %v7450_v63 = vld [vmem:[#allocation6 + $0xa80] sm:$0xf]  ;;  %v9130_v0 = vld [vmem:[#allocation6 + $0xa8c] sm:$0xf0] }
 0x12c   :  { %v7162_v6 = vld [vmem:[#allocation6 + $0x840] sm:$0xf] }
 0x12e   :  { %3902 = vmatpush.bf16.msrb.mxu0 %v6619_v11  ;;  %3916 = vmatpush.bf16.msrb.mxu1 %v6747_v13  ;;  %v9102_v11 = vld [vmem:[#allocation6 + $0x9ac] sm:$0xf0] }
 0x12f   :  { %3930 = vmatpush.bf16.msrb.mxu2 %v6875_v22  ;;  %3944 = vmatpush.bf16.msrb.mxu3 %v7003_v25  ;;  %v7339_v24 = vor.u32 %v9102_v11, %v7338_v10  ;;  %v7610_v25 = vld [vmem:[#allocation6 + $0xbc0] sm:$0xf]  ;;  %v9090_v11 = vld [vmem:[#allocation6 + $0x94c] sm:$0xf0] }
 0x130   :  { %v7290_v10 = vld [vmem:[#allocation6 + $0x940] sm:$0xf] }
 0x14d   :  { %v494_v27 = vpop.f32.mrf.mxu0  ;;  %v508_v28 = vpop.f32.mrf.mxu1 }
 0x14e   :  { %v495_v31 = vadd.f32 %v494_v27, %v288_v29  ;;  %v509_v32 = vadd.f32 %v508_v28, %v289_v30  ;;  %v9170_v27 = vld [vmem:[#allocation6 + $0xbcc] sm:$0xf0]  ;;  %v7194_v28 = vld [vmem:[#allocation6 + $0x880] sm:$0xf] }
 0x150   :  { %v709_v44 = vmax.f32 %v495_v31, 0.0  ;;  %v710_v46 = vmax.f32 %v509_v32, 0.0  ;;  %v9098_v31 = vld [vmem:[#allocation6 + $0x98c] sm:$0xf0]  ;;  %v7483_v32 = vor.u32 %v9138_v21, %v7482_v20 }
 0x154   :  { %v522_v33 = vpop.f32.mrf.mxu2  ;;  %v536_v34 = vpop.f32.mrf.mxu3 }
 0x155   :  { %v496_v35 = vpop.f32.mrf.mxu0  ;;  %v510_v36 = vpop.f32.mrf.mxu1  ;;  %v523_v57 = vadd.f32 %v522_v33, %v290_v7  ;;  %v537_v58 = vadd.f32 %v536_v34, %v291_v43  ;;  %v7466_v33 = vld [vmem:[#allocation6 + $0xaa0] sm:$0xf] }
 0x156   :  { %v497_v38 = vadd.f32 %v496_v35, %v288_v29  ;;  %v511_v39 = vadd.f32 %v510_v36, %v289_v30  ;;  %v9066_v29 = vld [vmem:[#allocation6 + $0x88c] sm:$0xf0]  ;;  %v7322_v30 = vld [vmem:[#allocation6 + $0x980] sm:$0xf] }
 0x157   :  { %v711_v12 = vmax.f32 %v523_v57, 0.0  ;;  %v712_v13 = vmax.f32 %v537_v58, 0.0  ;;  %v9094_v57 = vld [vmem:[#allocation6 + $0x96c] sm:$0xf0]  ;;  %v9917_v58 = vld [vmem:[#allocation4 + $0x8] sm:$0xff] }
 0x158   :  { %v725_v47 = vmax.f32 %v497_v38, 0.0  ;;  %v726_v48 = vmax.f32 %v511_v39, 0.0  ;;  %v7611_v38 = vor.u32 %v9170_v27, %v7610_v25  ;;  %v9134_v39 = vld [vmem:[#allocation6 + $0xaac] sm:$0xf0]  ;;  %v7562_v27 = vld [vmem:[#allocation6 + $0xb60] sm:$0xf] }
 0x159   :  { %v7467_v52 = vor.u32 %v9134_v39, %v7466_v33  ;;  %v7274_v33 = vld [vmem:[#allocation6 + $0x920] sm:$0xf] }
 0x15a   :  { %v9901_v53 = vpack.c.bf16 %v725_v47, %v709_v44  ;;  %v9903_v54 = vpack.c.bf16 %v726_v48, %v710_v46  ;;  %v7323_v44 = vor.u32 %v9098_v31, %v7322_v30  ;;  %v294_v46 = vperm.slane %v9895_v26, 6  ;;  %v7418_v39 = vld [vmem:[#allocation6 + $0xa40] sm:$0xf] }
 0x15b   :  { %v7291_v31 = vor.u32 %v9090_v11, %v7290_v10 }
 0x15c   :  { %v524_v59 = vpop.f32.mrf.mxu2  ;;  %v538_v60 = vpop.f32.mrf.mxu3  ;;  %3847 = vmatmul.bf16.vlgmr.msra.gmra.mxu0 %v9901_v53  ;;  %3861 = vmatmul.bf16.vlgmr.msra.gmra.mxu1 %v9903_v54 }
 0x15d   :  { %v525_v1 = vadd.f32 %v524_v59, %v290_v7  ;;  %v539_v2 = vadd.f32 %v538_v60, %v291_v43  ;;  %3951 = vmatpush.bf16.msra.mxu0 %v7243_v49  ;;  %3965 = vmatpush.bf16.msra.mxu1 %v7371_v50  ;;  %v550_v3 = vpop.f32.mrf.mxu0  ;;  %v564_v4 = vpop.f32.mrf.mxu1  ;;  %v7195_v43 = vor.u32 %v9066_v29, %v7194_v28  ;;  %v7178_v49 = vld [vmem:[#allocation6 + $0x860] sm:$0xf]  ;;  %v9062_v50 = vld [vmem:[#allocation6 + $0x86c] sm:$0xf0] }
 0x15e   :  { %v551_v34 = vadd.f32 %v550_v3, %v292_v45  ;;  %v565_v35 = vadd.f32 %v564_v4, %v293_v16  ;;  %v7179_v4 = vor.u32 %v9062_v50, %v7178_v49  ;;  %v9158_v28 = vld [vmem:[#allocation6 + $0xb6c] sm:$0xf0]  ;;  %v7146_v29 = vld [vmem:[#allocation6 + $0x820] sm:$0xf] }
 0x15f   :  { %v727_v14 = vmax.f32 %v525_v1, 0.0  ;;  %v728_v15 = vmax.f32 %v539_v2, 0.0  ;;  %v7578_v1 = vld [vmem:[#allocation6 + $0xb80] sm:$0xf]  ;;  %v9162_v2 = vld [vmem:[#allocation6 + $0xb8c] sm:$0xf0]  ;;  %v7563_v41 = vor.u32 %v9158_v28, %v7562_v27 }
 0x160   :  { %v713_v59 = vmax.f32 %v551_v34, 0.0  ;;  %v714_v60 = vmax.f32 %v565_v35, 0.0  ;;  %v9086_v34 = vld [vmem:[#allocation6 + $0x92c] sm:$0xf0]  ;;  %v7258_v49 = vld [vmem:[#allocation6 + $0x900] sm:$0xf] }
 0x161   :  { %v9909_v22 = vpack.c.bf16 %v727_v14, %v711_v12  ;;  %v9911_v23 = vpack.c.bf16 %v728_v15, %v712_v13  ;;  %3952 = vmatpush.bf16.msra.mxu0 %v7227_v61  ;;  %3966 = vmatpush.bf16.msra.mxu1 %v7355_v5  ;;  %v7307_v5 = vor.u32 %v9094_v57, %v7306_v56  ;;  %v296_v14 = vperm.slane %v9917_v58, 0  ;;  %v9206_v56 = vld [vmem:[#allocation6 + $0xcec] sm:$0xf0]  ;;  %v7386_v28 = vld [vmem:[#allocation6 + $0xa00] sm:$0xf] }
 0x162   :  { %v297_v15 = vperm.slane %v9917_v58, 1  ;;  %v9234_v27 = vld [vmem:[#allocation6 + $0xdcc] sm:$0xf0] }
 0x163   :  { %3875 = vmatmul.bf16.vlgmr.msra.gmra.mxu2 %v9909_v22  ;;  %3889 = vmatmul.bf16.vlgmr.msra.gmra.mxu3 %v9911_v23 }
 0x164   :  { %3979 = vmatpush.bf16.msra.mxu2 %v7499_v17  ;;  %3993 = vmatpush.bf16.msra.mxu3 %v7627_v18  ;;  %v578_v36 = vpop.f32.mrf.mxu2  ;;  %v592_v37 = vpop.f32.mrf.mxu3  ;;  %v7579_v17 = vor.u32 %v9162_v2, %v7578_v1  ;;  %v7434_v18 = vld [vmem:[#allocation6 + $0xa60] sm:$0xf] }
 0x165   :  { %3953 = vmatpush.bf16.msra.mxu0 %v7211_v19  ;;  %3967 = vmatpush.bf16.msra.mxu1 %v7339_v24  ;;  %v552_v42 = vpop.f32.mrf.mxu0  ;;  %v566_v7 = vpop.f32.mrf.mxu1  ;;  %v579_v8 = vadd.f32 %v578_v36, %v294_v46  ;;  %v593_v9 = vadd.f32 %v592_v37, %v295_v51  ;;  %v9126_v19 = vld [vmem:[#allocation6 + $0xa6c] sm:$0xf0] }
 0x166   :  { %v553_v47 = vadd.f32 %v552_v42, %v292_v45  ;;  %v567_v48 = vadd.f32 %v566_v7, %v293_v16  ;;  %v9058_v45 = vld [vmem:[#allocation6 + $0x84c] sm:$0xf0]  ;;  %v7451_v16 = vor.u32 %v9130_v0, %v7450_v63  ;;  %v7435_v40 = vor.u32 %v9126_v19, %v7434_v18  ;;  %v7546_v7 = vld [vmem:[#allocation6 + $0xb40] sm:$0xf] }
 0x167   :  { %v7163_v30 = vor.u32 %v9058_v45, %v7162_v6  ;;  %v715_v35 = vmax.f32 %v579_v8, 0.0  ;;  %v716_v36 = vmax.f32 %v593_v9, 0.0  ;;  %v9122_v42 = vld [vmem:[#allocation6 + $0xa4c] sm:$0xf0]  ;;  %v298_v8 = vperm.slane %v9917_v58, 2 }
 0x168   :  { %v729_v61 = vmax.f32 %v553_v47, 0.0  ;;  %v730_v62 = vmax.f32 %v567_v48, 0.0  ;;  %3980 = vmatpush.bf16.msra.mxu2 %v7483_v32  ;;  %3994 = vmatpush.bf16.msra.mxu3 %v7611_v38  ;;  %v9054_v32 = vld [vmem:[#allocation6 + $0x82c] sm:$0xf0]  ;;  %v7130_v47 = vld [vmem:[#allocation6 + $0x800] sm:$0xf]  ;;  %v7419_v57 = vor.u32 %v9122_v42, %v7418_v39 }
 0x169   :  { %3954 = vmatpush.bf16.msra.mxu0 %v7195_v43  ;;  %3968 = vmatpush.bf16.msra.mxu1 %v7323_v44  ;;  %v9154_v43 = vld [vmem:[#allocation6 + $0xb4c] sm:$0xf0]  ;;  %v7147_v50 = vor.u32 %v9054_v32, %v7146_v29  ;;  %v299_v9 = vperm.slane %v9917_v58, 3  ;;  %v7866_v19 = vld [vmem:[#allocation6 + $0xdc0] sm:$0xf] }
 0x16a   :  { %v9919_v3 = vpack.c.bf16 %v729_v61, %v713_v59  ;;  %v9921_v26 = vpack.c.bf16 %v730_v62, %v714_v60  ;;  %v9050_v48 = vld [vmem:[#allocation6 + $0x80c] sm:$0xf0]  ;;  %v7882_v59 = vld [vmem:[#allocation6 + $0xde0] sm:$0xf]  ;;  %v7547_v2 = vor.u32 %v9154_v43, %v7546_v7  ;;  %v7867_v43 = vor.u32 %v9234_v27, %v7866_v19 }
 0x16b   :  { %v9238_v60 = vld [vmem:[#allocation6 + $0xdec] sm:$0xf0]  ;;  %v7402_v61 = vld [vmem:[#allocation6 + $0xa20] sm:$0xf]  ;;  %v7131_v11 = vor.u32 %v9050_v48, %v7130_v47 }
 0x16c   :  { %3981 = vmatpush.bf16.msra.mxu2 %v7467_v52  ;;  %3995 = vmatpush.bf16.msra.mxu3 %v7595_v55  ;;  %v580_v12 = vpop.f32.mrf.mxu2  ;;  %v594_v13 = vpop.f32.mrf.mxu3  ;;  %v9082_v52 = vld [vmem:[#allocation6 + $0x90c] sm:$0xf0]  ;;  %v7754_v55 = vld [vmem:[#allocation6 + $0xce0] sm:$0xf] }
 0x16d   :  { %v581_v20 = vadd.f32 %v580_v12, %v294_v46  ;;  %v595_v21 = vadd.f32 %v594_v13, %v295_v51  ;;  %3903 = vmatmul.bf16.vlgmr.msrb.gmra.mxu0 %v9919_v3  ;;  %3917 = vmatmul.bf16.vlgmr.msrb.gmra.mxu1 %v9921_v26  ;;  %v606_v24 = vpop.f32.mrf.mxu0  ;;  %v620_v25 = vpop.f32.mrf.mxu1  ;;  %v7275_v51 = vor.u32 %v9086_v34, %v7274_v33  ;;  %v9150_v6 = vld [vmem:[#allocation6 + $0xb2c] sm:$0xf0]  ;;  %v8138_v39 = vld [vmem:[#allocation6 + $0xfe0] sm:$0xf] }
 0x16e   :  { %3955 = vmatpush.bf16.msra.mxu0 %v7179_v4  ;;  %3969 = vmatpush.bf16.msra.mxu1 %v7307_v5  ;;  %v607_v62 = vadd.f32 %v606_v24, %v296_v14  ;;  %v621_v63 = vadd.f32 %v620_v25, %v297_v15  ;;  %v9118_v4 = vld [vmem:[#allocation6 + $0xa2c] sm:$0xf0]  ;;  %v7530_v5 = vld [vmem:[#allocation6 + $0xb20] sm:$0xf] }
 0x16f   :  { %v731_v37 = vmax.f32 %v581_v20, 0.0  ;;  %v732_v38 = vmax.f32 %v595_v21, 0.0  ;;  %v9202_v18 = vld [vmem:[#allocation6 + $0xccc] sm:$0xf0]  ;;  %v7755_v20 = vor.u32 %v9206_v56, %v7754_v55  ;;  %v7883_v21 = vor.u32 %v9238_v60, %v7882_v59  ;;  %v7850_v48 = vld [vmem:[#allocation6 + $0xda0] sm:$0xf] }
 0x170   :  { %3982 = vmatpush.bf16.msra.mxu2 %v7451_v16  ;;  %3996 = vmatpush.bf16.msra.mxu3 %v7579_v17  ;;  %v7259_v16 = vor.u32 %v9082_v52, %v7258_v49  ;;  %v7738_v17 = vld [vmem:[#allocation6 + $0xcc0] sm:$0xf]  ;;  %v7403_v24 = vor.u32 %v9118_v4, %v7402_v61  ;;  %v7531_v25 = vor.u32 %v9150_v6, %v7530_v5  ;;  %v9114_v29 = vld [vmem:[#allocation6 + $0xa0c] sm:$0xf0] }
 0x171   :  { %v9927_v44 = vpack.c.bf16 %v731_v37, %v715_v35  ;;  %v9929_v46 = vpack.c.bf16 %v732_v38, %v716_v36  ;;  %v9146_v34 = vld [vmem:[#allocation6 + $0xb0c] sm:$0xf0]  ;;  %v7739_v38 = vor.u32 %v9202_v18, %v7738_v17  ;;  %v7387_v52 = vor.u32 %v9114_v29, %v7386_v28  ;;  %v7994_v61 = vld [vmem:[#allocation6 + $0xec0] sm:$0xf] }
 0x172   :  { %3956 = vmatpush.bf16.msra.mxu0 %v7163_v30  ;;  %3970 = vmatpush.bf16.msra.mxu1 %v7291_v31  ;;  %v717_v30 = vmax.f32 %v607_v62, 0.0  ;;  %v718_v31 = vmax.f32 %v621_v63, 0.0  ;;  %v9270_v35 = vld [vmem:[#allocation6 + $0xeec] sm:$0xf0]  ;;  %v7978_v18 = vld [vmem:[#allocation6 + $0xea0] sm:$0xf] }
 0x173   :  { %3931 = vmatmul.bf16.vlgmr.msrb.gmra.mxu2 %v9927_v44  ;;  %3945 = vmatmul.bf16.vlgmr.msrb.gmra.mxu3 %v9929_v46  ;;  %v9198_v47 = vld [vmem:[#allocation6 + $0xcac] sm:$0xf0]  ;;  %v7690_v29 = vld [vmem:[#allocation6 + $0xc60] sm:$0xf] }
 0x174   :  { %3983 = vmatpush.bf16.msra.mxu2 %v7435_v40  ;;  %3997 = vmatpush.bf16.msra.mxu3 %v7563_v41  ;;  %v634_v0 = vpop.f32.mrf.mxu2  ;;  %v648_v1 = vpop.f32.mrf.mxu3  ;;  %v9302_v40 = vld [vmem:[#allocation6 + $0xfec] sm:$0xf0]  ;;  %v7722_v41 = vld [vmem:[#allocation6 + $0xca0] sm:$0xf] }
 0x175   :  { %v608_v45 = vpop.f32.mrf.mxu0  ;;  %v622_v10 = vpop.f32.mrf.mxu1  ;;  %v635_v42 = vadd.f32 %v634_v0, %v298_v8  ;;  %v649_v7 = vadd.f32 %v648_v1, %v299_v9  ;;  %v9230_v49 = vld [vmem:[#allocation6 + $0xdac] sm:$0xf0]  ;;  %v8139_v60 = vor.u32 %v9302_v40, %v8138_v39  ;;  %v7723_v63 = vor.u32 %v9198_v47, %v7722_v41  ;;  %v8122_v1 = vld [vmem:[#allocation6 + $0xfc0] sm:$0xf] }
 0x176   :  { %3957 = vmatpush.bf16.msra.mxu0 %v7147_v50  ;;  %3971 = vmatpush.bf16.msra.mxu1 %v7275_v51  ;;  %v609_v12 = vadd.f32 %v608_v45, %v296_v14  ;;  %v623_v13 = vadd.f32 %v622_v10, %v297_v15  ;;  %v7514_v14 = vld [vmem:[#allocation6 + $0xb00] sm:$0xf]  ;;  %v9266_v62 = vld [vmem:[#allocation6 + $0xecc] sm:$0xf0]  ;;  %v7851_v0 = vor.u32 %v9230_v49, %v7850_v48 }
 0x177   :  { %v8010_v15 = vld [vmem:[#allocation6 + $0xee0] sm:$0xf]  ;;  %v7515_v55 = vor.u32 %v9146_v34, %v7514_v14  ;;  %v719_v4 = vmax.f32 %v635_v42, 0.0  ;;  %v720_v5 = vmax.f32 %v649_v7, 0.0  ;;  %v9262_v19 = vld [vmem:[#allocation6 + $0xeac] sm:$0xf0] }
 0x178   :  { %v733_v32 = vmax.f32 %v609_v12, 0.0  ;;  %v734_v33 = vmax.f32 %v623_v13, 0.0  ;;  %3984 = vmatpush.bf16.msra.mxu2 %v7419_v57  ;;  %3998 = vmatpush.bf16.msra.mxu3 %v7547_v2  ;;  %v8011_v56 = vor.u32 %v9270_v35, %v8010_v15  ;;  %v9298_v2 = vld [vmem:[#allocation6 + $0xfcc] sm:$0xf0]  ;;  %v7706_v10 = vld [vmem:[#allocation6 + $0xc80] sm:$0xf] }
 0x179   :  { %v9226_v12 = vld [vmem:[#allocation6 + $0xd8c] sm:$0xf0]  ;;  %v8123_v17 = vor.u32 %v9298_v2, %v8122_v1  ;;  %v7962_v34 = vld [vmem:[#allocation6 + $0xe80] sm:$0xf]  ;;  %v301_v1 = vperm.slane %v9917_v58, 5 }
 0x17a   :  { %v9943_v36 = vpack.c.bf16 %v733_v32, %v717_v30  ;;  %v9945_v37 = vpack.c.bf16 %v734_v33, %v718_v31  ;;  %3958 = vmatpush.bf16.msra.mxu0 %v7131_v11  ;;  %3972 = vmatpush.bf16.msra.mxu1 %v7259_v16  ;;  %v7834_v11 = vld [vmem:[#allocation6 + $0xd80] sm:$0xf]  ;;  %v9190_v30 = vld [vmem:[#allocation6 + $0xc6c] sm:$0xf0]  ;;  %v7979_v33 = vor.u32 %v9262_v19, %v7978_v18 }
 0x17b   :  { %v7835_v28 = vor.u32 %v9226_v12, %v7834_v11  ;;  %v7818_v31 = vld [vmem:[#allocation6 + $0xd60] sm:$0xf]  ;;  %v9222_v32 = vld [vmem:[#allocation6 + $0xd6c] sm:$0xf0]  ;;  %v7691_v39 = vor.u32 %v9190_v30, %v7690_v29  ;;  %v6220_v29 = vld [vmem:[#allocation6 + $0xf0] sm:$0xf0] }
 0x17c   :  { %3985 = vmatpush.bf16.msra.mxu2 %v7403_v24  ;;  %3999 = vmatpush.bf16.msra.mxu3 %v7531_v25  ;;  %v636_v50 = vpop.f32.mrf.mxu2  ;;  %v650_v51 = vpop.f32.mrf.mxu3  ;;  %v9258_v15 = vld [vmem:[#allocation6 + $0xe8c] sm:$0xf0]  ;;  %v8090_v35 = vld [vmem:[#allocation6 + $0xf80] sm:$0xf]  ;;  %v7819_v40 = vor.u32 %v9222_v32, %v7818_v31  ;;  %v8852_v32 = vld [vmem:[#allocation6 + $0x1e4] sm:$0xf] }
 0x17d   :  { %v637_v57 = vadd.f32 %v636_v50, %v298_v8  ;;  %v651_v59 = vadd.f32 %v650_v51, %v299_v9  ;;  %3959 = vmatmul.bf16.vlgmr.msra.gmra.mxu0 %v9943_v36  ;;  %3973 = vmatmul.bf16.vlgmr.msra.gmra.mxu1 %v9945_v37  ;;  %v7995_v8 = vor.u32 %v9266_v62, %v7994_v61  ;;  %v9194_v9 = vld [vmem:[#allocation6 + $0xc8c] sm:$0xf0]  ;;  %v9953_v24 = vpop.f32.mrf.mxu0  ;;  %v9955_v25 = vpop.f32.mrf.mxu1  ;;  %v7674_v41 = vld [vmem:[#allocation6 + $0xc40] sm:$0xf] }
 0x17e   :  { %4007 = vmatpush.bf16.msrb.mxu0 %v7755_v20  ;;  %4021 = vmatpush.bf16.msrb.mxu1 %v7883_v21  ;;  %v8106_v20 = vld [vmem:[#allocation6 + $0xfa0] sm:$0xf]  ;;  %v9294_v21 = vld [vmem:[#allocation6 + $0xfac] sm:$0xf0]  ;;  %v7707_v27 = vor.u32 %v9194_v9, %v7706_v10  ;;  %v7963_v49 = vor.u32 %v9258_v15, %v7962_v34  ;;  %v677_v15 = vadd.f32 %v9955_v25, %v301_v1  ;;  %v8848_v25 = vld [vmem:[#allocation6 + $0x1c4] sm:$0xf] }
 0x17f   :  { %v735_v6 = vmax.f32 %v637_v57, 0.0  ;;  %v736_v45 = vmax.f32 %v651_v59, 0.0  ;;  %v8107_v14 = vor.u32 %v9294_v21, %v8106_v20  ;;  %v9186_v42 = vld [vmem:[#allocation6 + $0xc4c] sm:$0xf0]  ;;  %v7802_v7 = vld [vmem:[#allocation6 + $0xd40] sm:$0xf] }
 0x180   :  { %3986 = vmatpush.bf16.msra.mxu2 %v7387_v52  ;;  %4000 = vmatpush.bf16.msra.mxu3 %v7515_v55  ;;  %v7946_v51 = vld [vmem:[#allocation6 + $0xe60] sm:$0xf]  ;;  %v9254_v52 = vld [vmem:[#allocation6 + $0xe6c] sm:$0xf0]  ;;  %v7675_v57 = vor.u32 %v9186_v42, %v7674_v41  ;;  %v303_v41 = vperm.slane %v9917_v58, 7 }
 0x181   :  { %v9949_v13 = vpack.c.bf16 %v735_v6, %v719_v4  ;;  %v9951_v16 = vpack.c.bf16 %v736_v45, %v720_v5  ;;  %v8074_v55 = vld [vmem:[#allocation6 + $0xf60] sm:$0xf]  ;;  %v9182_v61 = vld [vmem:[#allocation6 + $0xc2c] sm:$0xf0]  ;;  %v7947_v5 = vor.u32 %v9254_v52, %v7946_v51  ;;  %v6204_v51 = vld [vmem:[#allocation6 + $0xd0] sm:$0xf0] }
 0x182   :  { %4008 = vmatpush.bf16.msrb.mxu0 %v7739_v38  ;;  %4022 = vmatpush.bf16.msrb.mxu1 %v7867_v43  ;;  %v9290_v38 = vld [vmem:[#allocation6 + $0xf8c] sm:$0xf0]  ;;  %v7786_v62 = vld [vmem:[#allocation6 + $0xd20] sm:$0xf] }
 0x183   :  { %3987 = vmatmul.bf16.vlgmr.msra.gmra.mxu2 %v9949_v13  ;;  %4001 = vmatmul.bf16.vlgmr.msra.gmra.mxu3 %v9951_v16  ;;  %v9218_v43 = vld [vmem:[#allocation6 + $0xd4c] sm:$0xf0]  ;;  %v8091_v50 = vor.u32 %v9290_v38, %v8090_v35  ;;  %v7930_v45 = vld [vmem:[#allocation6 + $0xe40] sm:$0xf] }
 0x184   :  { %4035 = vmatpush.bf16.msrb.mxu2 %v8011_v56  ;;  %4049 = vmatpush.bf16.msrb.mxu3 %v8139_v60  ;;  %v9959_v47 = vpop.f32.mrf.mxu2  ;;  %v9961_v48 = vpop.f32.mrf.mxu3  ;;  %v9286_v56 = vld [vmem:[#allocation6 + $0xf6c] sm:$0xf0]  ;;  %v7803_v59 = vor.u32 %v9218_v43, %v7802_v7  ;;  %v7658_v60 = vld [vmem:[#allocation6 + $0xc20] sm:$0xf] }
 0x185   :  { %v664_v2 = vpop.f32.mrf.mxu0  ;;  %v678_v4 = vpop.f32.mrf.mxu1  ;;  %v8075_v6 = vor.u32 %v9286_v56, %v8074_v55  ;;  %v9250_v10 = vld [vmem:[#allocation6 + $0xe4c] sm:$0xf0]  ;;  %v7659_v11 = vor.u32 %v9182_v61, %v7658_v60  ;;  %v7770_v19 = vld [vmem:[#allocation6 + $0xd00] sm:$0xf] }
 0x186   :  { %4009 = vmatpush.bf16.msrb.mxu0 %v7723_v63  ;;  %4023 = vmatpush.bf16.msrb.mxu1 %v7851_v0  ;;  %v9214_v63 = vld [vmem:[#allocation6 + $0xd2c] sm:$0xf0]  ;;  %v300_v0 = vperm.slane %v9917_v58, 4  ;;  %v679_v21 = vadd.f32 %v678_v4, %v301_v1  ;;  %v7931_v30 = vor.u32 %v9250_v10, %v7930_v45  ;;  %v8042_v38 = vld [vmem:[#allocation6 + $0xf20] sm:$0xf] }
 0x187   :  { %v9282_v9 = vld [vmem:[#allocation6 + $0xf4c] sm:$0xf0]  ;;  %v7787_v12 = vor.u32 %v9214_v63, %v7786_v62  ;;  %v7898_v61 = vld [vmem:[#allocation6 + $0xe00] sm:$0xf] }
 0x188   :  { %4036 = vmatpush.bf16.msrb.mxu2 %v7995_v8  ;;  %4050 = vmatpush.bf16.msrb.mxu3 %v8123_v17  ;;  %v8058_v8 = vld [vmem:[#allocation6 + $0xf40] sm:$0xf]  ;;  %v9178_v18 = vld [vmem:[#allocation6 + $0xc0c] sm:$0xf0]  ;;  %v665_v20 = vadd.f32 %v664_v2, %v300_v0  ;;  %v663_v34 = vadd.f32 %v9953_v24, %v300_v0  ;;  %v738_v55 = vmax.f32 %v679_v21, 0.0  ;;  %v722_v0 = vmax.f32 %v677_v15, 0.0 }
 0x189   :  { %v7642_v17 = vld [vmem:[#allocation6 + $0xc00] sm:$0xf]  ;;  %v8059_v31 = vor.u32 %v9282_v9, %v8058_v8  ;;  %v9246_v35 = vld [vmem:[#allocation6 + $0xe2c] sm:$0xf0]  ;;  %v6476_v8 = vld [vmem:[#allocation6 + $0x2f0] sm:$0xf0] }
 0x18a   :  { %4010 = vmatpush.bf16.msrb.mxu0 %v7707_v27  ;;  %4024 = vmatpush.bf16.msrb.mxu1 %v7835_v28  ;;  %v9210_v27 = vld [vmem:[#allocation6 + $0xd0c] sm:$0xf0]  ;;  %v8820_v28 = vld [vmem:[#allocation6 + $0xe4] sm:$0xf]  ;;  %v7643_v43 = vor.u32 %v9178_v18, %v7642_v17  ;;  %v737_v52 = vmax.f32 %v665_v20, 0.0  ;;  %v721_v63 = vmax.f32 %v663_v34, 0.0  ;;  %v9973_v18 = vpack.c.bf16 %v738_v55, %v722_v0 }
 0x18b   :  { %v6223_v24 = vor.u32 %v8820_v28, %v6220_v29  ;;  %v8026_v62 = vld [vmem:[#allocation6 + $0xf00] sm:$0xf]  ;;  %v9274_v4 = vld [vmem:[#allocation6 + $0xf0c] sm:$0xf0]  ;;  %v8916_v9 = vld [vmem:[#allocation6 + $0x3e4] sm:$0xf] }
 0x18c   :  { %4037 = vmatpush.bf16.msrb.mxu2 %v7979_v33  ;;  %4051 = vmatpush.bf16.msrb.mxu3 %v8107_v14  ;;  %v6348_v33 = vld [vmem:[#allocation6 + $0x1f0] sm:$0xf0]  ;;  %v7914_v14 = vld [vmem:[#allocation6 + $0xe20] sm:$0xf]  ;;  %v692_v42 = vpop.f32.mrf.mxu2  ;;  %v706_v7 = vpop.f32.mrf.mxu3  ;;  %v9971_v17 = vpack.c.bf16 %v737_v52, %v721_v63  ;;  %v8876_v52 = vld [vmem:[#allocation6 + $0x2a4] sm:$0xf] }
 0x18d   :  { %v6351_v56 = vor.u32 %v8852_v32, %v6348_v33  ;;  %v707_v2 = vadd.f32 %v706_v7, %v303_v41  ;;  %v6188_v21 = vld [vmem:[#allocation6 + $0xb0] sm:$0xf0]  ;;  %v8880_v32 = vld [vmem:[#allocation6 + $0x2c4] sm:$0xf] }
 0x18e   :  { %4011 = vmatpush.bf16.msrb.mxu0 %v7691_v39  ;;  %4025 = vmatpush.bf16.msrb.mxu1 %v7819_v40  ;;  %v9278_v39 = vld [vmem:[#allocation6 + $0xf2c] sm:$0xf0]  ;;  %v302_v40 = vperm.slane %v9917_v58, 6  ;;  %v6316_v28 = vld [vmem:[#allocation6 + $0x1b0] sm:$0xf0] }
 0x18f   :  { %v8043_v60 = vor.u32 %v9278_v39, %v8042_v38  ;;  %v9242_v58 = vld [vmem:[#allocation6 + $0xe0c] sm:$0xf0]  ;;  %v6460_v33 = vld [vmem:[#allocation6 + $0x2d0] sm:$0xf0]  ;;  %v8872_v0 = vld [vmem:[#allocation6 + $0x284] sm:$0xf] }
 0x190   :  { %4038 = vmatpush.bf16.msrb.mxu2 %v7963_v49  ;;  %4052 = vmatpush.bf16.msrb.mxu3 %v8091_v50  ;;  %v7771_v49 = vor.u32 %v9210_v27, %v7770_v19  ;;  %v8816_v50 = vld [vmem:[#allocation6 + $0xc4] sm:$0xf]  ;;  %v693_v1 = vadd.f32 %v692_v42, %v302_v40  ;;  %v7899_v20 = vor.u32 %v9242_v58, %v7898_v61  ;;  %v6588_v34 = vld [vmem:[#allocation6 + $0x3d0] sm:$0xf0] }
 0x191   :  { %v6207_v45 = vor.u32 %v8816_v50, %v6204_v51  ;;  %v8812_v19 = vld [vmem:[#allocation6 + $0xa4] sm:$0xf]  ;;  %v6172_v42 = vld [vmem:[#allocation6 + $0x90] sm:$0xf0] }
 0x192   :  { %4012 = vmatpush.bf16.msrb.mxu0 %v7675_v57  ;;  %4026 = vmatpush.bf16.msrb.mxu1 %v7803_v59  ;;  %v6332_v57 = vld [vmem:[#allocation6 + $0x1d0] sm:$0xf0]  ;;  %v7915_v59 = vor.u32 %v9246_v35, %v7914_v14  ;;  %v8844_v27 = vld [vmem:[#allocation6 + $0x1a4] sm:$0xf]  ;;  %v739_v29 = vmax.f32 %v693_v1, 0.0  ;;  %v6191_v38 = vor.u32 %v8812_v19, %v6188_v21 }
 0x193   :  { %v6335_v10 = vor.u32 %v8848_v25, %v6332_v57  ;;  %v8912_v14 = vld [vmem:[#allocation6 + $0x3c4] sm:$0xf]  ;;  %v6319_v39 = vor.u32 %v8844_v27, %v6316_v28  ;;  %v6300_v51 = vld [vmem:[#allocation6 + $0x190] sm:$0xf0] }
 0x194   :  { %4039 = vmatpush.bf16.msrb.mxu2 %v7947_v5  ;;  %4053 = vmatpush.bf16.msrb.mxu3 %v8075_v6  ;;  %v8884_v5 = vld [vmem:[#allocation6 + $0x2e4] sm:$0xf]  ;;  %v691_v6 = vadd.f32 %v9959_v47, %v302_v40  ;;  %v8027_v47 = vor.u32 %v9274_v4, %v8026_v62  ;;  %v6463_v40 = vor.u32 %v8880_v32, %v6460_v33  ;;  %v6444_v55 = vld [vmem:[#allocation6 + $0x2b0] sm:$0xf0] }
 0x195   :  { %v8840_v50 = vld [vmem:[#allocation6 + $0x184] sm:$0xf]  ;;  %v6447_v61 = vor.u32 %v8876_v52, %v6444_v55  ;;  %v6284_v63 = vld [vmem:[#allocation6 + $0x170] sm:$0xf0] }
 0x196   :  { %4013 = vmatpush.bf16.msrb.mxu0 %v7659_v11  ;;  %4027 = vmatpush.bf16.msrb.mxu1 %v7787_v12  ;;  %v6604_v11 = vld [vmem:[#allocation6 + $0x3f0] sm:$0xf0]  ;;  %v705_v12 = vadd.f32 %v9961_v48, %v303_v41  ;;  %v6479_v48 = vor.u32 %v8884_v5, %v6476_v8  ;;  %v723_v15 = vmax.f32 %v691_v6, 0.0  ;;  %v8808_v41 = vld [vmem:[#allocation6 + $0x84] sm:$0xf]  ;;  %v6303_v57 = vor.u32 %v8840_v50, %v6300_v51 }
 0x197   :  { %v6175_v25 = vor.u32 %v8808_v41, %v6172_v42  ;;  %v8836_v62 = vld [vmem:[#allocation6 + $0x164] sm:$0xf]  ;;  %v6428_v1 = vld [vmem:[#allocation6 + $0x290] sm:$0xf0] }
 0x198   :  { %4040 = vmatpush.bf16.msrb.mxu2 %v7931_v30  ;;  %4054 = vmatpush.bf16.msrb.mxu3 %v8059_v31  ;;  %v740_v30 = vmax.f32 %v707_v2, 0.0  ;;  %v6607_v31 = vor.u32 %v8916_v9, %v6604_v11  ;;  %v724_v35 = vmax.f32 %v705_v12, 0.0  ;;  %v9977_v7 = vpack.c.bf16 %v739_v29, %v723_v15  ;;  %v8904_v2 = vld [vmem:[#allocation6 + $0x384] sm:$0xf]  ;;  %v6556_v4 = vld [vmem:[#allocation6 + $0x390] sm:$0xf0] }
 0x199   :  { %v6287_v6 = vor.u32 %v8836_v62, %v6284_v63  ;;  %v6431_v8 = vor.u32 %v8872_v0, %v6428_v1  ;;  %v6559_v9 = vor.u32 %v8904_v2, %v6556_v4  ;;  %v8832_v11 = vld [vmem:[#allocation6 + $0x144] sm:$0xf]  ;;  %v6268_v12 = vld [vmem:[#allocation6 + $0x150] sm:$0xf0] }
 0x19a   :  { %4014 = vmatpush.bf16.msrb.mxu0 %v7643_v43  ;;  %4028 = vmatpush.bf16.msrb.mxu1 %v7771_v49  ;;  %10303 = vst [vmem:[#allocation20_spill] sm:$0xff] %v9977_v7  ;;  %v9979_v43 = vpack.c.bf16 %v740_v30, %v724_v35  ;;  %v6591_v49 = vor.u32 %v8912_v14, %v6588_v34  ;;  %v8868_v19 = vld [vmem:[#allocation6 + $0x264] sm:$0xf]  ;;  %v6540_v21 = vld [vmem:[#allocation6 + $0x370] sm:$0xf0] }
 0x19b   :  { %v6271_v28 = vor.u32 %v8832_v11, %v6268_v12  ;;  %v8796_v29 = vld [vmem:[#allocation6 + $0x24] sm:$0xf]  ;;  %v6124_v30 = vld [vmem:[#allocation6 + $0x30] sm:$0xf0] }
 0x19c   :  { %4041 = vmatpush.bf16.msrb.mxu2 %v7915_v59  ;;  %4055 = vmatpush.bf16.msrb.mxu3 %v8043_v60  ;;  %10304 = vst [vmem:[#allocation21_spill] sm:$0xff] %v9979_v43  ;;  %v8804_v59 = vld [vmem:[#allocation6 + $0x64] sm:$0xf]  ;;  %v6156_v60 = vld [vmem:[#allocation6 + $0x70] sm:$0xf0] }
 0x19d   :  { %4015 = vmatmul.bf16.vlgmr.msrb.gmra.mxu0 %v9971_v17  ;;  %4029 = vmatmul.bf16.vlgmr.msrb.gmra.mxu1 %v9973_v18  ;;  %v6159_v5 = vor.u32 %v8804_v59, %v6156_v60  ;;  %v8828_v32 = vld [vmem:[#allocation6 + $0x124] sm:$0xf]  ;;  %v6252_v33 = vld [vmem:[#allocation6 + $0x130] sm:$0xf0] }
 0x19e   :  { %4063 = vmatpush.bf16.msra.mxu0 %v6223_v24  ;;  %4077 = vmatpush.bf16.msra.mxu1 %v6351_v56  ;;  %v8908_v24 = vld [vmem:[#allocation6 + $0x3a4] sm:$0xf]  ;;  %v6572_v56 = vld [vmem:[#allocation6 + $0x3b0] sm:$0xf0] }
 0x19f   :  { %v6575_v58 = vor.u32 %v8908_v24, %v6572_v56  ;;  %v8864_v14 = vld [vmem:[#allocation6 + $0x244] sm:$0xf]  ;;  %v6396_v34 = vld [vmem:[#allocation6 + $0x250] sm:$0xf0] }
 0x1a0   :  { %4042 = vmatpush.bf16.msrb.mxu2 %v7899_v20  ;;  %4056 = vmatpush.bf16.msrb.mxu3 %v8027_v47  ;;  %v6412_v20 = vld [vmem:[#allocation6 + $0x270] sm:$0xf0]  ;;  %v8900_v47 = vld [vmem:[#allocation6 + $0x364] sm:$0xf] }
 0x1a1   :  { %v8896_v15 = vld [vmem:[#allocation6 + $0x344] sm:$0xf]  ;;  %v6524_v35 = vld [vmem:[#allocation6 + $0x350] sm:$0xf0] }
 0x1a2   :  { %4064 = vmatpush.bf16.msra.mxu0 %v6207_v45  ;;  %4078 = vmatpush.bf16.msra.mxu1 %v6335_v10  ;;  %v8800_v45 = vld [vmem:[#allocation6 + $0x44] sm:$0xf]  ;;  %v6140_v10 = vld [vmem:[#allocation6 + $0x50] sm:$0xf0]  ;;  %v6527_v50 = vor.u32 %v8896_v15, %v6524_v35 }
 0x1a3   :  { %4043 = vmatmul.bf16.vlgmr.msrb.gmra.mxu2 %v9977_v7  ;;  %4057 = vmatmul.bf16.vlgmr.msrb.gmra.mxu3 %v9979_v43  ;;  %v6143_v27 = vor.u32 %v8800_v45, %v6140_v10  ;;  %v6108_v41 = vld [vmem:[#allocation6 + $0x10] sm:$0xf0]  ;;  %v8824_v42 = vld [vmem:[#allocation6 + $0x104] sm:$0xf] }
 0x1a4   :  { %4091 = vmatpush.bf16.msra.mxu2 %v6479_v48  ;;  %4105 = vmatpush.bf16.msra.mxu3 %v6607_v31  ;;  %v6415_v48 = vor.u32 %v8868_v19, %v6412_v20  ;;  %v6543_v31 = vor.u32 %v8900_v47, %v6540_v21  ;;  %v6236_v51 = vld [vmem:[#allocation6 + $0x110] sm:$0xf0]  ;;  %v8948_v52 = vld [vmem:[#allocation6 + $0x4e4] sm:$0xf] }
 0x1a5   :  { %v6732_v55 = vld [vmem:[#allocation6 + $0x4f0] sm:$0xf0]  ;;  %v8980_v24 = vld [vmem:[#allocation6 + $0x5e4] sm:$0xf] }
 0x1a6   :  { %4065 = vmatpush.bf16.msra.mxu0 %v6191_v38  ;;  %4079 = vmatpush.bf16.msra.mxu1 %v6319_v39  ;;  %v6127_v38 = vor.u32 %v8796_v29, %v6124_v30  ;;  %v6255_v39 = vor.u32 %v8828_v32, %v6252_v33  ;;  %v6860_v56 = vld [vmem:[#allocation6 + $0x5f0] sm:$0xf0]  ;;  %v8892_v59 = vld [vmem:[#allocation6 + $0x324] sm:$0xf]  ;;  %v6735_v62 = vor.u32 %v8948_v52, %v6732_v55 }
 0x1a7   :  { %v6508_v60 = vld [vmem:[#allocation6 + $0x330] sm:$0xf0]  ;;  %v6863_v63 = vor.u32 %v8980_v24, %v6860_v56  ;;  %v8944_v0 = vld [vmem:[#allocation6 + $0x4c4] sm:$0xf] }
 0x1a8   :  { %4092 = vmatpush.bf16.msra.mxu2 %v6463_v40  ;;  %4106 = vmatpush.bf16.msra.mxu3 %v6591_v49  ;;  %v8792_v40 = vld [vmem:[#allocation6 + $0x4] sm:$0xf]  ;;  %v6399_v49 = vor.u32 %v8864_v14, %v6396_v34  ;;  %v6716_v1 = vld [vmem:[#allocation6 + $0x4d0] sm:$0xf0] }
 0x1a9   :  { %v8976_v2 = vld [vmem:[#allocation6 + $0x5c4] sm:$0xf]  ;;  %v6364_v10 = vld [vmem:[#allocation6 + $0x210] sm:$0xf0]  ;;  %v6719_v47 = vor.u32 %v8944_v0, %v6716_v1 }
 0x1aa   :  { %4066 = vmatpush.bf16.msra.mxu0 %v6175_v25  ;;  %4080 = vmatpush.bf16.msra.mxu1 %v6303_v57  ;;  %v8860_v25 = vld [vmem:[#allocation6 + $0x224] sm:$0xf]  ;;  %v6380_v57 = vld [vmem:[#allocation6 + $0x230] sm:$0xf0] }
 0x1ab   :  { %v6383_v4 = vor.u32 %v8860_v25, %v6380_v57  ;;  %v8856_v45 = vld [vmem:[#allocation6 + $0x204] sm:$0xf]  ;;  %v6988_v12 = vld [vmem:[#allocation6 + $0x6f0] sm:$0xf0] }
 0x1ac   :  { %4093 = vmatpush.bf16.msra.mxu2 %v6447_v61  ;;  %4107 = vmatpush.bf16.msra.mxu3 %v6575_v58  ;;  %v6111_v61 = vor.u32 %v8792_v40, %v6108_v41  ;;  %v6239_v58 = vor.u32 %v8824_v42, %v6236_v51  ;;  %v9012_v11 = vld [vmem:[#allocation6 + $0x6e4] sm:$0xf]  ;;  %v7116_v20 = vld [vmem:[#allocation6 + $0x7f0] sm:$0xf0] }
 0x1ad   :  { %v9044_v19 = vld [vmem:[#allocation6 + $0x7e4] sm:$0xf]  ;;  %v6700_v30 = vld [vmem:[#allocation6 + $0x4b0] sm:$0xf0] }
 0x1ae   :  { %4067 = vmatpush.bf16.msra.mxu0 %v6159_v5  ;;  %4081 = vmatpush.bf16.msra.mxu1 %v6287_v6  ;;  %v6511_v5 = vor.u32 %v8892_v59, %v6508_v60  ;;  %v6844_v6 = vld [vmem:[#allocation6 + $0x5d0] sm:$0xf0]  ;;  %v8940_v29 = vld [vmem:[#allocation6 + $0x4a4] sm:$0xf] }
 0x1af   :  { %v6847_v21 = vor.u32 %v8976_v2, %v6844_v6  ;;  %v8972_v32 = vld [vmem:[#allocation6 + $0x5a4] sm:$0xf]  ;;  %v6828_v33 = vld [vmem:[#allocation6 + $0x5b0] sm:$0xf0] }
 0x1b0   :  { %4094 = vmatpush.bf16.msra.mxu2 %v6431_v8  ;;  %4108 = vmatpush.bf16.msra.mxu3 %v6559_v9  ;;  %v8888_v8 = vld [vmem:[#allocation6 + $0x304] sm:$0xf]  ;;  %v6492_v9 = vld [vmem:[#allocation6 + $0x310] sm:$0xf0] }
 0x1b1   :  { %v9008_v14 = vld [vmem:[#allocation6 + $0x6c4] sm:$0xf]  ;;  %v6972_v34 = vld [vmem:[#allocation6 + $0x6d0] sm:$0xf0] }
 0x1b2   :  { %4068 = vmatpush.bf16.msra.mxu0 %v6143_v27  ;;  %4082 = vmatpush.bf16.msra.mxu1 %v6271_v28  ;;  %v6367_v27 = vor.u32 %v8856_v45, %v6364_v10  ;;  %v6495_v28 = vor.u32 %v8888_v8, %v6492_v9  ;;  %v9040_v15 = vld [vmem:[#allocation6 + $0x7c4] sm:$0xf]  ;;  %v7100_v35 = vld [vmem:[#allocation6 + $0x7d0] sm:$0xf0]  ;;  %v6975_v42 = vor.u32 %v9008_v14, %v6972_v34 }
 0x1b3   :  { %v8936_v40 = vld [vmem:[#allocation6 + $0x484] sm:$0xf]  ;;  %v6684_v41 = vld [vmem:[#allocation6 + $0x490] sm:$0xf0] }
 0x1b4   :  { %4095 = vmatpush.bf16.msra.mxu2 %v6415_v48  ;;  %4109 = vmatpush.bf16.msra.mxu3 %v6543_v31  ;;  %v6991_v48 = vor.u32 %v9012_v11, %v6988_v12  ;;  %v7119_v31 = vor.u32 %v9044_v19, %v7116_v20  ;;  %v6812_v51 = vld [vmem:[#allocation6 + $0x590] sm:$0xf0]  ;;  %v9004_v52 = vld [vmem:[#allocation6 + $0x6a4] sm:$0xf]  ;;  %v6687_v25 = vor.u32 %v8936_v40, %v6684_v41 }
 0x1b5   :  { %v6956_v55 = vld [vmem:[#allocation6 + $0x6b0] sm:$0xf0]  ;;  %v9036_v24 = vld [vmem:[#allocation6 + $0x7a4] sm:$0xf] }
 0x1b6   :  { %4069 = vmatpush.bf16.msra.mxu0 %v6127_v38  ;;  %4083 = vmatpush.bf16.msra.mxu1 %v6255_v39  ;;  %v6703_v38 = vor.u32 %v8940_v29, %v6700_v30  ;;  %v6831_v39 = vor.u32 %v8972_v32, %v6828_v33  ;;  %v7084_v56 = vld [vmem:[#allocation6 + $0x7b0] sm:$0xf0]  ;;  %v8932_v59 = vld [vmem:[#allocation6 + $0x464] sm:$0xf] }
 0x1b7   :  { %v6668_v60 = vld [vmem:[#allocation6 + $0x470] sm:$0xf0]  ;;  %v9000_v0 = vld [vmem:[#allocation6 + $0x684] sm:$0xf] }
 0x1b8   :  { %4096 = vmatpush.bf16.msra.mxu2 %v6399_v49  ;;  %4110 = vmatpush.bf16.msra.mxu3 %v6527_v50  ;;  %v7103_v49 = vor.u32 %v9040_v15, %v7100_v35  ;;  %v8968_v50 = vld [vmem:[#allocation6 + $0x584] sm:$0xf]  ;;  %v6940_v1 = vld [vmem:[#allocation6 + $0x690] sm:$0xf0] }
 0x1b9   :  { %v6815_v57 = vor.u32 %v8968_v50, %v6812_v51  ;;  %v9032_v2 = vld [vmem:[#allocation6 + $0x784] sm:$0xf]  ;;  %v6652_v10 = vld [vmem:[#allocation6 + $0x450] sm:$0xf0]  ;;  %v6943_v8 = vor.u32 %v9000_v0, %v6940_v1 }
 0x1ba   :  { %4070 = vmatpush.bf16.msra.mxu0 %v6111_v61  ;;  %4084 = vmatpush.bf16.msra.mxu1 %v6239_v58  ;;  %v6959_v61 = vor.u32 %v9004_v52, %v6956_v55  ;;  %v7087_v58 = vor.u32 %v9036_v24, %v7084_v56  ;;  %v8928_v45 = vld [vmem:[#allocation6 + $0x444] sm:$0xf]  ;;  %v6780_v12 = vld [vmem:[#allocation6 + $0x550] sm:$0xf0] }
 0x1bb   :  { %v8960_v11 = vld [vmem:[#allocation6 + $0x544] sm:$0xf]  ;;  %v6924_v20 = vld [vmem:[#allocation6 + $0x670] sm:$0xf0] }
 0x1bc   :  { %4097 = vmatpush.bf16.msra.mxu2 %v6383_v4  ;;  %4111 = vmatpush.bf16.msra.mxu3 %v6511_v5  ;;  %v7068_v4 = vld [vmem:[#allocation6 + $0x790] sm:$0xf0]  ;;  %v6671_v5 = vor.u32 %v8932_v59, %v6668_v60  ;;  %v8996_v19 = vld [vmem:[#allocation6 + $0x664] sm:$0xf] }
 0x1bd   :  { %4071 = vmatmul.bf16.vlgmr.msra.gmra.mxu0 %v9901_v53  ;;  %4085 = vmatmul.bf16.vlgmr.msra.gmra.mxu1 %v9903_v54  ;;  %v7071_v9 = vor.u32 %v9032_v2, %v7068_v4  ;;  %v8924_v29 = vld [vmem:[#allocation6 + $0x424] sm:$0xf]  ;;  %v6636_v30 = vld [vmem:[#allocation6 + $0x430] sm:$0xf0] }
 0x1be   :  { %4119 = vmatpush.bf16.msrb.mxu0 %v6735_v62  ;;  %4133 = vmatpush.bf16.msrb.mxu1 %v6863_v63  ;;  %v8964_v62 = vld [vmem:[#allocation6 + $0x564] sm:$0xf]  ;;  %v6796_v63 = vld [vmem:[#allocation6 + $0x570] sm:$0xf0] }
 0x1bf   :  { %v6799_v6 = vor.u32 %v8964_v62, %v6796_v63  ;;  %v8956_v32 = vld [vmem:[#allocation6 + $0x524] sm:$0xf]  ;;  %v6764_v33 = vld [vmem:[#allocation6 + $0x530] sm:$0xf0] }
 0x1c0   :  { %4098 = vmatpush.bf16.msra.mxu2 %v6367_v27  ;;  %4112 = vmatpush.bf16.msra.mxu3 %v6495_v28  ;;  %v6655_v27 = vor.u32 %v8928_v45, %v6652_v10  ;;  %v6783_v28 = vor.u32 %v8960_v11, %v6780_v12  ;;  %v8992_v14 = vld [vmem:[#allocation6 + $0x644] sm:$0xf]  ;;  %v6908_v34 = vld [vmem:[#allocation6 + $0x650] sm:$0xf0] }
 0x1c1   :  { %v9024_v15 = vld [vmem:[#allocation6 + $0x744] sm:$0xf]  ;;  %v7036_v35 = vld [vmem:[#allocation6 + $0x750] sm:$0xf0] }
 0x1c2   :  { %4120 = vmatpush.bf16.msrb.mxu0 %v6719_v47  ;;  %4134 = vmatpush.bf16.msrb.mxu1 %v6847_v21  ;;  %v9028_v47 = vld [vmem:[#allocation6 + $0x764] sm:$0xf]  ;;  %v7052_v21 = vld [vmem:[#allocation6 + $0x770] sm:$0xf0]  ;;  %v7039_v50 = vor.u32 %v9024_v15, %v7036_v35 }
 0x1c3   :  { %4099 = vmatmul.bf16.vlgmr.msra.gmra.mxu2 %v9909_v22  ;;  %4113 = vmatmul.bf16.vlgmr.msra.gmra.mxu3 %v9911_v23  ;;  %v8920_v40 = vld [vmem:[#allocation6 + $0x404] sm:$0xf]  ;;  %v6620_v41 = vld [vmem:[#allocation6 + $0x410] sm:$0xf0] }
 0x1c4   :  { %4147 = vmatpush.bf16.msrb.mxu2 %v6991_v48  ;;  %4161 = vmatpush.bf16.msrb.mxu3 %v7119_v31  ;;  %v6927_v48 = vor.u32 %v8996_v19, %v6924_v20  ;;  %v7055_v31 = vor.u32 %v9028_v47, %v7052_v21  ;;  %v6748_v51 = vld [vmem:[#allocation6 + $0x510] sm:$0xf0]  ;;  %v9076_v52 = vld [vmem:[#allocation6 + $0x8e4] sm:$0xf]  ;;  %v9987_v47 = vld [vmem:[#allocation7] sm:$0xf] }
 0x1c5   :  { %v7244_v55 = vld [vmem:[#allocation6 + $0x8f0] sm:$0xf0]  ;;  %v9108_v24 = vld [vmem:[#allocation6 + $0x9e4] sm:$0xf] }
 0x1c6   :  { %4121 = vmatpush.bf16.msrb.mxu0 %v6703_v38  ;;  %4135 = vmatpush.bf16.msrb.mxu1 %v6831_v39  ;;  %v6639_v38 = vor.u32 %v8924_v29, %v6636_v30  ;;  %v6767_v39 = vor.u32 %v8956_v32, %v6764_v33  ;;  %v7372_v56 = vld [vmem:[#allocation6 + $0x9f0] sm:$0xf0]  ;;  %v9020_v59 = vld [vmem:[#allocation6 + $0x724] sm:$0xf]  ;;  %v7247_v63 = vor.u32 %v9076_v52, %v7244_v55 }
 0x1c7   :  { %v7020_v60 = vld [vmem:[#allocation6 + $0x730] sm:$0xf0]  ;;  %v9072_v62 = vld [vmem:[#allocation6 + $0x8c4] sm:$0xf]  ;;  %v7375_v0 = vor.u32 %v9108_v24, %v7372_v56 }
 0x1c8   :  { %4148 = vmatpush.bf16.msrb.mxu2 %v6975_v42  ;;  %4162 = vmatpush.bf16.msrb.mxu3 %v7103_v49  ;;  %v8952_v42 = vld [vmem:[#allocation6 + $0x504] sm:$0xf]  ;;  %v6911_v49 = vor.u32 %v8992_v14, %v6908_v34  ;;  %v7228_v1 = vld [vmem:[#allocation6 + $0x8d0] sm:$0xf0]  ;;  %v10300_v34 = vperm.slane %v9987_v47, 0 }
 0x1c9   :  { %v9104_v2 = vld [vmem:[#allocation6 + $0x9c4] sm:$0xf]  ;;  %v7356_v4 = vld [vmem:[#allocation6 + $0x9d0] sm:$0xf0]  ;;  %v7231_v21 = vor.u32 %v9072_v62, %v7228_v1 }
 0x1ca   :  { %4122 = vmatpush.bf16.msrb.mxu0 %v6687_v25  ;;  %4136 = vmatpush.bf16.msrb.mxu1 %v6815_v57  ;;  %v8988_v25 = vld [vmem:[#allocation6 + $0x624] sm:$0xf]  ;;  %v6892_v57 = vld [vmem:[#allocation6 + $0x630] sm:$0xf0] }
 0x1cb   :  { %v8984_v45 = vld [vmem:[#allocation6 + $0x604] sm:$0xf]  ;;  %v6876_v10 = vld [vmem:[#allocation6 + $0x610] sm:$0xf0] }
 0x1cc   :  { %4149 = vmatpush.bf16.msrb.mxu2 %v6959_v61  ;;  %4163 = vmatpush.bf16.msrb.mxu3 %v7087_v58  ;;  %v6623_v61 = vor.u32 %v8920_v40, %v6620_v41  ;;  %v6751_v58 = vor.u32 %v8952_v42, %v6748_v51  ;;  %v9140_v11 = vld [vmem:[#allocation6 + $0xae4] sm:$0xf]  ;;  %v7500_v12 = vld [vmem:[#allocation6 + $0xaf0] sm:$0xf0] }
 0x1cd   :  { %v9172_v19 = vld [vmem:[#allocation6 + $0xbe4] sm:$0xf]  ;;  %v7628_v20 = vld [vmem:[#allocation6 + $0xbf0] sm:$0xf0]  ;;  %v7503_v32 = vor.u32 %v9140_v11, %v7500_v12 }
 0x1ce   :  { %4123 = vmatpush.bf16.msrb.mxu0 %v6671_v5  ;;  %4137 = vmatpush.bf16.msrb.mxu1 %v6799_v6  ;;  %v6895_v5 = vor.u32 %v8988_v25, %v6892_v57  ;;  %v7023_v6 = vor.u32 %v9020_v59, %v7020_v60  ;;  %v9068_v30 = vld [vmem:[#allocation6 + $0x8a4] sm:$0xf]  ;;  %v7631_v33 = vor.u32 %v9172_v19, %v7628_v20  ;;  %v7340_v14 = vld [vmem:[#allocation6 + $0x9b0] sm:$0xf0] }
 0x1cf   :  { %v9136_v15 = vld [vmem:[#allocation6 + $0xac4] sm:$0xf]  ;;  %v7484_v35 = vld [vmem:[#allocation6 + $0xad0] sm:$0xf0] }
 0x1d0   :  { %4150 = vmatpush.bf16.msrb.mxu2 %v6943_v8  ;;  %4164 = vmatpush.bf16.msrb.mxu3 %v7071_v9  ;;  %v9016_v8 = vld [vmem:[#allocation6 + $0x704] sm:$0xf]  ;;  %v7004_v9 = vld [vmem:[#allocation6 + $0x710] sm:$0xf0]  ;;  %v7487_v55 = vor.u32 %v9136_v15, %v7484_v35 }
 0x1d1   :  { %v7007_v29 = vor.u32 %v9016_v8, %v7004_v9  ;;  %v7196_v51 = vld [vmem:[#allocation6 + $0x890] sm:$0xf0]  ;;  %v9096_v56 = vld [vmem:[#allocation6 + $0x984] sm:$0xf] }
 0x1d2   :  { %4124 = vmatpush.bf16.msrb.mxu0 %v6655_v27  ;;  %4138 = vmatpush.bf16.msrb.mxu1 %v6783_v28  ;;  %v7359_v27 = vor.u32 %v9104_v2, %v7356_v4  ;;  %v6879_v28 = vor.u32 %v8984_v45, %v6876_v10  ;;  %v7324_v25 = vld [vmem:[#allocation6 + $0x990] sm:$0xf0]  ;;  %v9132_v57 = vld [vmem:[#allocation6 + $0xaa4] sm:$0xf] }
 0x1d3   :  { %v7468_v59 = vld [vmem:[#allocation6 + $0xab0] sm:$0xf0]  ;;  %v9164_v60 = vld [vmem:[#allocation6 + $0xba4] sm:$0xf] }
 0x1d4   :  { %4151 = vmatpush.bf16.msrb.mxu2 %v6927_v48  ;;  %4165 = vmatpush.bf16.msrb.mxu3 %v7055_v31  ;;  %v7212_v48 = vld [vmem:[#allocation6 + $0x8b0] sm:$0xf0]  ;;  %v9100_v31 = vld [vmem:[#allocation6 + $0x9a4] sm:$0xf]  ;;  %v7471_v2 = vor.u32 %v9132_v57, %v7468_v59 }
 0x1d5   :  { %v7215_v40 = vor.u32 %v9068_v30, %v7212_v48  ;;  %v7343_v41 = vor.u32 %v9100_v31, %v7340_v14  ;;  %v7180_v1 = vld [vmem:[#allocation6 + $0x870] sm:$0xf0]  ;;  %v9128_v45 = vld [vmem:[#allocation6 + $0xa84] sm:$0xf] }
 0x1d6   :  { %4125 = vmatpush.bf16.msrb.mxu0 %v6639_v38  ;;  %4139 = vmatpush.bf16.msrb.mxu1 %v6767_v39  ;;  %v9168_v38 = vld [vmem:[#allocation6 + $0xbc4] sm:$0xf]  ;;  %v7612_v39 = vld [vmem:[#allocation6 + $0xbd0] sm:$0xf0] }
 0x1d7   :  { %v7615_v24 = vor.u32 %v9168_v38, %v7612_v39  ;;  %v7452_v10 = vld [vmem:[#allocation6 + $0xa90] sm:$0xf0]  ;;  %v9160_v8 = vld [vmem:[#allocation6 + $0xb84] sm:$0xf] }
 0x1d8   :  { %4152 = vmatpush.bf16.msrb.mxu2 %v6911_v49  ;;  %4166 = vmatpush.bf16.msrb.mxu3 %v7039_v50  ;;  %v9064_v50 = vld [vmem:[#allocation6 + $0x884] sm:$0xf]  ;;  %v7580_v9 = vld [vmem:[#allocation6 + $0xb90] sm:$0xf0] }
 0x1d9   :  { %v3848_v42 = vpop.f32.mrf.mxu0  ;;  %v3862_v49 = vpop.f32.mrf.mxu1  ;;  %v7199_v62 = vor.u32 %v9064_v50, %v7196_v51  ;;  %v9088_v30 = vld [vmem:[#allocation6 + $0x944] sm:$0xf]  ;;  %v7292_v48 = vld [vmem:[#allocation6 + $0x950] sm:$0xf0] }
 0x1da   :  { %4126 = vmatpush.bf16.msrb.mxu0 %v6623_v61  ;;  %4140 = vmatpush.bf16.msrb.mxu1 %v6751_v58  ;;  %v3849_v52 = vadd.f32 %v3848_v42, %v10300_v34  ;;  %v7596_v61 = vld [vmem:[#allocation6 + $0xbb0] sm:$0xf0]  ;;  %v9124_v31 = vld [vmem:[#allocation6 + $0xa64] sm:$0xf]  ;;  %v7295_v35 = vor.u32 %v9088_v30, %v7292_v48  ;;  %v7010_v34 = vld [vmem:[#allocation6 + $0x708] sm:$0xf] }
 0x1db   :  { %v7599_v4 = vor.u32 %v9164_v60, %v7596_v61  ;;  %v7564_v14 = vld [vmem:[#allocation6 + $0xb70] sm:$0xf0]  ;;  %v9052_v38 = vld [vmem:[#allocation6 + $0x824] sm:$0xf] }
 0x1dc   :  { %4153 = vmatpush.bf16.msrb.mxu2 %v6895_v5  ;;  %4167 = vmatpush.bf16.msrb.mxu3 %v7023_v6  ;;  %v3863_v58 = vadd.f32 %v3862_v49, %v3849_v52  ;;  %v9092_v5 = vld [vmem:[#allocation6 + $0x964] sm:$0xf]  ;;  %v7308_v6 = vld [vmem:[#allocation6 + $0x970] sm:$0xf0] }
 0x1dd   :  { %4127 = vmatmul.bf16.vlgmr.msrb.gmra.mxu0 %v9919_v3  ;;  %4141 = vmatmul.bf16.vlgmr.msrb.gmra.mxu1 %v9921_v26  ;;  %v7311_v12 = vor.u32 %v9092_v5, %v7308_v6  ;;  %v7148_v39 = vld [vmem:[#allocation6 + $0x830] sm:$0xf0]  ;;  %v9084_v50 = vld [vmem:[#allocation6 + $0x924] sm:$0xf] }
 0x1de   :  { %4175 = vmatpush.bf16.msra.mxu0 %v7247_v63  ;;  %4189 = vmatpush.bf16.msra.mxu1 %v7375_v0  ;;  %v7327_v63 = vor.u32 %v9096_v56, %v7324_v25  ;;  %v9060_v0 = vld [vmem:[#allocation6 + $0x864] sm:$0xf]  ;;  %v7276_v51 = vld [vmem:[#allocation6 + $0x930] sm:$0xf0]  ;;  %v7151_v59 = vor.u32 %v9052_v38, %v7148_v39 }
 0x1df   :  { %v7183_v11 = vor.u32 %v9060_v0, %v7180_v1  ;;  %v9120_v52 = vld [vmem:[#allocation6 + $0xa44] sm:$0xf]  ;;  %v7548_v25 = vld [vmem:[#allocation6 + $0xb50] sm:$0xf0]  ;;  %v7279_v60 = vor.u32 %v9084_v50, %v7276_v51 }
 0x1e0   :  { %4154 = vmatpush.bf16.msrb.mxu2 %v6879_v28  ;;  %4168 = vmatpush.bf16.msrb.mxu3 %v7007_v29  ;;  %v7455_v28 = vor.u32 %v9128_v45, %v7452_v10  ;;  %v7583_v29 = vor.u32 %v9160_v8, %v7580_v9  ;;  %v9152_v56 = vld [vmem:[#allocation6 + $0xb44] sm:$0xf]  ;;  %v7260_v5 = vld [vmem:[#allocation6 + $0x910] sm:$0xf0] }
 0x1e1   :  { %v9996_v19 = vpop.f32.mrf.mxu0  ;;  %v9998_v20 = vpop.f32.mrf.mxu1  ;;  %v9048_v61 = vld [vmem:[#allocation6 + $0x804] sm:$0xf]  ;;  %v7884_v8 = vld [vmem:[#allocation6 + $0xdf0] sm:$0xf0] }
 0x1e2   :  { %4176 = vmatpush.bf16.msra.mxu0 %v7231_v21  ;;  %4190 = vmatpush.bf16.msra.mxu1 %v7359_v27  ;;  %v9056_v21 = vld [vmem:[#allocation6 + $0x844] sm:$0xf]  ;;  %v7164_v27 = vld [vmem:[#allocation6 + $0x850] sm:$0xf0] }
 0x1e3   :  { %4155 = vmatmul.bf16.vlgmr.msrb.gmra.mxu2 %v9927_v44  ;;  %4169 = vmatmul.bf16.vlgmr.msrb.gmra.mxu3 %v9929_v46  ;;  %v7167_v15 = vor.u32 %v9056_v21, %v7164_v27  ;;  %v9204_v6 = vld [vmem:[#allocation6 + $0xce4] sm:$0xf]  ;;  %v7532_v21 = vld [vmem:[#allocation6 + $0xb30] sm:$0xf0] }
 0x1e4   :  { %4203 = vmatpush.bf16.msra.mxu2 %v7503_v32  ;;  %4217 = vmatpush.bf16.msra.mxu3 %v7631_v33  ;;  %v7436_v32 = vld [vmem:[#allocation6 + $0xa70] sm:$0xf0]  ;;  %v9156_v33 = vld [vmem:[#allocation6 + $0xb64] sm:$0xf] }
 0x1e5   :  { %v7439_v42 = vor.u32 %v9124_v31, %v7436_v32  ;;  %v7567_v49 = vor.u32 %v9156_v33, %v7564_v14  ;;  %v9236_v10 = vld [vmem:[#allocation6 + $0xde4] sm:$0xf]  ;;  %v7740_v14 = vld [vmem:[#allocation6 + $0xcd0] sm:$0xf0] }
 0x1e6   :  { %4177 = vmatpush.bf16.msra.mxu0 %v7215_v40  ;;  %4191 = vmatpush.bf16.msra.mxu1 %v7343_v41  ;;  %v3876_v40 = vpop.f32.mrf.mxu2  ;;  %v3890_v41 = vpop.f32.mrf.mxu3  ;;  %v9116_v9 = vld [vmem:[#allocation6 + $0xa24] sm:$0xf]  ;;  %v7887_v32 = vor.u32 %v9236_v10, %v7884_v8  ;;  %v7868_v39 = vld [vmem:[#allocation6 + $0xdd0] sm:$0xf0] }
 0x1e7   :  { %v9200_v33 = vld [vmem:[#allocation6 + $0xcc4] sm:$0xf]  ;;  %v8012_v51 = vld [vmem:[#allocation6 + $0xef0] sm:$0xf0] }
 0x1e8   :  { %4204 = vmatpush.bf16.msra.mxu2 %v7487_v55  ;;  %4218 = vmatpush.bf16.msra.mxu3 %v7615_v24  ;;  %v3877_v55 = vadd.f32 %v3876_v40, %v3863_v58  ;;  %v7420_v24 = vld [vmem:[#allocation6 + $0xa50] sm:$0xf0]  ;;  %v9112_v40 = vld [vmem:[#allocation6 + $0xa04] sm:$0xf] }
 0x1e9   :  { %v7756_v58 = vld [vmem:[#allocation6 + $0xcf0] sm:$0xf0]  ;;  %v9268_v50 = vld [vmem:[#allocation6 + $0xee4] sm:$0xf] }
 0x1ea   :  { %4178 = vmatpush.bf16.msra.mxu0 %v7199_v62  ;;  %4192 = vmatpush.bf16.msra.mxu1 %v7327_v63  ;;  %v3891_v57 = vadd.f32 %v3890_v41, %v3877_v55  ;;  %v7132_v62 = vld [vmem:[#allocation6 + $0x810] sm:$0xf0]  ;;  %v9080_v63 = vld [vmem:[#allocation6 + $0x904] sm:$0xf]  ;;  %v3904_v0 = vpop.f32.mrf.mxu0  ;;  %v3918_v1 = vpop.f32.mrf.mxu1  ;;  %v7759_v31 = vor.u32 %v9204_v6, %v7756_v58 }
 0x1eb   :  { %v7388_v41 = vld [vmem:[#allocation6 + $0xa10] sm:$0xf0]  ;;  %v9296_v6 = vld [vmem:[#allocation6 + $0xfc4] sm:$0xf] }
 0x1ec   :  { %4205 = vmatpush.bf16.msra.mxu2 %v7471_v2  ;;  %4219 = vmatpush.bf16.msra.mxu3 %v7599_v4  ;;  %v7423_v2 = vor.u32 %v9120_v52, %v7420_v24  ;;  %v7551_v4 = vor.u32 %v9152_v56, %v7548_v25  ;;  %v3905_v45 = vadd.f32 %v3904_v0, %v3891_v57  ;;  %v9300_v52 = vld [vmem:[#allocation6 + $0xfe4] sm:$0xf]  ;;  %v8140_v55 = vld [vmem:[#allocation6 + $0xff0] sm:$0xf0] }
 0x1ed   :  { %v7743_v25 = vor.u32 %v9200_v33, %v7740_v14  ;;  %v8143_v0 = vor.u32 %v9300_v52, %v8140_v55  ;;  %v8124_v58 = vld [vmem:[#allocation6 + $0xfd0] sm:$0xf0]  ;;  %v9260_v33 = vld [vmem:[#allocation6 + $0xea4] sm:$0xf] }
 0x1ee   :  { %4179 = vmatpush.bf16.msra.mxu0 %v7183_v11  ;;  %4193 = vmatpush.bf16.msra.mxu1 %v7311_v12  ;;  %v7404_v11 = vld [vmem:[#allocation6 + $0xa30] sm:$0xf0]  ;;  %v9148_v12 = vld [vmem:[#allocation6 + $0xb24] sm:$0xf]  ;;  %v3919_v27 = vadd.f32 %v3918_v1, %v3905_v45  ;;  %v10000_v30 = vpop.f32.mrf.mxu2  ;;  %v10002_v48 = vpop.f32.mrf.mxu3 }
 0x1ef   :  { %v7535_v38 = vor.u32 %v9148_v12, %v7532_v21  ;;  %v9228_v1 = vld [vmem:[#allocation6 + $0xda4] sm:$0xf]  ;;  %v7708_v21 = vld [vmem:[#allocation6 + $0xc90] sm:$0xf0] }
 0x1f0   :  { %4206 = vmatpush.bf16.msra.mxu2 %v7455_v28  ;;  %4220 = vmatpush.bf16.msra.mxu3 %v7583_v29  ;;  %v7135_v28 = vor.u32 %v9048_v61, %v7132_v62  ;;  %v7263_v29 = vor.u32 %v9080_v63, %v7260_v5  ;;  %v9196_v61 = vld [vmem:[#allocation6 + $0xca4] sm:$0xf]  ;;  %v7724_v62 = vld [vmem:[#allocation6 + $0xcb0] sm:$0xf0]  ;;  %v8015_v63 = vor.u32 %v9268_v50, %v8012_v51 }
 0x1f1   :  { %v7996_v5 = vld [vmem:[#allocation6 + $0xed0] sm:$0xf0]  ;;  %v9192_v12 = vld [vmem:[#allocation6 + $0xc84] sm:$0xf] }
 0x1f2   :  { %4180 = vmatpush.bf16.msra.mxu0 %v7167_v15  ;;  %4194 = vmatpush.bf16.msra.mxu1 %v7295_v35  ;;  %v9232_v15 = vld [vmem:[#allocation6 + $0xdc4] sm:$0xf]  ;;  %v7407_v35 = vor.u32 %v9116_v9, %v7404_v11  ;;  %v10004_v24 = vpop.f32.mrf.mxu0  ;;  %v10006_v56 = vpop.f32.mrf.mxu1  ;;  %v7727_v9 = vor.u32 %v9196_v61, %v7724_v62  ;;  %v8092_v62 = vld [vmem:[#allocation6 + $0xf90] sm:$0xf0] }
 0x1f3   :  { %v7871_v57 = vor.u32 %v9232_v15, %v7868_v39  ;;  %v7980_v15 = vld [vmem:[#allocation6 + $0xeb0] sm:$0xf0]  ;;  %v9220_v55 = vld [vmem:[#allocation6 + $0xd64] sm:$0xf] }
 0x1f4   :  { %4207 = vmatpush.bf16.msra.mxu2 %v7439_v42  ;;  %4221 = vmatpush.bf16.msra.mxu3 %v7567_v49  ;;  %v9144_v42 = vld [vmem:[#allocation6 + $0xb04] sm:$0xf]  ;;  %v7516_v49 = vld [vmem:[#allocation6 + $0xb10] sm:$0xf0]  ;;  %v7983_v51 = vor.u32 %v9260_v33, %v7980_v15 }
 0x1f5   :  { %v9288_v61 = vld [vmem:[#allocation6 + $0xf84] sm:$0xf]  ;;  %v7788_v15 = vld [vmem:[#allocation6 + $0xd30] sm:$0xf0] }
 0x1f6   :  { %4181 = vmatpush.bf16.msra.mxu0 %v7151_v59  ;;  %4195 = vmatpush.bf16.msra.mxu1 %v7279_v60  ;;  %v7391_v59 = vor.u32 %v9112_v40, %v7388_v41  ;;  %v7519_v60 = vor.u32 %v9144_v42, %v7516_v49  ;;  %v3932_v45 = vpop.f32.mrf.mxu2  ;;  %v3946_v10 = vpop.f32.mrf.mxu3  ;;  %v7711_v40 = vor.u32 %v9192_v12, %v7708_v21  ;;  %v9188_v42 = vld [vmem:[#allocation6 + $0xc64] sm:$0xf]  ;;  %v7692_v49 = vld [vmem:[#allocation6 + $0xc70] sm:$0xf0] }
 0x1f7   :  { %v3933_v8 = vadd.f32 %v3932_v45, %v3919_v27  ;;  %v9216_v45 = vld [vmem:[#allocation6 + $0xd44] sm:$0xf]  ;;  %v8076_v12 = vld [vmem:[#allocation6 + $0xf70] sm:$0xf0] }
 0x1f8   :  { %4208 = vmatpush.bf16.msra.mxu2 %v7423_v2  ;;  %4222 = vmatpush.bf16.msra.mxu3 %v7551_v4  ;;  %v7852_v2 = vld [vmem:[#allocation6 + $0xdb0] sm:$0xf0]  ;;  %v9264_v4 = vld [vmem:[#allocation6 + $0xec4] sm:$0xf] }
 0x1f9   :  { %v7855_v11 = vor.u32 %v9228_v1, %v7852_v2  ;;  %v3947_v14 = vadd.f32 %v3946_v10, %v3933_v8  ;;  %v7695_v1 = vor.u32 %v9188_v42, %v7692_v49  ;;  %v7804_v10 = vld [vmem:[#allocation6 + $0xd50] sm:$0xf0]  ;;  %v9252_v8 = vld [vmem:[#allocation6 + $0xe64] sm:$0xf] }
 0x1fa   :  { %4182 = vmatpush.bf16.msra.mxu0 %v7135_v28  ;;  %4196 = vmatpush.bf16.msra.mxu1 %v7263_v29  ;;  %v7999_v28 = vor.u32 %v9264_v4, %v7996_v5  ;;  %v8127_v29 = vor.u32 %v9296_v6, %v8124_v58  ;;  %v3960_v27 = vpop.f32.mrf.mxu0  ;;  %v3974_v50 = vpop.f32.mrf.mxu1  ;;  %v9184_v4 = vld [vmem:[#allocation6 + $0xc44] sm:$0xf]  ;;  %v7676_v5 = vld [vmem:[#allocation6 + $0xc50] sm:$0xf0]  ;;  %v8095_v58 = vor.u32 %v9288_v61, %v8092_v62  ;;  %v8823_v61 = vld [vmem:[#allocation6 + $0xf4] sm:$0xf0] }
 0x1fb   :  { %v3961_v39 = vadd.f32 %v3960_v27, %v3947_v14  ;;  %v7679_v21 = vor.u32 %v9184_v4, %v7676_v5  ;;  %v9212_v14 = vld [vmem:[#allocation6 + $0xd24] sm:$0xf] }
 0x1fc   :  { %4209 = vmatpush.bf16.msra.mxu2 %v7407_v35  ;;  %4223 = vmatpush.bf16.msra.mxu3 %v7535_v38  ;;  %v9292_v35 = vld [vmem:[#allocation6 + $0xfa4] sm:$0xf]  ;;  %v8108_v38 = vld [vmem:[#allocation6 + $0xfb0] sm:$0xf0]  ;;  %v7791_v42 = vor.u32 %v9212_v14, %v7788_v15 }
 0x1fd   :  { %4183 = vmatmul.bf16.vlgmr.msra.gmra.mxu0 %v9943_v36  ;;  %4197 = vmatmul.bf16.vlgmr.msra.gmra.mxu1 %v9945_v37  ;;  %v8111_v52 = vor.u32 %v9292_v35, %v8108_v38  ;;  %v9248_v35 = vld [vmem:[#allocation6 + $0xe44] sm:$0xf]  ;;  %v7932_v38 = vld [vmem:[#allocation6 + $0xe50] sm:$0xf0] }
 0x1fe   :  { %4231 = vmatpush.bf16.msrb.mxu0 %v7759_v31  ;;  %4245 = vmatpush.bf16.msrb.mxu1 %v7887_v32  ;;  %v9224_v31 = vld [vmem:[#allocation6 + $0xd84] sm:$0xf]  ;;  %v7836_v32 = vld [vmem:[#allocation6 + $0xd90] sm:$0xf0] }
 0x1ff   :  { %v7839_v41 = vor.u32 %v9224_v31, %v7836_v32  ;;  %v7660_v31 = vld [vmem:[#allocation6 + $0xc30] sm:$0xf0]  ;;  %v9280_v27 = vld [vmem:[#allocation6 + $0xf44] sm:$0xf] }
 0x200   :  { %4210 = vmatpush.bf16.msra.mxu2 %v7391_v59  ;;  %4224 = vmatpush.bf16.msra.mxu3 %v7519_v60  ;;  %v3975_v59 = vadd.f32 %v3974_v50, %v3961_v39  ;;  %v7964_v60 = vld [vmem:[#allocation6 + $0xe90] sm:$0xf0]  ;;  %v9176_v49 = vld [vmem:[#allocation6 + $0xc04] sm:$0xf] }
 0x201   :  { %v8060_v39 = vld [vmem:[#allocation6 + $0xf50] sm:$0xf0]  ;;  %v9244_v4 = vld [vmem:[#allocation6 + $0xe24] sm:$0xf] }
 0x202   :  { %4232 = vmatpush.bf16.msrb.mxu0 %v7743_v25  ;;  %4246 = vmatpush.bf16.msrb.mxu1 %v7871_v57  ;;  %v7820_v25 = vld [vmem:[#allocation6 + $0xd70] sm:$0xf0]  ;;  %v9256_v57 = vld [vmem:[#allocation6 + $0xe84] sm:$0xf] }
 0x203   :  { %4211 = vmatmul.bf16.vlgmr.msra.gmra.mxu2 %v9949_v13  ;;  %4225 = vmatmul.bf16.vlgmr.msra.gmra.mxu3 %v9951_v16  ;;  %v7823_v2 = vor.u32 %v9220_v55, %v7820_v25  ;;  %v7967_v6 = vor.u32 %v9256_v57, %v7964_v60  ;;  %v7644_v50 = vld [vmem:[#allocation6 + $0xc10] sm:$0xf0]  ;;  %v7935_v55 = vor.u32 %v9248_v35, %v7932_v38  ;;  %v6226_v60 = vld [vmem:[#allocation6 + $0xe8] sm:$0xf]  ;;  %v9272_v14 = vld [vmem:[#allocation6 + $0xf04] sm:$0xf]  ;;  %v10018_v38 = vpop.f32.mrf.mxu0 }
 0x204   :  { %4259 = vmatpush.bf16.msrb.mxu2 %v8015_v63  ;;  %4273 = vmatpush.bf16.msrb.mxu3 %v8143_v0  ;;  %v10012_v63 = vpop.f32.mrf.mxu2  ;;  %v10014_v0 = vpop.f32.mrf.mxu3  ;;  %v8063_v25 = vor.u32 %v9280_v27, %v8060_v39  ;;  %v7772_v57 = vld [vmem:[#allocation6 + $0xd10] sm:$0xf0]  ;;  %v6482_v35 = vld [vmem:[#allocation6 + $0x2e8] sm:$0xf]  ;;  %10305 = vst [vmem:[#allocation22_spill] sm:$0xff] %v10018_v38 }
 0x205   :  { %v8028_v15 = vld [vmem:[#allocation6 + $0xf10] sm:$0xf0]  ;;  %v8887_v27 = vld [vmem:[#allocation6 + $0x2f4] sm:$0xf0]  ;;  %v6610_v39 = vld [vmem:[#allocation6 + $0x3e8] sm:$0xf] }
 0x206   :  { %4233 = vmatpush.bf16.msrb.mxu0 %v7727_v9  ;;  %4247 = vmatpush.bf16.msrb.mxu1 %v7855_v11  ;;  %v7948_v9 = vld [vmem:[#allocation6 + $0xe70] sm:$0xf0]  ;;  %v9284_v11 = vld [vmem:[#allocation6 + $0xf64] sm:$0xf]  ;;  %v8885_v38 = vld [vmem:[#allocation6 + $0x2ec] sm:$0xf] }
 0x207   :  { %v7951_v32 = vor.u32 %v9252_v8, %v7948_v9  ;;  %v8079_v33 = vor.u32 %v9284_v11, %v8076_v12  ;;  %v6210_v11 = vld [vmem:[#allocation6 + $0xc8] sm:$0xf]  ;;  %v8819_v12 = vld [vmem:[#allocation6 + $0xd4] sm:$0xf0] }
 0x208   :  { %4260 = vmatpush.bf16.msrb.mxu2 %v7999_v28  ;;  %4274 = vmatpush.bf16.msrb.mxu3 %v8127_v29  ;;  %v7807_v28 = vor.u32 %v9216_v45, %v7804_v10  ;;  %v9180_v29 = vld [vmem:[#allocation6 + $0xc24] sm:$0xf]  ;;  %v8044_v45 = vld [vmem:[#allocation6 + $0xf30] sm:$0xf0]  ;;  %v7647_v10 = vor.u32 %v9176_v49, %v7644_v50  ;;  %v10020_v49 = vpop.f32.mrf.mxu1 }
 0x209   :  { %10306 = vst [vmem:[#allocation23_spill] sm:$0xff] %v10020_v49  ;;  %v8034_v49 = vld [vmem:[#allocation6 + $0xf08] sm:$0xf] }
 0x20a   :  { %4234 = vmatpush.bf16.msrb.mxu0 %v7711_v40  ;;  %4248 = vmatpush.bf16.msrb.mxu1 %v7839_v41  ;;  %v7663_v41 = vor.u32 %v9180_v29, %v7660_v31  ;;  %v8851_v31 = vld [vmem:[#allocation6 + $0x1d4] sm:$0xf0] }
 0x20c   :  { %4261 = vmatpush.bf16.msrb.mxu2 %v7983_v51  ;;  %4275 = vmatpush.bf16.msrb.mxu3 %v8111_v52  ;;  %v3988_v40 = vpop.f32.mrf.mxu2  ;;  %v9208_v51 = vld [vmem:[#allocation6 + $0xd04] sm:$0xf]  ;;  %v4002_v62 = vpop.f32.mrf.mxu3 }
 0x20d   :  { %v3989_v52 = vadd.f32 %v3988_v40, %v3975_v59  ;;  %v7775_v8 = vor.u32 %v9208_v51, %v7772_v57  ;;  %v6227_v59 = vor.u32 %v8823_v61, %v6226_v60  ;;  %v8919_v40 = vld [vmem:[#allocation6 + $0x3f4] sm:$0xf0]  ;;  %v8031_v51 = vor.u32 %v9272_v14, %v8028_v15  ;;  %v6322_v60 = vld [vmem:[#allocation6 + $0x1a8] sm:$0xf] }
 0x20e   :  { %4235 = vmatpush.bf16.msrb.mxu0 %v7695_v1  ;;  %4249 = vmatpush.bf16.msrb.mxu1 %v7823_v2  ;;  %v6354_v1 = vld [vmem:[#allocation6 + $0x1e8] sm:$0xf]  ;;  %v8855_v2 = vld [vmem:[#allocation6 + $0x1f4] sm:$0xf0]  ;;  %v6611_v57 = vor.u32 %v8919_v40, %v6610_v39 }
 0x20f   :  { %v10016_v5 = vadd.f32 %v4002_v62, %v3989_v52  ;;  %v6355_v9 = vor.u32 %v8855_v2, %v6354_v1  ;;  %v6194_v52 = vld [vmem:[#allocation6 + $0xa8] sm:$0xf]  ;;  %v8847_v61 = vld [vmem:[#allocation6 + $0x1b4] sm:$0xf0] }
 0x210   :  { %4262 = vmatpush.bf16.msrb.mxu2 %v7967_v6  ;;  %4276 = vmatpush.bf16.msrb.mxu3 %v8095_v58  ;;  %v7916_v6 = vld [vmem:[#allocation6 + $0xe30] sm:$0xf0]  ;;  %v9276_v58 = vld [vmem:[#allocation6 + $0xf24] sm:$0xf]  ;;  %v6466_v62 = vld [vmem:[#allocation6 + $0x2c8] sm:$0xf] }
 0x211   :  { %v8047_v29 = vor.u32 %v9276_v58, %v8044_v45  ;;  %v8883_v1 = vld [vmem:[#allocation6 + $0x2d4] sm:$0xf0]  ;;  %v6594_v2 = vld [vmem:[#allocation6 + $0x3c8] sm:$0xf]  ;;  %v6323_v58 = vor.u32 %v8847_v61, %v6322_v60 }
 0x212   :  { %4236 = vmatpush.bf16.msrb.mxu0 %v7679_v21  ;;  %4250 = vmatpush.bf16.msrb.mxu1 %v7807_v28  ;;  %v6338_v21 = vld [vmem:[#allocation6 + $0x1c8] sm:$0xf]  ;;  %v7919_v28 = vor.u32 %v9244_v4, %v7916_v6  ;;  %v8915_v4 = vld [vmem:[#allocation6 + $0x3d4] sm:$0xf0] }
 0x213   :  { %v6178_v45 = vld [vmem:[#allocation6 + $0x88] sm:$0xf] }
 0x214   :  { %4263 = vmatpush.bf16.msrb.mxu2 %v7951_v32  ;;  %4277 = vmatpush.bf16.msrb.mxu3 %v8079_v33  ;;  %v9240_v32 = vld [vmem:[#allocation6 + $0xe04] sm:$0xf]  ;;  %v7900_v33 = vld [vmem:[#allocation6 + $0xe10] sm:$0xf0] }
 0x215   :  { %v7903_v50 = vor.u32 %v9240_v32, %v7900_v33 }
 0x216   :  { %4237 = vmatpush.bf16.msrb.mxu0 %v7663_v41  ;;  %4251 = vmatpush.bf16.msrb.mxu1 %v7791_v42  ;;  %v6211_v41 = vor.u32 %v8819_v12, %v6210_v11  ;;  %v6339_v42 = vor.u32 %v8851_v31, %v6338_v21  ;;  %v8843_v11 = vld [vmem:[#allocation6 + $0x194] sm:$0xf0]  ;;  %v6450_v12 = vld [vmem:[#allocation6 + $0x2a8] sm:$0xf] }
 0x217   :  { %v8911_v31 = vld [vmem:[#allocation6 + $0x3b4] sm:$0xf0] }
 0x218   :  { %4264 = vmatpush.bf16.msrb.mxu2 %v7935_v55  ;;  %4278 = vmatpush.bf16.msrb.mxu3 %v8063_v25  ;;  %v8815_v55 = vld [vmem:[#allocation6 + $0xb4] sm:$0xf0]  ;;  %v6483_v25 = vor.u32 %v8887_v27, %v6482_v35  ;;  %v6162_v35 = vld [vmem:[#allocation6 + $0x68] sm:$0xf] }
 0x219   :  { %v6195_v6 = vor.u32 %v8815_v55, %v6194_v52  ;;  %v8807_v27 = vld [vmem:[#allocation6 + $0x74] sm:$0xf0]  ;;  %v10027_v52 = vpop.f32.mrf.mxu2 }
 0x21a   :  { %4238 = vmatpush.bf16.msrb.mxu0 %v7647_v10  ;;  %4252 = vmatpush.bf16.msrb.mxu1 %v7775_v8  ;;  %v8811_v10 = vld [vmem:[#allocation6 + $0x94] sm:$0xf0]  ;;  %v6467_v8 = vor.u32 %v8883_v1, %v6466_v62  ;;  %v4016_v21 = vpop.f32.mrf.mxu0  ;;  %v4030_v33 = vpop.f32.mrf.mxu1  ;;  %10307 = vst [vmem:[#allocation24_spill] sm:$0xff] %v10027_v52  ;;  %v6163_v60 = vor.u32 %v8807_v27, %v6162_v35  ;;  %v6146_v62 = vld [vmem:[#allocation6 + $0x48] sm:$0xf] }
 0x21b   :  { %v4017_v32 = vadd.f32 %v4016_v21, %v10016_v5  ;;  %v6179_v14 = vor.u32 %v8811_v10, %v6178_v45  ;;  %v8875_v55 = vld [vmem:[#allocation6 + $0x294] sm:$0xf0]  ;;  %v6418_v45 = vld [vmem:[#allocation6 + $0x268] sm:$0xf] }
 0x21c   :  { %4265 = vmatpush.bf16.msrb.mxu2 %v7919_v28  ;;  %4279 = vmatpush.bf16.msrb.mxu3 %v8047_v29  ;;  %v8879_v28 = vld [vmem:[#allocation6 + $0x2b4] sm:$0xf0]  ;;  %v6578_v29 = vld [vmem:[#allocation6 + $0x3a8] sm:$0xf] }
 0x21d   :  { %4239 = vmatmul.bf16.vlgmr.msrb.gmra.mxu0 %v9971_v17  ;;  %4253 = vmatmul.bf16.vlgmr.msrb.gmra.mxu1 %v9973_v18  ;;  %v4031_v39 = vadd.f32 %v4030_v33, %v4017_v32  ;;  %v6451_v40 = vor.u32 %v8879_v28, %v6450_v12  ;;  %v8907_v5 = vld [vmem:[#allocation6 + $0x394] sm:$0xf0]  ;;  %v6130_v12 = vld [vmem:[#allocation6 + $0x28] sm:$0xf] }
 0x21e   :  { %4287 = vmatpush.bf16.msra.mxu0 %v6227_v59  ;;  %4301 = vmatpush.bf16.msra.mxu1 %v6355_v9  ;;  %v6595_v59 = vor.u32 %v8915_v4, %v6594_v2  ;;  %v6306_v9 = vld [vmem:[#allocation6 + $0x188] sm:$0xf]  ;;  %v8803_v1 = vld [vmem:[#allocation6 + $0x54] sm:$0xf0] }
 0x21f   :  { %v6307_v15 = vor.u32 %v8843_v11, %v6306_v9  ;;  %v8871_v10 = vld [vmem:[#allocation6 + $0x274] sm:$0xf0]  ;;  %v6147_v9 = vor.u32 %v8803_v1, %v6146_v62  ;;  %v6402_v33 = vld [vmem:[#allocation6 + $0x248] sm:$0xf] }
 0x220   :  { %4266 = vmatpush.bf16.msrb.mxu2 %v7903_v50  ;;  %4280 = vmatpush.bf16.msrb.mxu3 %v8031_v51  ;;  %v8839_v50 = vld [vmem:[#allocation6 + $0x174] sm:$0xf0]  ;;  %v6434_v51 = vld [vmem:[#allocation6 + $0x288] sm:$0xf]  ;;  %v6419_v28 = vor.u32 %v8871_v10, %v6418_v45 }
 0x221   :  { %v6435_v2 = vor.u32 %v8875_v55, %v6434_v51  ;;  %v8799_v21 = vld [vmem:[#allocation6 + $0x34] sm:$0xf0]  ;;  %v6530_v35 = vld [vmem:[#allocation6 + $0x348] sm:$0xf] }
 0x222   :  { %4288 = vmatpush.bf16.msra.mxu0 %v6211_v41  ;;  %4302 = vmatpush.bf16.msra.mxu1 %v6339_v42  ;;  %v6579_v41 = vor.u32 %v8911_v31, %v6578_v29  ;;  %v6290_v42 = vld [vmem:[#allocation6 + $0x168] sm:$0xf]  ;;  %v8831_v32 = vld [vmem:[#allocation6 + $0x134] sm:$0xf0] }
 0x223   :  { %4267 = vmatmul.bf16.vlgmr.msrb.gmra.mxu2 %v9977_v7  ;;  %4281 = vmatmul.bf16.vlgmr.msrb.gmra.mxu3 %v9979_v43  ;;  %v6291_v61 = vor.u32 %v8839_v50, %v6290_v42  ;;  %v6258_v31 = vld [vmem:[#allocation6 + $0x128] sm:$0xf]  ;;  %v8899_v27 = vld [vmem:[#allocation6 + $0x354] sm:$0xf0]  ;;  %v6131_v42 = vor.u32 %v8799_v21, %v6130_v12 }
 0x224   :  { %4315 = vmatpush.bf16.msra.mxu2 %v6483_v25  ;;  %4329 = vmatpush.bf16.msra.mxu3 %v6611_v57  ;;  %v6562_v25 = vld [vmem:[#allocation6 + $0x388] sm:$0xf]  ;;  %v10029_v57 = vpop.f32.mrf.mxu3  ;;  %v6259_v50 = vor.u32 %v8831_v32, %v6258_v31  ;;  %v8795_v55 = vld [vmem:[#allocation6 + $0x14] sm:$0xf0] }
 0x225   :  { %10308 = vst [vmem:[#allocation25_spill] sm:$0xff] %v10029_v57  ;;  %v6563_v4 = vor.u32 %v8907_v5, %v6562_v25  ;;  %v6114_v51 = vld [vmem:[#allocation6 + $0x8] sm:$0xf]  ;;  %v8827_v62 = vld [vmem:[#allocation6 + $0x114] sm:$0xf0] }
 0x226   :  { %4289 = vmatpush.bf16.msra.mxu0 %v6195_v6  ;;  %4303 = vmatpush.bf16.msra.mxu1 %v6323_v58  ;;  %v6274_v6 = vld [vmem:[#allocation6 + $0x148] sm:$0xf]  ;;  %v8835_v58 = vld [vmem:[#allocation6 + $0x154] sm:$0xf0] }
 0x227   :  { %v6275_v11 = vor.u32 %v8835_v58, %v6274_v6  ;;  %v6242_v25 = vld [vmem:[#allocation6 + $0x108] sm:$0xf]  ;;  %v8983_v6 = vld [vmem:[#allocation6 + $0x5f4] sm:$0xf0] }
 0x228   :  { %4316 = vmatpush.bf16.msra.mxu2 %v6467_v8  ;;  %4330 = vmatpush.bf16.msra.mxu3 %v6595_v59  ;;  %v6546_v8 = vld [vmem:[#allocation6 + $0x368] sm:$0xf]  ;;  %v8903_v59 = vld [vmem:[#allocation6 + $0x374] sm:$0xf0] }
 0x229   :  { %v6547_v29 = vor.u32 %v8903_v59, %v6546_v8  ;;  %v6738_v1 = vld [vmem:[#allocation6 + $0x4e8] sm:$0xf]  ;;  %v8863_v58 = vld [vmem:[#allocation6 + $0x234] sm:$0xf0]  ;;  %v6115_v8 = vor.u32 %v8795_v55, %v6114_v51  ;;  %v6243_v59 = vor.u32 %v8827_v62, %v6242_v25  ;;  %v10035_v25 = vpop.f32.mrf.mxu1 }
 0x22a   :  { %4290 = vmatpush.bf16.msra.mxu0 %v6179_v14  ;;  %4304 = vmatpush.bf16.msra.mxu1 %v6307_v15  ;;  %v4044_v14 = vpop.f32.mrf.mxu2  ;;  %v8867_v15 = vld [vmem:[#allocation6 + $0x254] sm:$0xf0]  ;;  %v6514_v45 = vld [vmem:[#allocation6 + $0x328] sm:$0xf]  ;;  %10311 = vst [vmem:[#allocation28_spill] sm:$0xff] %v10035_v25 }
 0x22b   :  { %v8895_v10 = vld [vmem:[#allocation6 + $0x334] sm:$0xf0]  ;;  %v6722_v12 = vld [vmem:[#allocation6 + $0x4c8] sm:$0xf] }
 0x22c   :  { %4317 = vmatpush.bf16.msra.mxu2 %v6451_v40  ;;  %4331 = vmatpush.bf16.msra.mxu3 %v6579_v41  ;;  %v4045_v40 = vadd.f32 %v4044_v14, %v4031_v39  ;;  %v4058_v41 = vpop.f32.mrf.mxu3  ;;  %v6386_v39 = vld [vmem:[#allocation6 + $0x228] sm:$0xf]  ;;  %v8947_v21 = vld [vmem:[#allocation6 + $0x4d4] sm:$0xf0]  ;;  %v6515_v31 = vor.u32 %v8895_v10, %v6514_v45 }
 0x22d   :  { %v8979_v32 = vld [vmem:[#allocation6 + $0x5d4] sm:$0xf0]  ;;  %v6723_v51 = vor.u32 %v8947_v21, %v6722_v12  ;;  %v6706_v62 = vld [vmem:[#allocation6 + $0x4a8] sm:$0xf] }
 0x22e   :  { %4291 = vmatpush.bf16.msra.mxu0 %v6163_v60  ;;  %4305 = vmatpush.bf16.msra.mxu1 %v6291_v61  ;;  %v10031_v5 = vadd.f32 %v4058_v41, %v4045_v40  ;;  %v6403_v60 = vor.u32 %v8867_v15, %v6402_v33  ;;  %v6531_v61 = vor.u32 %v8899_v27, %v6530_v35  ;;  %v6370_v33 = vld [vmem:[#allocation6 + $0x208] sm:$0xf]  ;;  %v8859_v14 = vld [vmem:[#allocation6 + $0x214] sm:$0xf0]  ;;  %v10033_v40 = vpop.f32.mrf.mxu0 }
 0x22f   :  { %v6498_v15 = vld [vmem:[#allocation6 + $0x308] sm:$0xf]  ;;  %v8891_v35 = vld [vmem:[#allocation6 + $0x314] sm:$0xf0]  ;;  %10310 = vst [vmem:[#allocation27_spill] sm:$0xff] %v10033_v40 }
 0x230   :  { %4318 = vmatpush.bf16.msra.mxu2 %v6435_v2  ;;  %4332 = vmatpush.bf16.msra.mxu3 %v6563_v4  ;;  %10309 = vst [vmem:[#allocation26_spill] sm:$0xff] %v10031_v5  ;;  %v8951_v2 = vld [vmem:[#allocation6 + $0x4f4] sm:$0xf0]  ;;  %v6866_v4 = vld [vmem:[#allocation6 + $0x5e8] sm:$0xf] }
 0x231   :  { %v6994_v27 = vld [vmem:[#allocation6 + $0x6e8] sm:$0xf]  ;;  %v9015_v41 = vld [vmem:[#allocation6 + $0x6f4] sm:$0xf0] }
 0x232   :  { %4292 = vmatpush.bf16.msra.mxu0 %v6147_v9  ;;  %4306 = vmatpush.bf16.msra.mxu1 %v6275_v11  ;;  %v6739_v9 = vor.u32 %v8951_v2, %v6738_v1  ;;  %v6867_v11 = vor.u32 %v8983_v6, %v6866_v4  ;;  %v8943_v1 = vld [vmem:[#allocation6 + $0x4b4] sm:$0xf0]  ;;  %v6995_v2 = vor.u32 %v9015_v41, %v6994_v27  ;;  %v6834_v6 = vld [vmem:[#allocation6 + $0x5a8] sm:$0xf] }
 0x233   :  { %v9011_v45 = vld [vmem:[#allocation6 + $0x6d4] sm:$0xf0]  ;;  %v7106_v10 = vld [vmem:[#allocation6 + $0x7c8] sm:$0xf] }
 0x234   :  { %4319 = vmatpush.bf16.msra.mxu2 %v6419_v28  ;;  %4333 = vmatpush.bf16.msra.mxu3 %v6547_v29  ;;  %v6850_v28 = vld [vmem:[#allocation6 + $0x5c8] sm:$0xf]  ;;  %v6387_v29 = vor.u32 %v8863_v58, %v6386_v39  ;;  %v8975_v39 = vld [vmem:[#allocation6 + $0x5b4] sm:$0xf0] }
 0x235   :  { %v6851_v55 = vor.u32 %v8979_v32, %v6850_v28  ;;  %v6978_v58 = vld [vmem:[#allocation6 + $0x6c8] sm:$0xf]  ;;  %v8939_v21 = vld [vmem:[#allocation6 + $0x494] sm:$0xf0] }
 0x236   :  { %4293 = vmatpush.bf16.msra.mxu0 %v6131_v42  ;;  %4307 = vmatpush.bf16.msra.mxu1 %v6259_v50  ;;  %v7122_v42 = vld [vmem:[#allocation6 + $0x7e8] sm:$0xf]  ;;  %v9047_v50 = vld [vmem:[#allocation6 + $0x7f4] sm:$0xf0]  ;;  %v6979_v28 = vor.u32 %v9011_v45, %v6978_v58 }
 0x237   :  { %v7123_v4 = vor.u32 %v9047_v50, %v7122_v42  ;;  %v6690_v12 = vld [vmem:[#allocation6 + $0x488] sm:$0xf]  ;;  %v8971_v32 = vld [vmem:[#allocation6 + $0x594] sm:$0xf0] }
 0x238   :  { %4320 = vmatpush.bf16.msra.mxu2 %v6403_v60  ;;  %4334 = vmatpush.bf16.msra.mxu3 %v6531_v61  ;;  %v6371_v60 = vor.u32 %v8859_v14, %v6370_v33  ;;  %v6499_v61 = vor.u32 %v8891_v35, %v6498_v15  ;;  %v6962_v33 = vld [vmem:[#allocation6 + $0x6a8] sm:$0xf]  ;;  %v9007_v15 = vld [vmem:[#allocation6 + $0x6b4] sm:$0xf0]  ;;  %v6691_v50 = vor.u32 %v8939_v21, %v6690_v12 }
 0x239   :  { %v7090_v35 = vld [vmem:[#allocation6 + $0x7a8] sm:$0xf]  ;;  %v9039_v27 = vld [vmem:[#allocation6 + $0x7b4] sm:$0xf0] }
 0x23a   :  { %4294 = vmatpush.bf16.msra.mxu0 %v6115_v8  ;;  %4308 = vmatpush.bf16.msra.mxu1 %v6243_v59  ;;  %v9043_v8 = vld [vmem:[#allocation6 + $0x7d4] sm:$0xf0]  ;;  %v10299_v59 = vperm.slane %v9987_v47, 1  ;;  %v4072_v14 = vpop.f32.mrf.mxu0  ;;  %v4086_v42 = vpop.f32.mrf.mxu1  ;;  %v7074_v45 = vld [vmem:[#allocation6 + $0x788] sm:$0xf] }
 0x23b   :  { %v9003_v58 = vld [vmem:[#allocation6 + $0x694] sm:$0xf0]  ;;  %v6658_v12 = vld [vmem:[#allocation6 + $0x448] sm:$0xf] }
 0x23c   :  { %4321 = vmatpush.bf16.msra.mxu2 %v6387_v29  ;;  %4335 = vmatpush.bf16.msra.mxu3 %v6515_v31  ;;  %v7107_v29 = vor.u32 %v9043_v8, %v7106_v10  ;;  %v6818_v31 = vld [vmem:[#allocation6 + $0x588] sm:$0xf]  ;;  %v4073_v41 = vadd.f32 %v4072_v14, %v10299_v59  ;;  %v9035_v10 = vld [vmem:[#allocation6 + $0x794] sm:$0xf0]  ;;  %v10046_v8 = vpop.f32.mrf.mxu3 }
 0x23d   :  { %4295 = vmatmul.bf16.vlgmr.msra.gmra.mxu0 %v9901_v53  ;;  %4309 = vmatmul.bf16.vlgmr.msra.gmra.mxu1 %v9903_v54  ;;  %10313 = vst [vmem:[#allocation30_spill] sm:$0xff] %v10046_v8  ;;  %v8931_v21 = vld [vmem:[#allocation6 + $0x454] sm:$0xf0]  ;;  %v7506_v8 = vld [vmem:[#allocation6 + $0xae8] sm:$0xf] }
 0x23e   :  { %4343 = vmatpush.bf16.msrb.mxu0 %v6739_v9  ;;  %4357 = vmatpush.bf16.msrb.mxu1 %v6867_v11  ;;  %v6707_v9 = vor.u32 %v8943_v1, %v6706_v62  ;;  %v6835_v11 = vor.u32 %v8975_v39, %v6834_v6  ;;  %v6963_v62 = vor.u32 %v9007_v15, %v6962_v33  ;;  %v6946_v6 = vld [vmem:[#allocation6 + $0x688] sm:$0xf]  ;;  %v10044_v39 = vpop.f32.mrf.mxu2  ;;  %v8999_v14 = vld [vmem:[#allocation6 + $0x674] sm:$0xf0] }
 0x23f   :  { %v7091_v1 = vor.u32 %v9039_v27, %v7090_v35  ;;  %10312 = vst [vmem:[#allocation29_spill] sm:$0xff] %v10044_v39  ;;  %v6930_v33 = vld [vmem:[#allocation6 + $0x668] sm:$0xf]  ;;  %v9031_v35 = vld [vmem:[#allocation6 + $0x774] sm:$0xf0]  ;;  %v6659_v27 = vor.u32 %v8931_v21, %v6658_v12 }
 0x240   :  { %4322 = vmatpush.bf16.msra.mxu2 %v6371_v60  ;;  %4336 = vmatpush.bf16.msra.mxu3 %v6499_v61  ;;  %v8935_v60 = vld [vmem:[#allocation6 + $0x474] sm:$0xf0]  ;;  %v4087_v61 = vadd.f32 %v4086_v42, %v4073_v41  ;;  %v7058_v15 = vld [vmem:[#allocation6 + $0x768] sm:$0xf] }
 0x241   :  { %v6642_v42 = vld [vmem:[#allocation6 + $0x428] sm:$0xf]  ;;  %v8923_v21 = vld [vmem:[#allocation6 + $0x414] sm:$0xf0] }
 0x242   :  { %4344 = vmatpush.bf16.msrb.mxu0 %v6723_v51  ;;  %4358 = vmatpush.bf16.msrb.mxu1 %v6851_v55  ;;  %v6819_v51 = vor.u32 %v8971_v32, %v6818_v31  ;;  %v6674_v55 = vld [vmem:[#allocation6 + $0x468] sm:$0xf]  ;;  %v8963_v32 = vld [vmem:[#allocation6 + $0x554] sm:$0xf0]  ;;  %v10050_v39 = vpop.f32.mrf.mxu0 }
 0x243   :  { %4323 = vmatmul.bf16.vlgmr.msra.gmra.mxu2 %v9909_v22  ;;  %4337 = vmatmul.bf16.vlgmr.msra.gmra.mxu3 %v9911_v23  ;;  %v6786_v31 = vld [vmem:[#allocation6 + $0x548] sm:$0xf]  ;;  %v9111_v59 = vld [vmem:[#allocation6 + $0x9f4] sm:$0xf0] }
 0x244   :  { %4371 = vmatpush.bf16.msrb.mxu2 %v6995_v2  ;;  %4385 = vmatpush.bf16.msrb.mxu3 %v7123_v4  ;;  %v6802_v2 = vld [vmem:[#allocation6 + $0x568] sm:$0xf]  ;;  %v8967_v4 = vld [vmem:[#allocation6 + $0x574] sm:$0xf0]  ;;  %v6787_v41 = vor.u32 %v8963_v32, %v6786_v31 }
 0x245   :  { %v6626_v12 = vld [vmem:[#allocation6 + $0x408] sm:$0xf]  ;;  %v9019_v5 = vld [vmem:[#allocation6 + $0x714] sm:$0xf0] }
 0x246   :  { %4345 = vmatpush.bf16.msrb.mxu0 %v6707_v9  ;;  %4359 = vmatpush.bf16.msrb.mxu1 %v6835_v11  ;;  %v6675_v9 = vor.u32 %v8935_v60, %v6674_v55  ;;  %v6803_v11 = vor.u32 %v8967_v4, %v6802_v2  ;;  %v7059_v55 = vor.u32 %v9031_v35, %v7058_v15  ;;  %v6770_v60 = vld [vmem:[#allocation6 + $0x528] sm:$0xf]  ;;  %v4100_v2 = vpop.f32.mrf.mxu2  ;;  %v8995_v4 = vld [vmem:[#allocation6 + $0x654] sm:$0xf0] }
 0x247   :  { %v6754_v31 = vld [vmem:[#allocation6 + $0x508] sm:$0xf]  ;;  %v9079_v15 = vld [vmem:[#allocation6 + $0x8f4] sm:$0xf0] }
 0x248   :  { %4372 = vmatpush.bf16.msrb.mxu2 %v6979_v28  ;;  %4386 = vmatpush.bf16.msrb.mxu3 %v7107_v29  ;;  %v6947_v28 = vor.u32 %v9003_v58, %v6946_v6  ;;  %v7075_v29 = vor.u32 %v9035_v10, %v7074_v45  ;;  %v7042_v6 = vld [vmem:[#allocation6 + $0x748] sm:$0xf]  ;;  %v9027_v58 = vld [vmem:[#allocation6 + $0x754] sm:$0xf0]  ;;  %v4101_v45 = vadd.f32 %v4100_v2, %v4087_v61  ;;  %v4114_v10 = vpop.f32.mrf.mxu3 }
 0x249   :  { %v7043_v32 = vor.u32 %v9027_v58, %v7042_v6  ;;  %v7378_v35 = vld [vmem:[#allocation6 + $0x9e8] sm:$0xf]  ;;  %v9023_v2 = vld [vmem:[#allocation6 + $0x734] sm:$0xf0] }
 0x24a   :  { %4346 = vmatpush.bf16.msrb.mxu0 %v6691_v50  ;;  %4360 = vmatpush.bf16.msrb.mxu1 %v6819_v51  ;;  %v8927_v50 = vld [vmem:[#allocation6 + $0x434] sm:$0xf0]  ;;  %v6931_v51 = vor.u32 %v8999_v14, %v6930_v33  ;;  %v7250_v14 = vld [vmem:[#allocation6 + $0x8e8] sm:$0xf] }
 0x24b   :  { %v8955_v33 = vld [vmem:[#allocation6 + $0x514] sm:$0xf0]  ;;  %v6898_v61 = vld [vmem:[#allocation6 + $0x628] sm:$0xf] }
 0x24c   :  { %4373 = vmatpush.bf16.msrb.mxu2 %v6963_v62  ;;  %4387 = vmatpush.bf16.msrb.mxu3 %v7091_v1  ;;  %v8959_v62 = vld [vmem:[#allocation6 + $0x534] sm:$0xf0]  ;;  %v6914_v1 = vld [vmem:[#allocation6 + $0x648] sm:$0xf] }
 0x24d   :  { %v9107_v58 = vld [vmem:[#allocation6 + $0x9d4] sm:$0xf0]  ;;  %v7522_v25 = vld [vmem:[#allocation6 + $0xb08] sm:$0xf] }
 0x24e   :  { %4347 = vmatpush.bf16.msrb.mxu0 %v6675_v9  ;;  %4361 = vmatpush.bf16.msrb.mxu1 %v6803_v11  ;;  %v6643_v9 = vor.u32 %v8927_v50, %v6642_v42  ;;  %v6771_v11 = vor.u32 %v8959_v62, %v6770_v60  ;;  %v6627_v42 = vor.u32 %v8923_v21, %v6626_v12  ;;  %v7234_v60 = vld [vmem:[#allocation6 + $0x8c8] sm:$0xf]  ;;  %v9075_v62 = vld [vmem:[#allocation6 + $0x8d4] sm:$0xf0] }
 0x24f   :  { %v6755_v50 = vor.u32 %v8955_v33, %v6754_v31  ;;  %v9175_v12 = vld [vmem:[#allocation6 + $0xbf4] sm:$0xf0]  ;;  %v10052_v31 = vpop.f32.mrf.mxu1  ;;  %v7218_v33 = vld [vmem:[#allocation6 + $0x8a8] sm:$0xf] }
 0x250   :  { %4374 = vmatpush.bf16.msrb.mxu2 %v6947_v28  ;;  %4388 = vmatpush.bf16.msrb.mxu3 %v7075_v29  ;;  %v10048_v28 = vadd.f32 %v4114_v10, %v4101_v45  ;;  %v6915_v29 = vor.u32 %v8995_v4, %v6914_v1  ;;  %v7362_v1 = vld [vmem:[#allocation6 + $0x9c8] sm:$0xf]  ;;  %v8987_v10 = vld [vmem:[#allocation6 + $0x614] sm:$0xf0] }
 0x251   :  { %v6882_v45 = vld [vmem:[#allocation6 + $0x608] sm:$0xf]  ;;  %v7363_v21 = vor.u32 %v9107_v58, %v7362_v1  ;;  %v9099_v1 = vld [vmem:[#allocation6 + $0x994] sm:$0xf0] }
 0x252   :  { %4348 = vmatpush.bf16.msrb.mxu0 %v6659_v27  ;;  %4362 = vmatpush.bf16.msrb.mxu1 %v6787_v41  ;;  %v8991_v27 = vld [vmem:[#allocation6 + $0x634] sm:$0xf0]  ;;  %v7026_v41 = vld [vmem:[#allocation6 + $0x728] sm:$0xf] }
 0x253   :  { %v6899_v4 = vor.u32 %v8991_v27, %v6898_v61  ;;  %v7027_v6 = vor.u32 %v9023_v2, %v7026_v41  ;;  %v7346_v61 = vld [vmem:[#allocation6 + $0x9a8] sm:$0xf]  ;;  %v9103_v27 = vld [vmem:[#allocation6 + $0x9b4] sm:$0xf0] }
 0x254   :  { %4375 = vmatpush.bf16.msrb.mxu2 %v6931_v51  ;;  %4389 = vmatpush.bf16.msrb.mxu3 %v7059_v55  ;;  %v7251_v51 = vor.u32 %v9079_v15, %v7250_v14  ;;  %v7379_v55 = vor.u32 %v9111_v59, %v7378_v35  ;;  %v7235_v59 = vor.u32 %v9075_v62, %v7234_v60  ;;  %v9071_v14 = vld [vmem:[#allocation6 + $0x8b4] sm:$0xf0]  ;;  %v7490_v41 = vld [vmem:[#allocation6 + $0xac8] sm:$0xf] }
 0x255   :  { %v9139_v2 = vld [vmem:[#allocation6 + $0xad4] sm:$0xf0]  ;;  %v8018_v57 = vld [vmem:[#allocation6 + $0xee8] sm:$0xf] }
 0x256   :  { %4349 = vmatpush.bf16.msrb.mxu0 %v6643_v9  ;;  %4363 = vmatpush.bf16.msrb.mxu1 %v6771_v11  ;;  %v9143_v9 = vld [vmem:[#allocation6 + $0xaf4] sm:$0xf0]  ;;  %v7634_v11 = vld [vmem:[#allocation6 + $0xbe8] sm:$0xf]  ;;  %v7491_v60 = vor.u32 %v9139_v2, %v7490_v41 }
 0x257   :  { %v7507_v15 = vor.u32 %v9143_v9, %v7506_v8  ;;  %v7635_v35 = vor.u32 %v9175_v12, %v7634_v11  ;;  %v7330_v8 = vld [vmem:[#allocation6 + $0x988] sm:$0xf]  ;;  %v9135_v58 = vld [vmem:[#allocation6 + $0xab4] sm:$0xf0] }
 0x258   :  { %4376 = vmatpush.bf16.msrb.mxu2 %v6915_v29  ;;  %4390 = vmatpush.bf16.msrb.mxu3 %v7043_v32  ;;  %v6883_v29 = vor.u32 %v8987_v10, %v6882_v45  ;;  %v7011_v32 = vor.u32 %v9019_v5, %v7010_v34  ;;  %v7347_v34 = vor.u32 %v9103_v27, %v7346_v61  ;;  %v7202_v5 = vld [vmem:[#allocation6 + $0x888] sm:$0xf]  ;;  %v9167_v10 = vld [vmem:[#allocation6 + $0xbb4] sm:$0xf0]  ;;  %v10059_v27 = vpop.f32.mrf.mxu2 }
 0x259   :  { %v7602_v45 = vld [vmem:[#allocation6 + $0xba8] sm:$0xf]  ;;  %v9131_v41 = vld [vmem:[#allocation6 + $0xa94] sm:$0xf0] }
 0x25a   :  { %4350 = vmatpush.bf16.msrb.mxu0 %v6627_v42  ;;  %4364 = vmatpush.bf16.msrb.mxu1 %v6755_v50  ;;  %v7618_v42 = vld [vmem:[#allocation6 + $0xbc8] sm:$0xf]  ;;  %v9171_v50 = vld [vmem:[#allocation6 + $0xbd4] sm:$0xf0]  ;;  %v4142_v11 = vpop.f32.mrf.mxu1 }
 0x25b   :  { %v7619_v62 = vor.u32 %v9171_v50, %v7618_v42  ;;  %v7458_v61 = vld [vmem:[#allocation6 + $0xa88] sm:$0xf]  ;;  %v10061_v42 = vpop.f32.mrf.mxu3  ;;  %v9147_v40 = vld [vmem:[#allocation6 + $0xb14] sm:$0xf0] }
 0x25c   :  { %4377 = vmatpush.bf16.msrb.mxu2 %v6899_v4  ;;  %4391 = vmatpush.bf16.msrb.mxu3 %v7027_v6  ;;  %v7474_v4 = vld [vmem:[#allocation6 + $0xaa8] sm:$0xf]  ;;  %v4128_v6 = vpop.f32.mrf.mxu0 }
 0x25d   :  { %4351 = vmatmul.bf16.vlgmr.msrb.gmra.mxu0 %v9919_v3  ;;  %4365 = vmatmul.bf16.vlgmr.msrb.gmra.mxu1 %v9921_v26  ;;  %v4129_v9 = vadd.f32 %v4128_v6, %v10048_v28  ;;  %v7586_v2 = vld [vmem:[#allocation6 + $0xb88] sm:$0xf]  ;;  %v9163_v28 = vld [vmem:[#allocation6 + $0xb94] sm:$0xf0] }
 0x25e   :  { %4399 = vmatpush.bf16.msra.mxu0 %v7251_v51  ;;  %4413 = vmatpush.bf16.msra.mxu1 %v7379_v55  ;;  %v7219_v51 = vor.u32 %v9071_v14, %v7218_v33  ;;  %v9067_v55 = vld [vmem:[#allocation6 + $0x894] sm:$0xf0]  ;;  %v7475_v33 = vor.u32 %v9135_v58, %v7474_v4  ;;  %v7603_v14 = vor.u32 %v9167_v10, %v7602_v45  ;;  %v7570_v6 = vld [vmem:[#allocation6 + $0xb68] sm:$0xf] }
 0x25f   :  { %v7203_v12 = vor.u32 %v9067_v55, %v7202_v5  ;;  %v9059_v5 = vld [vmem:[#allocation6 + $0x854] sm:$0xf0]  ;;  %v7459_v55 = vor.u32 %v9131_v41, %v7458_v61 }
 0x260   :  { %4378 = vmatpush.bf16.msrb.mxu2 %v6883_v29  ;;  %4392 = vmatpush.bf16.msrb.mxu3 %v7011_v32  ;;  %v9063_v29 = vld [vmem:[#allocation6 + $0x874] sm:$0xf0]  ;;  %v4143_v32 = vadd.f32 %v4142_v11, %v4129_v9  ;;  %v7154_v9 = vld [vmem:[#allocation6 + $0x828] sm:$0xf] }
 0x261   :  { %v9127_v4 = vld [vmem:[#allocation6 + $0xa74] sm:$0xf0] }
 0x262   :  { %4400 = vmatpush.bf16.msra.mxu0 %v7235_v59  ;;  %4414 = vmatpush.bf16.msra.mxu1 %v7363_v21  ;;  %v7331_v59 = vor.u32 %v9099_v1, %v7330_v8  ;;  %v7186_v21 = vld [vmem:[#allocation6 + $0x868] sm:$0xf]  ;;  %v9091_v8 = vld [vmem:[#allocation6 + $0x954] sm:$0xf0] }
 0x263   :  { %4379 = vmatmul.bf16.vlgmr.msrb.gmra.mxu2 %v9927_v44  ;;  %4393 = vmatmul.bf16.vlgmr.msrb.gmra.mxu3 %v9929_v46  ;;  %v7187_v50 = vor.u32 %v9063_v29, %v7186_v21  ;;  %v7442_v1 = vld [vmem:[#allocation6 + $0xa68] sm:$0xf]  ;;  %v9159_v58 = vld [vmem:[#allocation6 + $0xb74] sm:$0xf0] }
 0x264   :  { %4427 = vmatpush.bf16.msra.mxu2 %v7507_v15  ;;  %4441 = vmatpush.bf16.msra.mxu3 %v7635_v35  ;;  %v7314_v15 = vld [vmem:[#allocation6 + $0x968] sm:$0xf]  ;;  %v9095_v35 = vld [vmem:[#allocation6 + $0x974] sm:$0xf0]  ;;  %v10065_v52 = vpop.f32.mrf.mxu0 }
 0x265   :  { %v9055_v11 = vld [vmem:[#allocation6 + $0x834] sm:$0xf0]  ;;  %v7282_v21 = vld [vmem:[#allocation6 + $0x928] sm:$0xf] }
 0x266   :  { %4401 = vmatpush.bf16.msra.mxu0 %v7219_v51  ;;  %4415 = vmatpush.bf16.msra.mxu1 %v7347_v34  ;;  %v7315_v51 = vor.u32 %v9095_v35, %v7314_v15  ;;  %v7170_v34 = vld [vmem:[#allocation6 + $0x848] sm:$0xf]  ;;  %v9087_v29 = vld [vmem:[#allocation6 + $0x934] sm:$0xf0] }
 0x267   :  { %v7171_v45 = vor.u32 %v9059_v5, %v7170_v34  ;;  %v9123_v15 = vld [vmem:[#allocation6 + $0xa54] sm:$0xf0]  ;;  %v7554_v35 = vld [vmem:[#allocation6 + $0xb48] sm:$0xf] }
 0x268   :  { %4428 = vmatpush.bf16.msra.mxu2 %v7491_v60  ;;  %4442 = vmatpush.bf16.msra.mxu3 %v7619_v62  ;;  %v7587_v60 = vor.u32 %v9163_v28, %v7586_v2  ;;  %v7298_v62 = vld [vmem:[#allocation6 + $0x948] sm:$0xf]  ;;  %v9155_v61 = vld [vmem:[#allocation6 + $0xb54] sm:$0xf0]  ;;  %v4170_v2 = vpop.f32.mrf.mxu3  ;;  %v7155_v28 = vor.u32 %v9055_v11, %v7154_v9 }
 0x269   :  { %v7299_v10 = vor.u32 %v9091_v8, %v7298_v62  ;;  %v9051_v34 = vld [vmem:[#allocation6 + $0x814] sm:$0xf0]  ;;  %v7266_v5 = vld [vmem:[#allocation6 + $0x908] sm:$0xf]  ;;  %v7555_v62 = vor.u32 %v9155_v61, %v7554_v35 }
 0x26a   :  { %4402 = vmatpush.bf16.msra.mxu0 %v7203_v12  ;;  %4416 = vmatpush.bf16.msra.mxu1 %v7331_v59  ;;  %v7443_v12 = vor.u32 %v9127_v4, %v7442_v1  ;;  %v7571_v59 = vor.u32 %v9159_v58, %v7570_v6  ;;  %v9083_v8 = vld [vmem:[#allocation6 + $0x914] sm:$0xf0]  ;;  %v7762_v1 = vld [vmem:[#allocation6 + $0xce8] sm:$0xf] }
 0x26b   :  { %v9207_v4 = vld [vmem:[#allocation6 + $0xcf4] sm:$0xf0]  ;;  %v7890_v6 = vld [vmem:[#allocation6 + $0xde8] sm:$0xf]  ;;  %v7267_v11 = vor.u32 %v9083_v8, %v7266_v5  ;;  %v7523_v8 = vor.u32 %v9147_v40, %v7522_v25 }
 0x26c   :  { %4429 = vmatpush.bf16.msra.mxu2 %v7475_v33  ;;  %4443 = vmatpush.bf16.msra.mxu3 %v7603_v14  ;;  %v7426_v33 = vld [vmem:[#allocation6 + $0xa48] sm:$0xf]  ;;  %v4156_v14 = vpop.f32.mrf.mxu2  ;;  %v9239_v58 = vld [vmem:[#allocation6 + $0xdf4] sm:$0xf0] }
 0x26d   :  { %v4157_v41 = vadd.f32 %v4156_v14, %v4143_v32  ;;  %v7410_v32 = vld [vmem:[#allocation6 + $0xa28] sm:$0xf]  ;;  %v9151_v14 = vld [vmem:[#allocation6 + $0xb34] sm:$0xf0] }
 0x26e   :  { %4403 = vmatpush.bf16.msra.mxu0 %v7187_v50  ;;  %4417 = vmatpush.bf16.msra.mxu1 %v7315_v51  ;;  %v7283_v50 = vor.u32 %v9087_v29, %v7282_v21  ;;  %v7138_v51 = vld [vmem:[#allocation6 + $0x808] sm:$0xf]  ;;  %v9203_v29 = vld [vmem:[#allocation6 + $0xcd4] sm:$0xf0] }
 0x26f   :  { %v7139_v9 = vor.u32 %v9051_v34, %v7138_v51  ;;  %v7746_v21 = vld [vmem:[#allocation6 + $0xcc8] sm:$0xf]  ;;  %v9235_v61 = vld [vmem:[#allocation6 + $0xdd4] sm:$0xf0] }
 0x270   :  { %4430 = vmatpush.bf16.msra.mxu2 %v7459_v55  ;;  %4444 = vmatpush.bf16.msra.mxu3 %v7587_v60  ;;  %v10063_v55 = vadd.f32 %v4170_v2, %v4157_v41  ;;  %v7427_v60 = vor.u32 %v9123_v15, %v7426_v33  ;;  %v7874_v33 = vld [vmem:[#allocation6 + $0xdc8] sm:$0xf]  ;;  %v9115_v2 = vld [vmem:[#allocation6 + $0xa14] sm:$0xf0]  ;;  %v7747_v34 = vor.u32 %v9203_v29, %v7746_v21 }
 0x271   :  { %v7394_v41 = vld [vmem:[#allocation6 + $0xa08] sm:$0xf]  ;;  %v9303_v51 = vld [vmem:[#allocation6 + $0xff4] sm:$0xf0]  ;;  %v7875_v5 = vor.u32 %v9235_v61, %v7874_v33 }
 0x272   :  { %4404 = vmatpush.bf16.msra.mxu0 %v7171_v45  ;;  %4418 = vmatpush.bf16.msra.mxu1 %v7299_v10  ;;  %v9119_v45 = vld [vmem:[#allocation6 + $0xa34] sm:$0xf0]  ;;  %v7538_v10 = vld [vmem:[#allocation6 + $0xb28] sm:$0xf] }
 0x273   :  { %v7411_v15 = vor.u32 %v9119_v45, %v7410_v32  ;;  %v7539_v35 = vor.u32 %v9151_v14, %v7538_v10  ;;  %v7858_v32 = vld [vmem:[#allocation6 + $0xda8] sm:$0xf]  ;;  %v9231_v45 = vld [vmem:[#allocation6 + $0xdb4] sm:$0xf0] }
 0x274   :  { %4431 = vmatpush.bf16.msra.mxu2 %v7443_v12  ;;  %4445 = vmatpush.bf16.msra.mxu3 %v7571_v59  ;;  %v7763_v12 = vor.u32 %v9207_v4, %v7762_v1  ;;  %v7891_v59 = vor.u32 %v9239_v58, %v7890_v6  ;;  %v7730_v1 = vld [vmem:[#allocation6 + $0xca8] sm:$0xf]  ;;  %v9199_v4 = vld [vmem:[#allocation6 + $0xcb4] sm:$0xf0]  ;;  %v7859_v40 = vor.u32 %v9231_v45, %v7858_v32  ;;  %v10074_v45 = vpop.f32.mrf.mxu2 }
 0x275   :  { %v8002_v10 = vld [vmem:[#allocation6 + $0xec8] sm:$0xf]  ;;  %v9267_v14 = vld [vmem:[#allocation6 + $0xed4] sm:$0xf0]  ;;  %10314 = vst [vmem:[#allocation31_spill] sm:$0xff] %v10074_v45 }
 0x276   :  { %4405 = vmatpush.bf16.msra.mxu0 %v7155_v28  ;;  %4419 = vmatpush.bf16.msra.mxu1 %v7283_v50  ;;  %v9271_v28 = vld [vmem:[#allocation6 + $0xef4] sm:$0xf0]  ;;  %v8146_v50 = vld [vmem:[#allocation6 + $0xfe8] sm:$0xf]  ;;  %v8003_v21 = vor.u32 %v9267_v14, %v8002_v10 }
 0x277   :  { %v8019_v6 = vor.u32 %v9271_v28, %v8018_v57  ;;  %v8147_v58 = vor.u32 %v9303_v51, %v8146_v50  ;;  %v7714_v25 = vld [vmem:[#allocation6 + $0xc88] sm:$0xf]  ;;  %v9227_v33 = vld [vmem:[#allocation6 + $0xd94] sm:$0xf0] }
 0x278   :  { %4432 = vmatpush.bf16.msra.mxu2 %v7427_v60  ;;  %4446 = vmatpush.bf16.msra.mxu3 %v7555_v62  ;;  %v10067_v60 = vpop.f32.mrf.mxu1  ;;  %v7395_v62 = vor.u32 %v9115_v2, %v7394_v41  ;;  %v7842_v57 = vld [vmem:[#allocation6 + $0xd88] sm:$0xf]  ;;  %v9263_v61 = vld [vmem:[#allocation6 + $0xeb4] sm:$0xf0] }
 0x279   :  { %v8114_v41 = vld [vmem:[#allocation6 + $0xfa8] sm:$0xf]  ;;  %v9295_v2 = vld [vmem:[#allocation6 + $0xfb4] sm:$0xf0] }
 0x27a   :  { %4406 = vmatpush.bf16.msra.mxu0 %v7139_v9  ;;  %4420 = vmatpush.bf16.msra.mxu1 %v7267_v11  ;;  %v8130_v9 = vld [vmem:[#allocation6 + $0xfc8] sm:$0xf]  ;;  %v9299_v11 = vld [vmem:[#allocation6 + $0xfd4] sm:$0xf0] }
 0x27b   :  { %v8131_v29 = vor.u32 %v9299_v11, %v8130_v9  ;;  %v7970_v32 = vld [vmem:[#allocation6 + $0xe88] sm:$0xf]  ;;  %v9259_v10 = vld [vmem:[#allocation6 + $0xe94] sm:$0xf0]  ;;  %v10076_v9 = vpop.f32.mrf.mxu3 }
 0x27c   :  { %4433 = vmatpush.bf16.msra.mxu2 %v7411_v15  ;;  %4447 = vmatpush.bf16.msra.mxu3 %v7539_v35  ;;  %v7986_v15 = vld [vmem:[#allocation6 + $0xea8] sm:$0xf]  ;;  %v4184_v35 = vpop.f32.mrf.mxu0  ;;  %10315 = vst [vmem:[#allocation32_spill] sm:$0xff] %v10076_v9  ;;  %v9275_v9 = vld [vmem:[#allocation6 + $0xf14] sm:$0xf0] }
 0x27d   :  { %4407 = vmatmul.bf16.vlgmr.msra.gmra.mxu0 %v9943_v36  ;;  %4421 = vmatmul.bf16.vlgmr.msra.gmra.mxu1 %v9945_v37  ;;  %v4185_v28 = vadd.f32 %v4184_v35, %v10063_v55  ;;  %v8098_v14 = vld [vmem:[#allocation6 + $0xf88] sm:$0xf]  ;;  %v9291_v55 = vld [vmem:[#allocation6 + $0xf94] sm:$0xf0] }
 0x27e   :  { %4455 = vmatpush.bf16.msrb.mxu0 %v7763_v12  ;;  %4469 = vmatpush.bf16.msrb.mxu1 %v7891_v59  ;;  %v7731_v12 = vor.u32 %v9199_v4, %v7730_v1  ;;  %v9195_v59 = vld [vmem:[#allocation6 + $0xc94] sm:$0xf0]  ;;  %v7987_v1 = vor.u32 %v9263_v61, %v7986_v15  ;;  %v8115_v4 = vor.u32 %v9295_v2, %v8114_v41  ;;  %v8082_v35 = vld [vmem:[#allocation6 + $0xf68] sm:$0xf] }
 0x27f   :  { %v7715_v51 = vor.u32 %v9195_v59, %v7714_v25  ;;  %v9187_v25 = vld [vmem:[#allocation6 + $0xc54] sm:$0xf0]  ;;  %v7971_v59 = vor.u32 %v9259_v10, %v7970_v32 }
 0x280   :  { %4434 = vmatpush.bf16.msra.mxu2 %v7395_v62  ;;  %4448 = vmatpush.bf16.msra.mxu3 %v7523_v8  ;;  %v4198_v50 = vpop.f32.mrf.mxu1  ;;  %v9191_v62 = vld [vmem:[#allocation6 + $0xc74] sm:$0xf0] }
 0x281   :  { %v4199_v8 = vadd.f32 %v4198_v50, %v4185_v28  ;;  %v9255_v15 = vld [vmem:[#allocation6 + $0xe74] sm:$0xf0]  ;;  %v7666_v28 = vld [vmem:[#allocation6 + $0xc28] sm:$0xf] }
 0x282   :  { %4456 = vmatpush.bf16.msrb.mxu0 %v7747_v34  ;;  %4470 = vmatpush.bf16.msrb.mxu1 %v7875_v5  ;;  %v7843_v34 = vor.u32 %v9227_v33, %v7842_v57  ;;  %v7698_v5 = vld [vmem:[#allocation6 + $0xc68] sm:$0xf]  ;;  %v9219_v57 = vld [vmem:[#allocation6 + $0xd54] sm:$0xf0] }
 0x283   :  { %4435 = vmatmul.bf16.vlgmr.msra.gmra.mxu2 %v9949_v13  ;;  %4449 = vmatmul.bf16.vlgmr.msra.gmra.mxu3 %v9951_v16  ;;  %v7699_v11 = vor.u32 %v9191_v62, %v7698_v5  ;;  %v7954_v33 = vld [vmem:[#allocation6 + $0xe68] sm:$0xf]  ;;  %v9287_v61 = vld [vmem:[#allocation6 + $0xf74] sm:$0xf0] }
 0x284   :  { %4483 = vmatpush.bf16.msrb.mxu2 %v8019_v6  ;;  %4497 = vmatpush.bf16.msrb.mxu3 %v8147_v58  ;;  %v7826_v6 = vld [vmem:[#allocation6 + $0xd68] sm:$0xf]  ;;  %v9223_v58 = vld [vmem:[#allocation6 + $0xd74] sm:$0xf0]  ;;  %v10080_v45 = vpop.f32.mrf.mxu0 }
 0x285   :  { %v9183_v50 = vld [vmem:[#allocation6 + $0xc34] sm:$0xf0]  ;;  %v7794_v5 = vld [vmem:[#allocation6 + $0xd28] sm:$0xf] }
 0x286   :  { %4457 = vmatpush.bf16.msrb.mxu0 %v7731_v12  ;;  %4471 = vmatpush.bf16.msrb.mxu1 %v7859_v40  ;;  %v7827_v12 = vor.u32 %v9223_v58, %v7826_v6  ;;  %v7682_v40 = vld [vmem:[#allocation6 + $0xc48] sm:$0xf]  ;;  %v9215_v62 = vld [vmem:[#allocation6 + $0xd34] sm:$0xf0] }
 0x287   :  { %v7683_v41 = vor.u32 %v9187_v25, %v7682_v40  ;;  %v9251_v6 = vld [vmem:[#allocation6 + $0xe54] sm:$0xf0]  ;;  %v8066_v58 = vld [vmem:[#allocation6 + $0xf48] sm:$0xf] }
 0x288   :  { %4484 = vmatpush.bf16.msrb.mxu2 %v8003_v21  ;;  %4498 = vmatpush.bf16.msrb.mxu3 %v8131_v29  ;;  %v8099_v21 = vor.u32 %v9291_v55, %v8098_v14  ;;  %v7810_v29 = vld [vmem:[#allocation6 + $0xd48] sm:$0xf]  ;;  %v9283_v32 = vld [vmem:[#allocation6 + $0xf54] sm:$0xf0]  ;;  %v4226_v14 = vpop.f32.mrf.mxu3  ;;  %v7667_v55 = vor.u32 %v9183_v50, %v7666_v28 }
 0x289   :  { %v7811_v2 = vor.u32 %v9219_v57, %v7810_v29  ;;  %v9179_v40 = vld [vmem:[#allocation6 + $0xc14] sm:$0xf0]  ;;  %v7778_v25 = vld [vmem:[#allocation6 + $0xd08] sm:$0xf]  ;;  %v8067_v29 = vor.u32 %v9283_v32, %v8066_v58  ;;  %v6340_v32 = vld [vmem:[#allocation6 + $0x1d8] sm:$0xf0] }
 0x28a   :  { %4458 = vmatpush.bf16.msrb.mxu0 %v7715_v51  ;;  %4472 = vmatpush.bf16.msrb.mxu1 %v7843_v34  ;;  %v7955_v51 = vor.u32 %v9255_v15, %v7954_v33  ;;  %v8083_v34 = vor.u32 %v9287_v61, %v8082_v35  ;;  %v9211_v57 = vld [vmem:[#allocation6 + $0xd14] sm:$0xf0]  ;;  %v8821_v33 = vld [vmem:[#allocation6 + $0xec] sm:$0xf]  ;;  %v6228_v15 = vld [vmem:[#allocation6 + $0xf8] sm:$0xf0] }
 0x28b   :  { %v8853_v35 = vld [vmem:[#allocation6 + $0x1ec] sm:$0xf]  ;;  %v6356_v61 = vld [vmem:[#allocation6 + $0x1f8] sm:$0xf0]  ;;  %v7779_v50 = vor.u32 %v9211_v57, %v7778_v25  ;;  %v8035_v57 = vor.u32 %v9275_v9, %v8034_v49 }
 0x28c   :  { %4485 = vmatpush.bf16.msrb.mxu2 %v7987_v1  ;;  %4499 = vmatpush.bf16.msrb.mxu3 %v8115_v4  ;;  %v7938_v1 = vld [vmem:[#allocation6 + $0xe48] sm:$0xf]  ;;  %v4212_v4 = vpop.f32.mrf.mxu2  ;;  %v8809_v9 = vld [vmem:[#allocation6 + $0x8c] sm:$0xf] }
 0x28d   :  { %v4213_v10 = vadd.f32 %v4212_v4, %v4199_v8  ;;  %v7922_v8 = vld [vmem:[#allocation6 + $0xe28] sm:$0xf]  ;;  %v9279_v4 = vld [vmem:[#allocation6 + $0xf34] sm:$0xf0] }
 0x28e   :  { %4459 = vmatpush.bf16.msrb.mxu0 %v7699_v11  ;;  %4473 = vmatpush.bf16.msrb.mxu1 %v7827_v12  ;;  %v7795_v11 = vor.u32 %v9215_v62, %v7794_v5  ;;  %v7650_v12 = vld [vmem:[#allocation6 + $0xc08] sm:$0xf]  ;;  %v8817_v5 = vld [vmem:[#allocation6 + $0xcc] sm:$0xf]  ;;  %v6212_v62 = vld [vmem:[#allocation6 + $0xd8] sm:$0xf0] }
 0x28f   :  { %v7651_v28 = vor.u32 %v9179_v40, %v7650_v12  ;;  %v6612_v12 = vld [vmem:[#allocation6 + $0x3f8] sm:$0xf0]  ;;  %v6215_v40 = vor.u32 %v8817_v5, %v6212_v62 }
 0x290   :  { %4486 = vmatpush.bf16.msrb.mxu2 %v7971_v59  ;;  %4500 = vmatpush.bf16.msrb.mxu3 %v8099_v21  ;;  %v10078_v59 = vadd.f32 %v4226_v14, %v4213_v10  ;;  %v7939_v21 = vor.u32 %v9251_v6, %v7938_v1  ;;  %v8849_v1 = vld [vmem:[#allocation6 + $0x1cc] sm:$0xf]  ;;  %v7906_v10 = vld [vmem:[#allocation6 + $0xe08] sm:$0xf]  ;;  %v9243_v14 = vld [vmem:[#allocation6 + $0xe14] sm:$0xf0] }
 0x291   :  { %v6343_v25 = vor.u32 %v8849_v1, %v6340_v32  ;;  %v6308_v1 = vld [vmem:[#allocation6 + $0x198] sm:$0xf0] }
 0x292   :  { %4460 = vmatpush.bf16.msrb.mxu0 %v7683_v41  ;;  %4474 = vmatpush.bf16.msrb.mxu1 %v7811_v2  ;;  %v9247_v41 = vld [vmem:[#allocation6 + $0xe34] sm:$0xf0]  ;;  %v8050_v2 = vld [vmem:[#allocation6 + $0xf28] sm:$0xf]  ;;  %v6452_v32 = vld [vmem:[#allocation6 + $0x2b8] sm:$0xf0] }
 0x293   :  { %v7923_v6 = vor.u32 %v9247_v41, %v7922_v8  ;;  %v8051_v58 = vor.u32 %v9279_v4, %v8050_v2  ;;  %v8845_v8 = vld [vmem:[#allocation6 + $0x1ac] sm:$0xf]  ;;  %v6324_v41 = vld [vmem:[#allocation6 + $0x1b8] sm:$0xf0] }
 0x294   :  { %4487 = vmatpush.bf16.msrb.mxu2 %v7955_v51  ;;  %4501 = vmatpush.bf16.msrb.mxu3 %v8083_v34  ;;  %v6231_v51 = vor.u32 %v8821_v33, %v6228_v15  ;;  %v6359_v34 = vor.u32 %v8853_v35, %v6356_v61  ;;  %v8813_v33 = vld [vmem:[#allocation6 + $0xac] sm:$0xf]  ;;  %v6196_v15 = vld [vmem:[#allocation6 + $0xb8] sm:$0xf0]  ;;  %v6327_v49 = vor.u32 %v8845_v8, %v6324_v41  ;;  %v10089_v41 = vpop.f32.mrf.mxu2 }
 0x295   :  { %v8881_v2 = vld [vmem:[#allocation6 + $0x2cc] sm:$0xf]  ;;  %v6468_v4 = vld [vmem:[#allocation6 + $0x2d8] sm:$0xf0] }
 0x296   :  { %4461 = vmatpush.bf16.msrb.mxu0 %v7667_v55  ;;  %4475 = vmatpush.bf16.msrb.mxu1 %v7795_v11  ;;  %v6484_v55 = vld [vmem:[#allocation6 + $0x2f8] sm:$0xf0]  ;;  %v8917_v11 = vld [vmem:[#allocation6 + $0x3ec] sm:$0xf]  ;;  %v6471_v5 = vor.u32 %v8881_v2, %v6468_v4 }
 0x297   :  { %v6487_v35 = vor.u32 %v8885_v38, %v6484_v55  ;;  %v6615_v61 = vor.u32 %v8917_v11, %v6612_v12  ;;  %v8841_v38 = vld [vmem:[#allocation6 + $0x18c] sm:$0xf]  ;;  %v6436_v2 = vld [vmem:[#allocation6 + $0x298] sm:$0xf0] }
 0x298   :  { %4488 = vmatpush.bf16.msrb.mxu2 %v7939_v21  ;;  %4502 = vmatpush.bf16.msrb.mxu3 %v8067_v29  ;;  %v10082_v21 = vpop.f32.mrf.mxu1  ;;  %v7907_v29 = vor.u32 %v9243_v14, %v7906_v10  ;;  %v8909_v10 = vld [vmem:[#allocation6 + $0x3ac] sm:$0xf]  ;;  %v6580_v14 = vld [vmem:[#allocation6 + $0x3b8] sm:$0xf0] }
 0x299   :  { %v8873_v8 = vld [vmem:[#allocation6 + $0x28c] sm:$0xf] }
 0x29a   :  { %4462 = vmatpush.bf16.msrb.mxu0 %v7651_v28  ;;  %4476 = vmatpush.bf16.msrb.mxu1 %v7779_v50  ;;  %v8913_v28 = vld [vmem:[#allocation6 + $0x3cc] sm:$0xf]  ;;  %v6596_v50 = vld [vmem:[#allocation6 + $0x3d8] sm:$0xf0] }
 0x29b   :  { %v6599_v62 = vor.u32 %v8913_v28, %v6596_v50  ;;  %v8905_v4 = vld [vmem:[#allocation6 + $0x38c] sm:$0xf]  ;;  %v10091_v28 = vpop.f32.mrf.mxu3 }
 0x29c   :  { %4489 = vmatpush.bf16.msrb.mxu2 %v7923_v6  ;;  %4503 = vmatpush.bf16.msrb.mxu3 %v8051_v58  ;;  %v8877_v6 = vld [vmem:[#allocation6 + $0x2ac] sm:$0xf]  ;;  %v4240_v58 = vpop.f32.mrf.mxu0 }
 0x29d   :  { %4463 = vmatmul.bf16.vlgmr.msrb.gmra.mxu0 %v9971_v17  ;;  %4477 = vmatmul.bf16.vlgmr.msrb.gmra.mxu1 %v9973_v18  ;;  %v4241_v55 = vadd.f32 %v4240_v58, %v10078_v59  ;;  %v6564_v59 = vld [vmem:[#allocation6 + $0x398] sm:$0xf0]  ;;  %v8901_v58 = vld [vmem:[#allocation6 + $0x36c] sm:$0xf] }
 0x29e   :  { %4511 = vmatpush.bf16.msra.mxu0 %v6231_v51  ;;  %4525 = vmatpush.bf16.msra.mxu1 %v6359_v34  ;;  %v6199_v51 = vor.u32 %v8813_v33, %v6196_v15  ;;  %v6180_v34 = vld [vmem:[#allocation6 + $0x98] sm:$0xf0]  ;;  %v6455_v33 = vor.u32 %v8877_v6, %v6452_v32  ;;  %v6583_v15 = vor.u32 %v8909_v10, %v6580_v14 }
 0x29f   :  { %v6183_v12 = vor.u32 %v8809_v9, %v6180_v34  ;;  %v6148_v9 = vld [vmem:[#allocation6 + $0x58] sm:$0xf0]  ;;  %v6439_v34 = vor.u32 %v8873_v8, %v6436_v2 }
 0x2a0   :  { %4490 = vmatpush.bf16.msrb.mxu2 %v7907_v29  ;;  %4504 = vmatpush.bf16.msrb.mxu3 %v8035_v57  ;;  %v4254_v11 = vpop.f32.mrf.mxu1  ;;  %v6164_v29 = vld [vmem:[#allocation6 + $0x78] sm:$0xf0] }
 0x2a1   :  { %v4255_v57 = vadd.f32 %v4254_v11, %v4241_v55  ;;  %v6420_v6 = vld [vmem:[#allocation6 + $0x278] sm:$0xf0]  ;;  %v8797_v55 = vld [vmem:[#allocation6 + $0x2c] sm:$0xf] }
 0x2a2   :  { %4512 = vmatpush.bf16.msra.mxu0 %v6215_v40  ;;  %4526 = vmatpush.bf16.msra.mxu1 %v6343_v25  ;;  %v6311_v40 = vor.u32 %v8841_v38, %v6308_v1  ;;  %v8805_v25 = vld [vmem:[#allocation6 + $0x6c] sm:$0xf]  ;;  %v6276_v38 = vld [vmem:[#allocation6 + $0x158] sm:$0xf0] }
 0x2a3   :  { %4491 = vmatmul.bf16.vlgmr.msrb.gmra.mxu2 %v9977_v7  ;;  %4505 = vmatmul.bf16.vlgmr.msrb.gmra.mxu3 %v9979_v43  ;;  %v6167_v50 = vor.u32 %v8805_v25, %v6164_v29  ;;  %v8869_v1 = vld [vmem:[#allocation6 + $0x26c] sm:$0xf]  ;;  %v6548_v32 = vld [vmem:[#allocation6 + $0x378] sm:$0xf0] }
 0x2a4   :  { %4539 = vmatpush.bf16.msra.mxu2 %v6487_v35  ;;  %4553 = vmatpush.bf16.msra.mxu3 %v6615_v61  ;;  %v8837_v35 = vld [vmem:[#allocation6 + $0x16c] sm:$0xf]  ;;  %v6292_v61 = vld [vmem:[#allocation6 + $0x178] sm:$0xf0] }
 0x2a5   :  { %v6132_v11 = vld [vmem:[#allocation6 + $0x38] sm:$0xf0]  ;;  %v8829_v25 = vld [vmem:[#allocation6 + $0x12c] sm:$0xf] }
 0x2a6   :  { %4513 = vmatpush.bf16.msra.mxu0 %v6199_v51  ;;  %4527 = vmatpush.bf16.msra.mxu1 %v6327_v49  ;;  %v6295_v51 = vor.u32 %v8837_v35, %v6292_v61  ;;  %v8801_v49 = vld [vmem:[#allocation6 + $0x4c] sm:$0xf]  ;;  %v6260_v29 = vld [vmem:[#allocation6 + $0x138] sm:$0xf0] }
 0x2a7   :  { %v6151_v10 = vor.u32 %v8801_v49, %v6148_v9  ;;  %v6404_v35 = vld [vmem:[#allocation6 + $0x258] sm:$0xf0]  ;;  %v8897_v61 = vld [vmem:[#allocation6 + $0x34c] sm:$0xf] }
 0x2a8   :  { %4540 = vmatpush.bf16.msra.mxu2 %v6471_v5  ;;  %4554 = vmatpush.bf16.msra.mxu3 %v6599_v62  ;;  %v6567_v5 = vor.u32 %v8905_v4, %v6564_v59  ;;  %v8833_v62 = vld [vmem:[#allocation6 + $0x14c] sm:$0xf]  ;;  %v6532_v8 = vld [vmem:[#allocation6 + $0x358] sm:$0xf0]  ;;  %v4282_v4 = vpop.f32.mrf.mxu3  ;;  %v6135_v59 = vor.u32 %v8797_v55, %v6132_v11 }
 0x2a9   :  { %v6279_v14 = vor.u32 %v8833_v62, %v6276_v38  ;;  %v6116_v49 = vld [vmem:[#allocation6 + $0x18] sm:$0xf0]  ;;  %v8825_v9 = vld [vmem:[#allocation6 + $0x10c] sm:$0xf]  ;;  %v6535_v62 = vor.u32 %v8897_v61, %v6532_v8 }
 0x2aa   :  { %4514 = vmatpush.bf16.msra.mxu0 %v6183_v12  ;;  %4528 = vmatpush.bf16.msra.mxu1 %v6311_v40  ;;  %v6423_v12 = vor.u32 %v8869_v1, %v6420_v6  ;;  %v6551_v40 = vor.u32 %v8901_v58, %v6548_v32  ;;  %v6244_v38 = vld [vmem:[#allocation6 + $0x118] sm:$0xf0]  ;;  %v8949_v1 = vld [vmem:[#allocation6 + $0x4ec] sm:$0xf] }
 0x2ab   :  { %v6740_v6 = vld [vmem:[#allocation6 + $0x4f8] sm:$0xf0]  ;;  %v8981_v58 = vld [vmem:[#allocation6 + $0x5ec] sm:$0xf]  ;;  %v6247_v11 = vor.u32 %v8825_v9, %v6244_v38 }
 0x2ac   :  { %4541 = vmatpush.bf16.msra.mxu2 %v6455_v33  ;;  %4555 = vmatpush.bf16.msra.mxu3 %v6583_v15  ;;  %v8865_v33 = vld [vmem:[#allocation6 + $0x24c] sm:$0xf]  ;;  %v4268_v15 = vpop.f32.mrf.mxu2  ;;  %v6868_v32 = vld [vmem:[#allocation6 + $0x5f8] sm:$0xf0] }
 0x2ad   :  { %v4269_v2 = vadd.f32 %v4268_v15, %v4255_v57  ;;  %v8861_v57 = vld [vmem:[#allocation6 + $0x22c] sm:$0xf]  ;;  %v6516_v15 = vld [vmem:[#allocation6 + $0x338] sm:$0xf0] }
 0x2ae   :  { %4515 = vmatpush.bf16.msra.mxu0 %v6167_v50  ;;  %4529 = vmatpush.bf16.msra.mxu1 %v6295_v51  ;;  %v6263_v50 = vor.u32 %v8829_v25, %v6260_v29  ;;  %v8793_v51 = vld [vmem:[#allocation6 + $0xc] sm:$0xf]  ;;  %v6724_v29 = vld [vmem:[#allocation6 + $0x4d8] sm:$0xf0] }
 0x2af   :  { %v6119_v55 = vor.u32 %v8793_v51, %v6116_v49  ;;  %v8945_v25 = vld [vmem:[#allocation6 + $0x4cc] sm:$0xf]  ;;  %v6852_v8 = vld [vmem:[#allocation6 + $0x5d8] sm:$0xf0] }
 0x2b0   :  { %4542 = vmatpush.bf16.msra.mxu2 %v6439_v34  ;;  %4556 = vmatpush.bf16.msra.mxu3 %v6567_v5  ;;  %v10093_v34 = vadd.f32 %v4282_v4, %v4269_v2  ;;  %v6407_v5 = vor.u32 %v8865_v33, %v6404_v35  ;;  %v8977_v33 = vld [vmem:[#allocation6 + $0x5cc] sm:$0xf]  ;;  %v6372_v4 = vld [vmem:[#allocation6 + $0x218] sm:$0xf0]  ;;  %v6727_v49 = vor.u32 %v8945_v25, %v6724_v29 }
 0x2b1   :  { %v8857_v2 = vld [vmem:[#allocation6 + $0x20c] sm:$0xf]  ;;  %v6500_v43 = vld [vmem:[#allocation6 + $0x318] sm:$0xf0]  ;;  %v6855_v9 = vor.u32 %v8977_v33, %v6852_v8 }
 0x2b2   :  { %4516 = vmatpush.bf16.msra.mxu0 %v6151_v10  ;;  %4530 = vmatpush.bf16.msra.mxu1 %v6279_v14  ;;  %10316 = vst [vmem:[#allocation33_spill] sm:$0xff] %v10093_v34  ;;  %v6388_v10 = vld [vmem:[#allocation6 + $0x238] sm:$0xf0]  ;;  %v8893_v14 = vld [vmem:[#allocation6 + $0x32c] sm:$0xf] }
 0x2b3   :  { %v6391_v35 = vor.u32 %v8861_v57, %v6388_v10  ;;  %v6519_v61 = vor.u32 %v8893_v14, %v6516_v15  ;;  %v8889_v34 = vld [vmem:[#allocation6 + $0x30c] sm:$0xf]  ;;  %v7124_v51 = vld [vmem:[#allocation6 + $0x7f8] sm:$0xf0] }
 0x2b4   :  { %4543 = vmatpush.bf16.msra.mxu2 %v6423_v12  ;;  %4557 = vmatpush.bf16.msra.mxu3 %v6551_v40  ;;  %v6743_v12 = vor.u32 %v8949_v1, %v6740_v6  ;;  %v6871_v40 = vor.u32 %v8981_v58, %v6868_v32  ;;  %v9013_v7 = vld [vmem:[#allocation6 + $0x6ec] sm:$0xf]  ;;  %v6708_v1 = vld [vmem:[#allocation6 + $0x4b8] sm:$0xf0] }
 0x2b5   :  { %v8941_v38 = vld [vmem:[#allocation6 + $0x4ac] sm:$0xf]  ;;  %v6836_v57 = vld [vmem:[#allocation6 + $0x5b8] sm:$0xf0] }
 0x2b6   :  { %4517 = vmatpush.bf16.msra.mxu0 %v6135_v59  ;;  %4531 = vmatpush.bf16.msra.mxu1 %v6263_v50  ;;  %v6996_v59 = vld [vmem:[#allocation6 + $0x6f8] sm:$0xf0]  ;;  %v9045_v50 = vld [vmem:[#allocation6 + $0x7ec] sm:$0xf] }
 0x2b7   :  { %v6999_v6 = vor.u32 %v9013_v7, %v6996_v59  ;;  %v7127_v58 = vor.u32 %v9045_v50, %v7124_v51  ;;  %v8973_v32 = vld [vmem:[#allocation6 + $0x5ac] sm:$0xf]  ;;  %v6980_v14 = vld [vmem:[#allocation6 + $0x6d8] sm:$0xf0] }
 0x2b8   :  { %4544 = vmatpush.bf16.msra.mxu2 %v6407_v5  ;;  %4558 = vmatpush.bf16.msra.mxu3 %v6535_v62  ;;  %v6375_v5 = vor.u32 %v8857_v2, %v6372_v4  ;;  %v6503_v62 = vor.u32 %v8889_v34, %v6500_v43  ;;  %v9009_v10 = vld [vmem:[#allocation6 + $0x6cc] sm:$0xf]  ;;  %v6839_v43 = vor.u32 %v8973_v32, %v6836_v57  ;;  %v6964_v29 = vld [vmem:[#allocation6 + $0x6b8] sm:$0xf0] }
 0x2b9   :  { %v9041_v15 = vld [vmem:[#allocation6 + $0x7cc] sm:$0xf]  ;;  %v6676_v4 = vld [vmem:[#allocation6 + $0x478] sm:$0xf0] }
 0x2ba   :  { %4518 = vmatpush.bf16.msra.mxu0 %v6119_v55  ;;  %4532 = vmatpush.bf16.msra.mxu1 %v6247_v11  ;;  %v7108_v55 = vld [vmem:[#allocation6 + $0x7d8] sm:$0xf0]  ;;  %v6711_v11 = vor.u32 %v8941_v38, %v6708_v1  ;;  %v8937_v34 = vld [vmem:[#allocation6 + $0x48c] sm:$0xf] }
 0x2bb   :  { %v8969_v7 = vld [vmem:[#allocation6 + $0x58c] sm:$0xf]  ;;  %v7076_v38 = vld [vmem:[#allocation6 + $0x798] sm:$0xf0] }
 0x2bc   :  { %4545 = vmatpush.bf16.msra.mxu2 %v6391_v35  ;;  %4559 = vmatpush.bf16.msra.mxu3 %v6519_v61  ;;  %v9005_v25 = vld [vmem:[#allocation6 + $0x6ac] sm:$0xf]  ;;  %v7092_v35 = vld [vmem:[#allocation6 + $0x7b8] sm:$0xf0] }
 0x2bd   :  { %4519 = vmatmul.bf16.vlgmr.msra.gmra.mxu0 %v9901_v53  ;;  %4533 = vmatmul.bf16.vlgmr.msra.gmra.mxu1 %v9903_v54  ;;  %v6983_v53 = vor.u32 %v9009_v10, %v6980_v14  ;;  %v7111_v54 = vor.u32 %v9041_v15, %v7108_v55  ;;  %v9037_v33 = vld [vmem:[#allocation6 + $0x7ac] sm:$0xf]  ;;  %v6967_v59 = vor.u32 %v9005_v25, %v6964_v29  ;;  %v6788_v10 = vld [vmem:[#allocation6 + $0x558] sm:$0xf0] }
 0x2be   :  { %4567 = vmatpush.bf16.msrb.mxu0 %v6743_v12  ;;  %4581 = vmatpush.bf16.msrb.mxu1 %v6871_v40  ;;  %v6692_v12 = vld [vmem:[#allocation6 + $0x498] sm:$0xf0]  ;;  %v8933_v2 = vld [vmem:[#allocation6 + $0x46c] sm:$0xf]  ;;  %v7095_v50 = vor.u32 %v9037_v33, %v7092_v35 }
 0x2bf   :  { %v6820_v40 = vld [vmem:[#allocation6 + $0x598] sm:$0xf0]  ;;  %v6695_v61 = vor.u32 %v8937_v34, %v6692_v12  ;;  %v8965_v51 = vld [vmem:[#allocation6 + $0x56c] sm:$0xf] }
 0x2c0   :  { %4546 = vmatpush.bf16.msra.mxu2 %v6375_v5  ;;  %4560 = vmatpush.bf16.msra.mxu3 %v6503_v62  ;;  %v6823_v8 = vor.u32 %v8969_v7, %v6820_v40  ;;  %v6948_v5 = vld [vmem:[#allocation6 + $0x698] sm:$0xf0]  ;;  %v9033_v62 = vld [vmem:[#allocation6 + $0x78c] sm:$0xf] }
 0x2c1   :  { %v8929_v1 = vld [vmem:[#allocation6 + $0x44c] sm:$0xf]  ;;  %v7079_v32 = vor.u32 %v9033_v62, %v7076_v38  ;;  %v6932_v15 = vld [vmem:[#allocation6 + $0x678] sm:$0xf0] }
 0x2c2   :  { %4568 = vmatpush.bf16.msrb.mxu0 %v6727_v49  ;;  %4582 = vmatpush.bf16.msrb.mxu1 %v6855_v9  ;;  %v6804_v49 = vld [vmem:[#allocation6 + $0x578] sm:$0xf0]  ;;  %v9001_v9 = vld [vmem:[#allocation6 + $0x68c] sm:$0xf] }
 0x2c3   :  { %4547 = vmatmul.bf16.vlgmr.msra.gmra.mxu2 %v9909_v22  ;;  %4561 = vmatmul.bf16.vlgmr.msra.gmra.mxu3 %v9911_v23  ;;  %v6679_v22 = vor.u32 %v8933_v2, %v6676_v4  ;;  %v6807_v23 = vor.u32 %v8965_v51, %v6804_v49  ;;  %v8961_v57 = vld [vmem:[#allocation6 + $0x54c] sm:$0xf]  ;;  %v6772_v25 = vld [vmem:[#allocation6 + $0x538] sm:$0xf0] }
 0x2c4   :  { %4595 = vmatpush.bf16.msrb.mxu2 %v6999_v6  ;;  %4609 = vmatpush.bf16.msrb.mxu3 %v7127_v58  ;;  %v6660_v6 = vld [vmem:[#allocation6 + $0x458] sm:$0xf0]  ;;  %v6951_v58 = vor.u32 %v9001_v9, %v6948_v5  ;;  %v8997_v14 = vld [vmem:[#allocation6 + $0x66c] sm:$0xf]  ;;  %v6791_v34 = vor.u32 %v8961_v57, %v6788_v10 }
 0x2c5   :  { %v9029_v55 = vld [vmem:[#allocation6 + $0x76c] sm:$0xf]  ;;  %v6916_v33 = vld [vmem:[#allocation6 + $0x658] sm:$0xf0] }
 0x2c6   :  { %4569 = vmatpush.bf16.msrb.mxu0 %v6711_v11  ;;  %4583 = vmatpush.bf16.msrb.mxu1 %v6839_v43  ;;  %v7060_v11 = vld [vmem:[#allocation6 + $0x778] sm:$0xf0]  ;;  %v6663_v43 = vor.u32 %v8929_v1, %v6660_v6  ;;  %v8925_v12 = vld [vmem:[#allocation6 + $0x42c] sm:$0xf] }
 0x2c7   :  { %v7063_v7 = vor.u32 %v9029_v55, %v7060_v11  ;;  %v8957_v40 = vld [vmem:[#allocation6 + $0x52c] sm:$0xf]  ;;  %v6756_v9 = vld [vmem:[#allocation6 + $0x518] sm:$0xf0] }
 0x2c8   :  { %4596 = vmatpush.bf16.msrb.mxu2 %v6983_v53  ;;  %4610 = vmatpush.bf16.msrb.mxu3 %v7111_v54  ;;  %v6644_v53 = vld [vmem:[#allocation6 + $0x438] sm:$0xf0]  ;;  %v6935_v54 = vor.u32 %v8997_v14, %v6932_v15  ;;  %v8993_v29 = vld [vmem:[#allocation6 + $0x64c] sm:$0xf]  ;;  %v6775_v2 = vor.u32 %v8957_v40, %v6772_v25 }
 0x2c9   :  { %v9025_v35 = vld [vmem:[#allocation6 + $0x74c] sm:$0xf]  ;;  %v6919_v51 = vor.u32 %v8993_v29, %v6916_v33  ;;  %v7252_v62 = vld [vmem:[#allocation6 + $0x8f8] sm:$0xf0] }
 0x2ca   :  { %4570 = vmatpush.bf16.msrb.mxu0 %v6695_v61  ;;  %4584 = vmatpush.bf16.msrb.mxu1 %v6823_v8  ;;  %v7044_v61 = vld [vmem:[#allocation6 + $0x758] sm:$0xf0]  ;;  %v6647_v8 = vor.u32 %v8925_v12, %v6644_v53  ;;  %v8921_v4 = vld [vmem:[#allocation6 + $0x40c] sm:$0xf] }
 0x2cb   :  { %v7047_v49 = vor.u32 %v9025_v35, %v7044_v61  ;;  %v9077_v5 = vld [vmem:[#allocation6 + $0x8ec] sm:$0xf]  ;;  %v6900_v1 = vld [vmem:[#allocation6 + $0x638] sm:$0xf0] }
 0x2cc   :  { %4597 = vmatpush.bf16.msrb.mxu2 %v6967_v59  ;;  %4611 = vmatpush.bf16.msrb.mxu3 %v7095_v50  ;;  %v6628_v59 = vld [vmem:[#allocation6 + $0x418] sm:$0xf0]  ;;  %v8953_v50 = vld [vmem:[#allocation6 + $0x50c] sm:$0xf]  ;;  %v7255_v10 = vor.u32 %v9077_v5, %v7252_v62 }
 0x2cd   :  { %v9109_v38 = vld [vmem:[#allocation6 + $0x9ec] sm:$0xf]  ;;  %v6759_v57 = vor.u32 %v8953_v50, %v6756_v9  ;;  %v7236_v55 = vld [vmem:[#allocation6 + $0x8d8] sm:$0xf0] }
 0x2ce   :  { %4571 = vmatpush.bf16.msrb.mxu0 %v6679_v22  ;;  %4585 = vmatpush.bf16.msrb.mxu1 %v6807_v23  ;;  %v7380_v22 = vld [vmem:[#allocation6 + $0x9f8] sm:$0xf0]  ;;  %v8989_v23 = vld [vmem:[#allocation6 + $0x62c] sm:$0xf] }
 0x2cf   :  { %v9021_v6 = vld [vmem:[#allocation6 + $0x72c] sm:$0xf]  ;;  %v7383_v14 = vor.u32 %v9109_v38, %v7380_v22  ;;  %v7364_v12 = vld [vmem:[#allocation6 + $0x9d8] sm:$0xf0] }
 0x2d0   :  { %4598 = vmatpush.bf16.msrb.mxu2 %v6951_v58  ;;  %4612 = vmatpush.bf16.msrb.mxu3 %v7079_v32  ;;  %v7028_v58 = vld [vmem:[#allocation6 + $0x738] sm:$0xf0]  ;;  %v6631_v32 = vor.u32 %v8921_v4, %v6628_v59  ;;  %v9073_v15 = vld [vmem:[#allocation6 + $0x8cc] sm:$0xf] }
 0x2d1   :  { %v9105_v11 = vld [vmem:[#allocation6 + $0x9cc] sm:$0xf]  ;;  %v7012_v40 = vld [vmem:[#allocation6 + $0x718] sm:$0xf0]  ;;  %v7239_v61 = vor.u32 %v9073_v15, %v7236_v55 }
 0x2d2   :  { %4572 = vmatpush.bf16.msrb.mxu0 %v6663_v43  ;;  %4586 = vmatpush.bf16.msrb.mxu1 %v6791_v34  ;;  %v6903_v43 = vor.u32 %v8989_v23, %v6900_v1  ;;  %v7031_v34 = vor.u32 %v9021_v6, %v7028_v58  ;;  %v8985_v53 = vld [vmem:[#allocation6 + $0x60c] sm:$0xf]  ;;  %v7508_v29 = vld [vmem:[#allocation6 + $0xaf8] sm:$0xf0] }
 0x2d3   :  { %v9141_v25 = vld [vmem:[#allocation6 + $0xaec] sm:$0xf]  ;;  %v7636_v35 = vld [vmem:[#allocation6 + $0xbf8] sm:$0xf0] }
 0x2d4   :  { %4599 = vmatpush.bf16.msrb.mxu2 %v6935_v54  ;;  %4613 = vmatpush.bf16.msrb.mxu3 %v7063_v7  ;;  %v6884_v54 = vld [vmem:[#allocation6 + $0x618] sm:$0xf0]  ;;  %v9017_v7 = vld [vmem:[#allocation6 + $0x70c] sm:$0xf] }
 0x2d5   :  { %v9173_v33 = vld [vmem:[#allocation6 + $0xbec] sm:$0xf]  ;;  %v7015_v4 = vor.u32 %v9017_v7, %v7012_v40  ;;  %v7220_v50 = vld [vmem:[#allocation6 + $0x8b8] sm:$0xf0] }
 0x2d6   :  { %4573 = vmatpush.bf16.msrb.mxu0 %v6647_v8  ;;  %4587 = vmatpush.bf16.msrb.mxu1 %v6775_v2  ;;  %v7367_v8 = vor.u32 %v9105_v11, %v7364_v12  ;;  %v6887_v2 = vor.u32 %v8985_v53, %v6884_v54  ;;  %v9069_v59 = vld [vmem:[#allocation6 + $0x8ac] sm:$0xf]  ;;  %v7348_v5 = vld [vmem:[#allocation6 + $0x9b8] sm:$0xf0] }
 0x2d7   :  { %v9101_v9 = vld [vmem:[#allocation6 + $0x9ac] sm:$0xf]  ;;  %v7492_v38 = vld [vmem:[#allocation6 + $0xad8] sm:$0xf0]  ;;  %v7223_v1 = vor.u32 %v9069_v59, %v7220_v50 }
 0x2d8   :  { %4600 = vmatpush.bf16.msrb.mxu2 %v6919_v51  ;;  %4614 = vmatpush.bf16.msrb.mxu3 %v7047_v49  ;;  %v7511_v51 = vor.u32 %v9141_v25, %v7508_v29  ;;  %v7639_v49 = vor.u32 %v9173_v33, %v7636_v35  ;;  %v9137_v62 = vld [vmem:[#allocation6 + $0xacc] sm:$0xf]  ;;  %v7620_v23 = vld [vmem:[#allocation6 + $0xbd8] sm:$0xf0]  ;;  %v7351_v6 = vor.u32 %v9101_v9, %v7348_v5 }
 0x2d9   :  { %v9169_v22 = vld [vmem:[#allocation6 + $0xbcc] sm:$0xf]  ;;  %v7476_v55 = vld [vmem:[#allocation6 + $0xab8] sm:$0xf0] }
 0x2da   :  { %4574 = vmatpush.bf16.msrb.mxu0 %v6631_v32  ;;  %4588 = vmatpush.bf16.msrb.mxu1 %v6759_v57  ;;  %v9065_v58 = vld [vmem:[#allocation6 + $0x88c] sm:$0xf]  ;;  %v7204_v32 = vld [vmem:[#allocation6 + $0x898] sm:$0xf0]  ;;  %v10101_v57 = vpop.f32.mrf.mxu0 }
 0x2db   :  { %v9133_v15 = vld [vmem:[#allocation6 + $0xaac] sm:$0xf]  ;;  %v7188_v54 = vld [vmem:[#allocation6 + $0x878] sm:$0xf0] }
 0x2dc   :  { %4601 = vmatpush.bf16.msrb.mxu2 %v6903_v43  ;;  %4615 = vmatpush.bf16.msrb.mxu3 %v7031_v34  ;;  %v9165_v11 = vld [vmem:[#allocation6 + $0xbac] sm:$0xf]  ;;  %v7604_v43 = vld [vmem:[#allocation6 + $0xbb8] sm:$0xf0]  ;;  %v7207_v34 = vor.u32 %v9065_v58, %v7204_v32  ;;  %v7479_v7 = vor.u32 %v9133_v15, %v7476_v55 }
 0x2dd   :  { %4575 = vmatmul.bf16.vlgmr.msrb.gmra.mxu0 %v9919_v3  ;;  %4589 = vmatmul.bf16.vlgmr.msrb.gmra.mxu1 %v9921_v26  ;;  %v7495_v3 = vor.u32 %v9137_v62, %v7492_v38  ;;  %v7623_v26 = vor.u32 %v9169_v22, %v7620_v23  ;;  %v9061_v53 = vld [vmem:[#allocation6 + $0x86c] sm:$0xf]  ;;  %v7607_v40 = vor.u32 %v9165_v11, %v7604_v43  ;;  %v7316_v29 = vld [vmem:[#allocation6 + $0x978] sm:$0xf0] }
 0x2de   :  { %4623 = vmatpush.bf16.msra.mxu0 %v7255_v10  ;;  %4637 = vmatpush.bf16.msra.mxu1 %v7383_v14  ;;  %v9097_v10 = vld [vmem:[#allocation6 + $0x98c] sm:$0xf]  ;;  %v7332_v14 = vld [vmem:[#allocation6 + $0x998] sm:$0xf0] }
 0x2df   :  { %v7335_v12 = vor.u32 %v9097_v10, %v7332_v14  ;;  %v9093_v25 = vld [vmem:[#allocation6 + $0x96c] sm:$0xf]  ;;  %v7460_v35 = vld [vmem:[#allocation6 + $0xa98] sm:$0xf0] }
 0x2e0   :  { %4602 = vmatpush.bf16.msrb.mxu2 %v6887_v2  ;;  %4616 = vmatpush.bf16.msrb.mxu3 %v7015_v4  ;;  %v9129_v33 = vld [vmem:[#allocation6 + $0xa8c] sm:$0xf]  ;;  %v10105_v2 = vpop.f32.mrf.mxu1  ;;  %v7172_v59 = vld [vmem:[#allocation6 + $0x858] sm:$0xf0] }
 0x2e1   :  { %v9057_v4 = vld [vmem:[#allocation6 + $0x84c] sm:$0xf]  ;;  %v7300_v5 = vld [vmem:[#allocation6 + $0x958] sm:$0xf0] }
 0x2e2   :  { %4624 = vmatpush.bf16.msra.mxu0 %v7239_v61  ;;  %4638 = vmatpush.bf16.msra.mxu1 %v7367_v8  ;;  %v9161_v61 = vld [vmem:[#allocation6 + $0xb8c] sm:$0xf]  ;;  %v7588_v8 = vld [vmem:[#allocation6 + $0xb98] sm:$0xf0]  ;;  %v10107_v50 = vpop.f32.mrf.mxu0  ;;  %v7175_v58 = vor.u32 %v9057_v4, %v7172_v59 }
 0x2e3   :  { %4603 = vmatmul.bf16.vlgmr.msrb.gmra.mxu2 %v9927_v44  ;;  %4617 = vmatmul.bf16.vlgmr.msrb.gmra.mxu3 %v9929_v46  ;;  %v7191_v44 = vor.u32 %v9061_v53, %v7188_v54  ;;  %v7319_v46 = vor.u32 %v9093_v25, %v7316_v29  ;;  %v9089_v9 = vld [vmem:[#allocation6 + $0x94c] sm:$0xf]  ;;  %v7444_v38 = vld [vmem:[#allocation6 + $0xa78] sm:$0xf0] }
 0x2e4   :  { %4651 = vmatpush.bf16.msra.mxu2 %v7511_v51  ;;  %4665 = vmatpush.bf16.msra.mxu3 %v7639_v49  ;;  %v7463_v51 = vor.u32 %v9129_v33, %v7460_v35  ;;  %v7591_v49 = vor.u32 %v9161_v61, %v7588_v8  ;;  %v9125_v62 = vld [vmem:[#allocation6 + $0xa6c] sm:$0xf]  ;;  %v7572_v23 = vld [vmem:[#allocation6 + $0xb78] sm:$0xf0]  ;;  %v7303_v32 = vor.u32 %v9089_v9, %v7300_v5 }
 0x2e5   :  { %v9157_v22 = vld [vmem:[#allocation6 + $0xb6c] sm:$0xf]  ;;  %v7447_v10 = vor.u32 %v9125_v62, %v7444_v38  ;;  %v7284_v55 = vld [vmem:[#allocation6 + $0x938] sm:$0xf0] }
 0x2e6   :  { %4625 = vmatpush.bf16.msra.mxu0 %v7223_v1  ;;  %4639 = vmatpush.bf16.msra.mxu1 %v7351_v6  ;;  %v10109_v1 = vpop.f32.mrf.mxu2  ;;  %v10111_v6 = vpop.f32.mrf.mxu3  ;;  %v7575_v14 = vor.u32 %v9157_v22, %v7572_v23  ;;  %v9085_v15 = vld [vmem:[#allocation6 + $0x92c] sm:$0xf]  ;;  %v7428_v43 = vld [vmem:[#allocation6 + $0xa58] sm:$0xf0] }
 0x2e7   :  { %10317 = vst [vmem:[#allocation34_spill] sm:$0xff] %v10111_v6  ;;  %v9121_v11 = vld [vmem:[#allocation6 + $0xa4c] sm:$0xf]  ;;  %v7140_v25 = vld [vmem:[#allocation6 + $0x818] sm:$0xf0] }
 0x2e8   :  { %4652 = vmatpush.bf16.msra.mxu2 %v7495_v3  ;;  %4666 = vmatpush.bf16.msra.mxu3 %v7623_v26  ;;  %v9053_v3 = vld [vmem:[#allocation6 + $0x82c] sm:$0xf]  ;;  %v7156_v26 = vld [vmem:[#allocation6 + $0x838] sm:$0xf0]  ;;  %v10113_v53 = vpop.f32.mrf.mxu1  ;;  %v7431_v33 = vor.u32 %v9121_v11, %v7428_v43 }
 0x2e9   :  { %v7159_v54 = vor.u32 %v9053_v3, %v7156_v26  ;;  %v9081_v29 = vld [vmem:[#allocation6 + $0x90c] sm:$0xf]  ;;  %v7268_v61 = vld [vmem:[#allocation6 + $0x918] sm:$0xf0] }
 0x2ea   :  { %4626 = vmatpush.bf16.msra.mxu0 %v7207_v34  ;;  %4640 = vmatpush.bf16.msra.mxu1 %v7335_v12  ;;  %v9153_v34 = vld [vmem:[#allocation6 + $0xb4c] sm:$0xf]  ;;  %v7556_v12 = vld [vmem:[#allocation6 + $0xb58] sm:$0xf0]  ;;  %v10118_v9 = vpop.f32.mrf.mxu0 }
 0x2eb   :  { %v7559_v35 = vor.u32 %v9153_v34, %v7556_v12  ;;  %v9205_v8 = vld [vmem:[#allocation6 + $0xcec] sm:$0xf]  ;;  %v7892_v4 = vld [vmem:[#allocation6 + $0xdf8] sm:$0xf0] }
 0x2ec   :  { %4653 = vmatpush.bf16.msra.mxu2 %v7479_v7  ;;  %4667 = vmatpush.bf16.msra.mxu3 %v7607_v40  ;;  %v7287_v7 = vor.u32 %v9085_v15, %v7284_v55  ;;  %v9049_v40 = vld [vmem:[#allocation6 + $0x80c] sm:$0xf]  ;;  %v7412_v5 = vld [vmem:[#allocation6 + $0xa38] sm:$0xf0] }
 0x2ed   :  { %v9117_v59 = vld [vmem:[#allocation6 + $0xa2c] sm:$0xf]  ;;  %v7540_v38 = vld [vmem:[#allocation6 + $0xb38] sm:$0xf0] }
 0x2ee   :  { %4627 = vmatpush.bf16.msra.mxu0 %v7191_v44  ;;  %4641 = vmatpush.bf16.msra.mxu1 %v7319_v46  ;;  %v7764_v44 = vld [vmem:[#allocation6 + $0xcf8] sm:$0xf0]  ;;  %v9237_v46 = vld [vmem:[#allocation6 + $0xdec] sm:$0xf]  ;;  %v10120_v22 = vpop.f32.mrf.mxu2  ;;  %v10122_v23 = vpop.f32.mrf.mxu3  ;;  %v7415_v15 = vor.u32 %v9117_v59, %v7412_v5 }
 0x2ef   :  { %v9149_v62 = vld [vmem:[#allocation6 + $0xb2c] sm:$0xf]  ;;  %v7767_v3 = vor.u32 %v9205_v8, %v7764_v44  ;;  %v7895_v26 = vor.u32 %v9237_v46, %v7892_v4  ;;  %v7876_v11 = vld [vmem:[#allocation6 + $0xdd8] sm:$0xf0]  ;;  %v10319_v4 = vperm.slane %v9987_v47, 1 }
 0x2f0   :  { %4654 = vmatpush.bf16.msra.mxu2 %v7463_v51  ;;  %4668 = vmatpush.bf16.msra.mxu3 %v7591_v49  ;;  %v10318_v51 = vperm.slane %v9987_v47, 0  ;;  %v7543_v55 = vor.u32 %v9149_v62, %v7540_v38  ;;  %v9113_v43 = vld [vmem:[#allocation6 + $0xa0c] sm:$0xf]  ;;  %v7396_v34 = vld [vmem:[#allocation6 + $0xa18] sm:$0xf0] }
 0x2f1   :  { %v7524_v6 = vld [vmem:[#allocation6 + $0xb18] sm:$0xf0]  ;;  %v7399_v8 = vor.u32 %v9113_v43, %v7396_v34  ;;  %v9197_v44 = vld [vmem:[#allocation6 + $0xcac] sm:$0xf]  ;;  %v4075_v59 = vadd.f32 %v10050_v39, %v10319_v4 }
 0x2f2   :  { %4628 = vmatpush.bf16.msra.mxu0 %v7175_v58  ;;  %4642 = vmatpush.bf16.msra.mxu1 %v7303_v32  ;;  %v3851_v49 = vadd.f32 %v9996_v19, %v10318_v51  ;;  %v7143_v58 = vor.u32 %v9049_v40, %v7140_v25  ;;  %v7271_v32 = vor.u32 %v9081_v29, %v7268_v61  ;;  %v9233_v19 = vld [vmem:[#allocation6 + $0xdcc] sm:$0xf]  ;;  %v8148_v25 = vld [vmem:[#allocation6 + $0xff8] sm:$0xf0]  ;;  %v10126_v61 = vpop.f32.mrf.mxu1 }
 0x2f3   :  { %v9145_v51 = vld [vmem:[#allocation6 + $0xb0c] sm:$0xf]  ;;  %v7732_v46 = vld [vmem:[#allocation6 + $0xcb8] sm:$0xf0] }
 0x2f4   :  { %4655 = vmatpush.bf16.msra.mxu2 %v7447_v10  ;;  %4669 = vmatpush.bf16.msra.mxu3 %v7575_v14  ;;  %v9201_v10 = vld [vmem:[#allocation6 + $0xccc] sm:$0xf]  ;;  %v7748_v14 = vld [vmem:[#allocation6 + $0xcd8] sm:$0xf0]  ;;  %v3865_v12 = vadd.f32 %v9998_v20, %v3851_v49  ;;  %v7527_v20 = vor.u32 %v9145_v51, %v7524_v6  ;;  %v10131_v49 = vpop.f32.mrf.mxu0 }
 0x2f5   :  { %v9301_v40 = vld [vmem:[#allocation6 + $0xfec] sm:$0xf]  ;;  %v7860_v38 = vld [vmem:[#allocation6 + $0xdb8] sm:$0xf0] }
 0x2f6   :  { %4629 = vmatpush.bf16.msra.mxu0 %v7159_v54  ;;  %4643 = vmatpush.bf16.msra.mxu1 %v7287_v7  ;;  %v9269_v54 = vld [vmem:[#allocation6 + $0xeec] sm:$0xf]  ;;  %v8020_v7 = vld [vmem:[#allocation6 + $0xef8] sm:$0xf0]  ;;  %v3879_v29 = vadd.f32 %v10000_v30, %v3865_v12  ;;  %v8151_v5 = vor.u32 %v9301_v40, %v8148_v25  ;;  %v10136_v47 = vpop.f32.mrf.mxu2  ;;  %v10138_v39 = vpop.f32.mrf.mxu3  ;;  %v9477_v40 = vld [vmem:[#allocation7] sm:$0xf] }
 0x2f7   :  { %v8023_v30 = vor.u32 %v9269_v54, %v8020_v7  ;;  %v9229_v62 = vld [vmem:[#allocation6 + $0xdac] sm:$0xf]  ;;  %v8132_v6 = vld [vmem:[#allocation6 + $0xfd8] sm:$0xf0] }
 0x2f8   :  { %4656 = vmatpush.bf16.msra.mxu2 %v7431_v33  ;;  %4670 = vmatpush.bf16.msra.mxu3 %v7559_v35  ;;  %v7751_v33 = vor.u32 %v9201_v10, %v7748_v14  ;;  %v7879_v35 = vor.u32 %v9233_v19, %v7876_v11  ;;  %v9193_v10 = vld [vmem:[#allocation6 + $0xc8c] sm:$0xf]  ;;  %v7716_v14 = vld [vmem:[#allocation6 + $0xc98] sm:$0xf0]  ;;  %v4089_v19 = vadd.f32 %v10052_v31, %v4075_v59  ;;  %v1273_v31 = vperm.slane %v9477_v40, 2 }
 0x2f9   :  { %v9225_v11 = vld [vmem:[#allocation6 + $0xd8c] sm:$0xf]  ;;  %v7988_v34 = vld [vmem:[#allocation6 + $0xeb8] sm:$0xf0] }
 0x2fa   :  { %4630 = vmatpush.bf16.msra.mxu0 %v7143_v58  ;;  %4644 = vmatpush.bf16.msra.mxu1 %v7271_v32  ;;  %v9265_v58 = vld [vmem:[#allocation6 + $0xecc] sm:$0xf]  ;;  %v8004_v32 = vld [vmem:[#allocation6 + $0xed8] sm:$0xf0]  ;;  %v4103_v7 = vadd.f32 %v10059_v27, %v4089_v19  ;;  %v10145_v25 = vpop.f32.mrf.mxu1 }
 0x2fb   :  { %v9261_v43 = vld [vmem:[#allocation6 + $0xeac] sm:$0xf]  ;;  %v8116_v51 = vld [vmem:[#allocation6 + $0xfb8] sm:$0xf0] }
 0x2fc   :  { %4657 = vmatpush.bf16.msra.mxu2 %v7415_v15  ;;  %4671 = vmatpush.bf16.msra.mxu3 %v7543_v55  ;;  %v8007_v15 = vor.u32 %v9265_v58, %v8004_v32  ;;  %v9293_v12 = vld [vmem:[#allocation6 + $0xfac] sm:$0xf]  ;;  %v7828_v27 = vld [vmem:[#allocation6 + $0xd78] sm:$0xf0] }
 0x2fd   :  { %4631 = vmatmul.bf16.vlgmr.msra.gmra.mxu0 %v9943_v36  ;;  %4645 = vmatmul.bf16.vlgmr.msra.gmra.mxu1 %v9945_v37  ;;  %v7735_v36 = vor.u32 %v9197_v44, %v7732_v46  ;;  %v7863_v37 = vor.u32 %v9229_v62, %v7860_v38  ;;  %v9221_v44 = vld [vmem:[#allocation6 + $0xd6c] sm:$0xf]  ;;  %v4297_v62 = vadd.f32 %v10107_v50, %v1273_v31  ;;  %v7956_v50 = vld [vmem:[#allocation6 + $0xe78] sm:$0xf0] }
 0x2fe   :  { %4679 = vmatpush.bf16.msrb.mxu0 %v7767_v3  ;;  %4693 = vmatpush.bf16.msrb.mxu1 %v7895_v26  ;;  %v9297_v3 = vld [vmem:[#allocation6 + $0xfcc] sm:$0xf]  ;;  %v3893_v26 = vadd.f32 %v10002_v48, %v3879_v29  ;;  %v7844_v48 = vld [vmem:[#allocation6 + $0xd98] sm:$0xf0]  ;;  %v7719_v29 = vor.u32 %v9193_v10, %v7716_v14  ;;  %v10152_v38 = vpop.f32.mrf.mxu2  ;;  %v10154_v58 = vpop.f32.mrf.mxu3 }
 0x2ff   :  { %v8135_v55 = vor.u32 %v9297_v3, %v8132_v6  ;;  %v9257_v46 = vld [vmem:[#allocation6 + $0xe8c] sm:$0xf]  ;;  %v7831_v3 = vor.u32 %v9221_v44, %v7828_v27  ;;  %v7812_v10 = vld [vmem:[#allocation6 + $0xd58] sm:$0xf0] }
 0x300   :  { %4658 = vmatpush.bf16.msra.mxu2 %v7399_v8  ;;  %4672 = vmatpush.bf16.msra.mxu3 %v7527_v20  ;;  %v3907_v54 = vadd.f32 %v10004_v24, %v3893_v26  ;;  %v7700_v8 = vld [vmem:[#allocation6 + $0xc78] sm:$0xf0]  ;;  %v7991_v20 = vor.u32 %v9261_v43, %v7988_v34  ;;  %v8119_v24 = vor.u32 %v9293_v12, %v8116_v51  ;;  %v9289_v4 = vld [vmem:[#allocation6 + $0xf8c] sm:$0xf] }
 0x301   :  { %v9185_v6 = vld [vmem:[#allocation6 + $0xc4c] sm:$0xf]  ;;  %v7684_v26 = vld [vmem:[#allocation6 + $0xc58] sm:$0xf0] }
 0x302   :  { %4680 = vmatpush.bf16.msrb.mxu0 %v7751_v33  ;;  %4694 = vmatpush.bf16.msrb.mxu1 %v7879_v35  ;;  %v7847_v33 = vor.u32 %v9225_v11, %v7844_v48  ;;  %v9189_v35 = vld [vmem:[#allocation6 + $0xc6c] sm:$0xf]  ;;  %v3921_v59 = vadd.f32 %v10006_v56, %v3907_v54  ;;  %v4299_v11 = vadd.f32 %v10118_v9, %v1273_v31  ;;  %v7668_v12 = vld [vmem:[#allocation6 + $0xc38] sm:$0xf0]  ;;  %v10162_v9 = vpop.f32.mrf.mxu1 }
 0x303   :  { %4659 = vmatmul.bf16.vlgmr.msra.gmra.mxu2 %v9949_v13  ;;  %4673 = vmatmul.bf16.vlgmr.msra.gmra.mxu3 %v9951_v16  ;;  %v7972_v13 = vld [vmem:[#allocation6 + $0xe98] sm:$0xf0]  ;;  %v7703_v32 = vor.u32 %v9189_v35, %v7700_v8  ;;  %v9253_v14 = vld [vmem:[#allocation6 + $0xe6c] sm:$0xf]  ;;  %v4311_v48 = vadd.f32 %v10113_v53, %v4297_v62  ;;  %v7687_v43 = vor.u32 %v9185_v6, %v7684_v26  ;;  %v8266_v62 = vld [vmem:[#allocation9 + $0xe0] sm:$0xf] }
 0x304   :  { %4707 = vmatpush.bf16.msrb.mxu2 %v8023_v30  ;;  %4721 = vmatpush.bf16.msrb.mxu3 %v8151_v5  ;;  %v8100_v16 = vld [vmem:[#allocation6 + $0xf98] sm:$0xf0]  ;;  %v4117_v30 = vadd.f32 %v10061_v42, %v4103_v7  ;;  %v10149_v5 = vpop.f32.mrf.mxu0  ;;  %v7975_v56 = vor.u32 %v9257_v46, %v7972_v13  ;;  %v9285_v19 = vld [vmem:[#allocation6 + $0xf6c] sm:$0xf]  ;;  %v7959_v54 = vor.u32 %v9253_v14, %v7956_v50  ;;  %v8394_v26 = vld [vmem:[#allocation9 + $0x1e0] sm:$0xf] }
 0x305   :  { %v8103_v42 = vor.u32 %v9289_v4, %v8100_v16  ;;  %v9181_v34 = vld [vmem:[#allocation6 + $0xc2c] sm:$0xf]  ;;  %v7940_v53 = vld [vmem:[#allocation6 + $0xe58] sm:$0xf0] }
 0x306   :  { %4681 = vmatpush.bf16.msrb.mxu0 %v7735_v36  ;;  %4695 = vmatpush.bf16.msrb.mxu1 %v7863_v37  ;;  %v4131_v36 = vadd.f32 %v10065_v52, %v4117_v30  ;;  %v9217_v37 = vld [vmem:[#allocation6 + $0xd4c] sm:$0xf]  ;;  %v8068_v35 = vld [vmem:[#allocation6 + $0xf58] sm:$0xf0]  ;;  %v7671_v27 = vor.u32 %v9181_v34, %v7668_v12  ;;  %v10173_v6 = vpop.f32.mrf.mxu3  ;;  %v9330_v34 = vld [vmem:[#allocation9 + $0xcc] sm:$0xf0] }
 0x307   :  { %v7815_v52 = vor.u32 %v9217_v37, %v7812_v10  ;;  %v9213_v40 = vld [vmem:[#allocation6 + $0xd2c] sm:$0xf]  ;;  %v7652_v4 = vld [vmem:[#allocation6 + $0xc18] sm:$0xf0] }
 0x308   :  { %4708 = vmatpush.bf16.msrb.mxu2 %v8007_v15  ;;  %4722 = vmatpush.bf16.msrb.mxu3 %v8135_v55  ;;  %v8084_v15 = vld [vmem:[#allocation6 + $0xf78] sm:$0xf0]  ;;  %v3935_v55 = vadd.f32 %v10012_v63, %v3921_v59  ;;  %v4145_v51 = vadd.f32 %v10067_v60, %v4131_v36  ;;  %v4325_v63 = vadd.f32 %v10120_v22, %v4311_v48  ;;  %v9281_v31 = vld [vmem:[#allocation6 + $0xf4c] sm:$0xf]  ;;  %v9366_v36 = vld [vmem:[#allocation9 + $0x1ec] sm:$0xf0] }
 0x309   :  { %v8087_v7 = vor.u32 %v9285_v19, %v8084_v15  ;;  %v4313_v60 = vadd.f32 %v10126_v61, %v4299_v11  ;;  %v9177_v13 = vld [vmem:[#allocation6 + $0xc0c] sm:$0xf]  ;;  %v8071_v30 = vor.u32 %v9281_v31, %v8068_v35  ;;  %v7924_v14 = vld [vmem:[#allocation6 + $0xe38] sm:$0xf0]  ;;  %v8522_v35 = vld [vmem:[#allocation9 + $0x2e0] sm:$0xf] }
 0x30a   :  { %4682 = vmatpush.bf16.msrb.mxu0 %v7719_v29  ;;  %4696 = vmatpush.bf16.msrb.mxu1 %v7847_v33  ;;  %v7796_v29 = vld [vmem:[#allocation6 + $0xd38] sm:$0xf0]  ;;  %v9249_v33 = vld [vmem:[#allocation6 + $0xe4c] sm:$0xf]  ;;  %v3949_v8 = vadd.f32 %v10014_v0, %v3935_v55  ;;  %v4339_v61 = vadd.f32 %v10122_v23, %v4325_v63  ;;  %v7655_v55 = vor.u32 %v9177_v13, %v7652_v4  ;;  %v10179_v12 = vpop.f32.mrf.mxu1 }
 0x30b   :  { %v7799_v46 = vor.u32 %v9213_v40, %v7796_v29  ;;  %v9209_v22 = vld [vmem:[#allocation6 + $0xd0c] sm:$0xf]  ;;  %v4327_v16 = vadd.f32 %v10136_v47, %v4313_v60  ;;  %v7943_v59 = vor.u32 %v9249_v33, %v7940_v53  ;;  %v7780_v0 = vld [vmem:[#allocation6 + $0xd18] sm:$0xf0]  ;;  %v9362_v40 = vld [vmem:[#allocation9 + $0x1cc] sm:$0xf0] }
 0x30c   :  { %4709 = vmatpush.bf16.msrb.mxu2 %v7991_v20  ;;  %4723 = vmatpush.bf16.msrb.mxu3 %v8119_v24  ;;  %v10320_v20 = vld [vmem:[#allocation31_spill] sm:$0xff]  ;;  %v10167_v44 = vpop.f32.mrf.mxu0  ;;  %v10322_v10 = vld [vmem:[#allocation32_spill] sm:$0xff]  ;;  %v8052_v19 = vld [vmem:[#allocation6 + $0xf38] sm:$0xf0]  ;;  %v4353_v15 = vadd.f32 %v10131_v49, %v4339_v61  ;;  %v7783_v23 = vor.u32 %v9209_v22, %v7780_v0 }
 0x30d   :  { %v4159_v24 = vadd.f32 %v10320_v20, %v4145_v51  ;;  %v9277_v50 = vld [vmem:[#allocation6 + $0xf2c] sm:$0xf]  ;;  %v4341_v11 = vadd.f32 %v10138_v39, %v4327_v16  ;;  %v7908_v63 = vld [vmem:[#allocation6 + $0xe18] sm:$0xf0]  ;;  %v10323_v20 = vld [vmem:[#allocation23_spill] sm:$0xff] }
 0x30e   :  { %4683 = vmatpush.bf16.msrb.mxu0 %v7703_v32  ;;  %4697 = vmatpush.bf16.msrb.mxu1 %v7831_v3  ;;  %v9334_v32 = vld [vmem:[#allocation9 + $0xec] sm:$0xf0]  ;;  %v10171_v3 = vpop.f32.mrf.mxu2  ;;  %v9241_v29 = vld [vmem:[#allocation6 + $0xe0c] sm:$0xf]  ;;  %v8036_v39 = vld [vmem:[#allocation6 + $0xf18] sm:$0xf0]  ;;  %v4367_v31 = vadd.f32 %v10145_v25, %v4353_v15 }
 0x30f   :  { %v4173_v47 = vadd.f32 %v10322_v10, %v4159_v24  ;;  %v8267_v48 = vor.u32 %v9334_v32, %v8266_v62  ;;  %v4355_v33 = vadd.f32 %v10149_v5, %v4341_v11  ;;  %v9273_v53 = vld [vmem:[#allocation6 + $0xf0c] sm:$0xf]  ;;  %v10186_v5 = vpop.f32.mrf.mxu3  ;;  %v7911_v4 = vor.u32 %v9241_v29, %v7908_v63  ;;  %v8234_v22 = vld [vmem:[#allocation9 + $0xa0] sm:$0xf]  ;;  %v9326_v0 = vld [vmem:[#allocation9 + $0xac] sm:$0xf0] }
 0x310   :  { %4710 = vmatpush.bf16.msrb.mxu2 %v7975_v56  ;;  %4724 = vmatpush.bf16.msrb.mxu3 %v8103_v42  ;;  %v9245_v56 = vld [vmem:[#allocation6 + $0xe2c] sm:$0xf]  ;;  %v10321_v42 = vld [vmem:[#allocation22_spill] sm:$0xff]  ;;  %v8039_v25 = vor.u32 %v9273_v53, %v8036_v39  ;;  %v8362_v62 = vld [vmem:[#allocation9 + $0x1a0] sm:$0xf] }
 0x311   :  { %v3963_v37 = vadd.f32 %v10321_v42, %v3949_v8  ;;  %v7927_v51 = vor.u32 %v9245_v56, %v7924_v14  ;;  %v4187_v49 = vadd.f32 %v10080_v45, %v4173_v47  ;;  %v9398_v8 = vld [vmem:[#allocation9 + $0x2ec] sm:$0xf0]  ;;  %v4381_v45 = vadd.f32 %v10152_v38, %v4367_v31  ;;  %v8506_v32 = vld [vmem:[#allocation9 + $0x2c0] sm:$0xf]  ;;  %v10326_v11 = vld [vmem:[#allocation20_spill] sm:$0xff] }
 0x312   :  { %4684 = vmatpush.bf16.msrb.mxu0 %v7687_v43  ;;  %4698 = vmatpush.bf16.msrb.mxu1 %v7815_v52  ;;  %v8395_v43 = vor.u32 %v9366_v36, %v8394_v26  ;;  %v8250_v52 = vld [vmem:[#allocation9 + $0xc0] sm:$0xf]  ;;  %v9358_v38 = vld [vmem:[#allocation9 + $0x1ac] sm:$0xf0]  ;;  %v10324_v26 = vld [vmem:[#allocation24_spill] sm:$0xff] }
 0x313   :  { %v3977_v24 = vadd.f32 %v10323_v20, %v3963_v37  ;;  %v4201_v16 = vadd.f32 %v10082_v21, %v4187_v49  ;;  %v9394_v61 = vld [vmem:[#allocation9 + $0x2cc] sm:$0xf0]  ;;  %v4395_v21 = vadd.f32 %v10154_v58, %v4381_v45  ;;  %v8346_v47 = vld [vmem:[#allocation9 + $0x180] sm:$0xf] }
 0x314   :  { %4711 = vmatpush.bf16.msrb.mxu2 %v7959_v54  ;;  %4725 = vmatpush.bf16.msrb.mxu3 %v8087_v7  ;;  %v8055_v54 = vor.u32 %v9277_v50, %v8052_v19  ;;  %v8378_v7 = vld [vmem:[#allocation9 + $0x1c0] sm:$0xf]  ;;  %v4410_v60 = vpop.f32.mrf.mxu0  ;;  %v8507_v37 = vor.u32 %v9394_v61, %v8506_v32  ;;  %v9322_v10 = vld [vmem:[#allocation9 + $0x8c] sm:$0xf0]  ;;  %v4424_v19 = vpop.f32.mrf.mxu1 }
 0x315   :  { %v3991_v36 = vadd.f32 %v10324_v26, %v3977_v24  ;;  %v4215_v56 = vadd.f32 %v10089_v41, %v4201_v16  ;;  %v9354_v14 = vld [vmem:[#allocation9 + $0x18c] sm:$0xf0]  ;;  %v4409_v50 = vadd.f32 %v10167_v44, %v4395_v21  ;;  %v8490_v41 = vld [vmem:[#allocation9 + $0x2a0] sm:$0xf] }
 0x316   :  { %4685 = vmatpush.bf16.msrb.mxu0 %v7671_v27  ;;  %4699 = vmatpush.bf16.msrb.mxu1 %v7799_v46  ;;  %v8251_v27 = vor.u32 %v9330_v34, %v8250_v52  ;;  %v8379_v46 = vor.u32 %v9362_v40, %v8378_v7  ;;  %v4436_v13 = vpop.f32.mrf.mxu2  ;;  %v9390_v15 = vld [vmem:[#allocation9 + $0x2ac] sm:$0xf0]  ;;  %v8347_v34 = vor.u32 %v9354_v14, %v8346_v47  ;;  %v10328_v44 = vld [vmem:[#allocation27_spill] sm:$0xff] }
 0x317   :  { %v8491_v29 = vor.u32 %v9390_v15, %v8490_v41  ;;  %v8330_v49 = vld [vmem:[#allocation9 + $0x160] sm:$0xf]  ;;  %v4452_v53 = vpop.f32.mrf.mxu3  ;;  %v9386_v31 = vld [vmem:[#allocation9 + $0x28c] sm:$0xf0] }
 0x318   :  { %4712 = vmatpush.bf16.msrb.mxu2 %v7943_v59  ;;  %4726 = vmatpush.bf16.msrb.mxu3 %v8071_v30  ;;  %v4369_v59 = vadd.f32 %v10162_v9, %v4355_v33  ;;  %v8523_v30 = vor.u32 %v9398_v8, %v8522_v35  ;;  %v8218_v9 = vld [vmem:[#allocation9 + $0x80] sm:$0xf]  ;;  %v4423_v33 = vadd.f32 %v10179_v12, %v4409_v50  ;;  %v9346_v12 = vld [vmem:[#allocation9 + $0x14c] sm:$0xf0] }
 0x319   :  { %v8219_v52 = vor.u32 %v9322_v10, %v8218_v9  ;;  %v8474_v39 = vld [vmem:[#allocation9 + $0x280] sm:$0xf]  ;;  %v9342_v21 = vld [vmem:[#allocation9 + $0x12c] sm:$0xf0] }
 0x31a   :  { %4686 = vmatpush.bf16.msrb.mxu0 %v7655_v55  ;;  %4700 = vmatpush.bf16.msrb.mxu1 %v7783_v23  ;;  %v4383_v42 = vadd.f32 %v10171_v3, %v4369_v59  ;;  %v10325_v3 = vld [vmem:[#allocation25_spill] sm:$0xff]  ;;  %v4229_v23 = vadd.f32 %v10091_v28, %v4215_v56  ;;  %v4437_v35 = vadd.f32 %v4436_v13, %v4423_v33  ;;  %v8186_v24 = vld [vmem:[#allocation9 + $0x40] sm:$0xf] }
 0x31b   :  { %v4005_v55 = vadd.f32 %v10325_v3, %v3991_v36  ;;  %v9318_v28 = vld [vmem:[#allocation9 + $0x6c] sm:$0xf0]  ;;  %v8475_v45 = vor.u32 %v9386_v31, %v8474_v39  ;;  %v8458_v16 = vld [vmem:[#allocation9 + $0x260] sm:$0xf] }
 0x31c   :  { %4713 = vmatpush.bf16.msrb.mxu2 %v7927_v51  ;;  %4727 = vmatpush.bf16.msrb.mxu3 %v8055_v54  ;;  %v4397_v58 = vadd.f32 %v10173_v6, %v4383_v42  ;;  %v8202_v51 = vld [vmem:[#allocation9 + $0x60] sm:$0xf]  ;;  %v4243_v7 = vadd.f32 %v10101_v57, %v4229_v23  ;;  %v9350_v6 = vld [vmem:[#allocation9 + $0x16c] sm:$0xf0] }
 0x31d   :  { %4687 = vmatmul.bf16.vlgmr.msrb.gmra.mxu0 %v9971_v17  ;;  %4701 = vmatmul.bf16.vlgmr.msrb.gmra.mxu1 %v9973_v18  ;;  %v8235_v17 = vor.u32 %v9326_v0, %v8234_v22  ;;  %v8363_v18 = vor.u32 %v9358_v38, %v8362_v62  ;;  %v4019_v54 = vadd.f32 %v10328_v44, %v4005_v55  ;;  %v4478_v22 = vpop.f32.mrf.mxu1  ;;  %v9382_v59 = vld [vmem:[#allocation9 + $0x26c] sm:$0xf0]  ;;  %v8170_v61 = vld [vmem:[#allocation9 + $0x20] sm:$0xf]  ;;  %v10333_v44 = vld [vmem:[#allocation26_spill] sm:$0xff] }
 0x31e   :  { %5525 = vmatpush.bf16.msra.mxu0 %v8267_v48  ;;  %5539 = vmatpush.bf16.msra.mxu1 %v8395_v43  ;;  %v10327_v48 = vld [vmem:[#allocation21_spill] sm:$0xff]  ;;  %v4464_v43 = vpop.f32.mrf.mxu0  ;;  %v4411_v40 = vadd.f32 %v4410_v60, %v4397_v58  ;;  %v4438_v63 = vpop.f32.mrf.mxu2  ;;  %v8203_v8 = vor.u32 %v9318_v28, %v8202_v51  ;;  %v8331_v20 = vor.u32 %v9350_v6, %v8330_v49  ;;  %v8298_v42 = vld [vmem:[#allocation9 + $0x120] sm:$0xf] }
 0x31f   :  { %v4257_v60 = vadd.f32 %v10105_v2, %v4243_v7  ;;  %v4451_v38 = vadd.f32 %v10186_v5, %v4437_v35  ;;  %v8459_v36 = vor.u32 %v9382_v59, %v8458_v16  ;;  %v9310_v56 = vld [vmem:[#allocation9 + $0x2c] sm:$0xf0]  ;;  %v10332_v5 = vld [vmem:[#allocation34_spill] sm:$0xff]  ;;  %v8299_v41 = vor.u32 %v9342_v21, %v8298_v42  ;;  %v8154_v15 = vld [vmem:[#allocation9] sm:$0xf] }
 0x320   :  { %4714 = vmatpush.bf16.msrb.mxu2 %v7911_v4  ;;  %4728 = vmatpush.bf16.msrb.mxu3 %v8039_v25  ;;  %v9314_v4 = vld [vmem:[#allocation9 + $0x4c] sm:$0xf0]  ;;  %v8314_v25 = vld [vmem:[#allocation9 + $0x140] sm:$0xf]  ;;  %v8396_v51 = vld [vmem:[#allocation9 + $0x1f0] sm:$0xf0] }
 0x321   :  { %v4271_v0 = vadd.f32 %v10109_v1, %v4257_v60  ;;  %v8187_v32 = vor.u32 %v9314_v4, %v8186_v24  ;;  %v8315_v2 = vor.u32 %v9346_v12, %v8314_v25  ;;  %v9378_v10 = vld [vmem:[#allocation9 + $0x24c] sm:$0xf0]  ;;  %v10331_v1 = vld [vmem:[#allocation30_spill] sm:$0xff]  ;;  %v8282_v58 = vld [vmem:[#allocation9 + $0x100] sm:$0xf] }
 0x322   :  { %5526 = vmatpush.bf16.msra.mxu0 %v8251_v27  ;;  %5540 = vmatpush.bf16.msra.mxu1 %v8379_v46  ;;  %v10329_v27 = vld [vmem:[#allocation28_spill] sm:$0xff]  ;;  %v4425_v46 = vadd.f32 %v4424_v19, %v4411_v40  ;;  %v8171_v19 = vor.u32 %v9310_v56, %v8170_v61  ;;  %v9306_v3 = vld [vmem:[#allocation9 + $0xc] sm:$0xf0]  ;;  %v8426_v40 = vld [vmem:[#allocation9 + $0x220] sm:$0xf] }
 0x323   :  { %4715 = vmatmul.bf16.vlgmr.msrb.gmra.mxu2 %v10326_v11  ;;  %4729 = vmatmul.bf16.vlgmr.msrb.gmra.mxu3 %v10327_v48  ;;  %v4033_v57 = vadd.f32 %v10329_v27, %v4019_v54  ;;  %v4285_v50 = vadd.f32 %v10332_v5, %v4271_v0  ;;  %v9338_v11 = vld [vmem:[#allocation9 + $0x10c] sm:$0xf0]  ;;  %v9332_v48 = vld [vmem:[#allocation9 + $0xe4] sm:$0xf]  ;;  %v4735_v54 = vmax.f32 %v10333_v44, 0.0  ;;  %v8155_v33 = vor.u32 %v9306_v3, %v8154_v15 }
 0x324   :  { %5553 = vmatpush.bf16.msra.mxu2 %v8523_v30  ;;  %v10330_v30 = vld [vmem:[#allocation29_spill] sm:$0xff]  ;;  %v4439_v62 = vadd.f32 %v4438_v63, %v4425_v46  ;;  %v8283_v63 = vor.u32 %v9338_v11, %v8282_v58  ;;  %v9360_v60 = vld [vmem:[#allocation9 + $0x1c4] sm:$0xf]  ;;  %v8410_v4 = vld [vmem:[#allocation9 + $0x200] sm:$0xf] }
 0x325   :  { %v4047_v13 = vadd.f32 %v10330_v30, %v4033_v57  ;;  %v4740_v28 = vmax.f32 %v4285_v50, 0.0  ;;  %v4480_v49 = vpop.f32.mrf.mxu1  ;;  %v8252_v57 = vld [vmem:[#allocation9 + $0xd0] sm:$0xf0]  ;;  %v9370_v25 = vld [vmem:[#allocation9 + $0x20c] sm:$0xf0] }
 0x326   :  { %5527 = vmatpush.bf16.msra.mxu0 %v8235_v17  ;;  %5541 = vmatpush.bf16.msra.mxu1 %v8363_v18  ;;  %v4466_v26 = vpop.f32.mrf.mxu0  ;;  %v4465_v17 = vadd.f32 %v4464_v43, %v4451_v38  ;;  %v4492_v18 = vpop.f32.mrf.mxu2  ;;  %v4453_v14 = vadd.f32 %v4452_v53, %v4439_v62  ;;  %v10334_v53 = vld [vmem:[#allocation33_spill] sm:$0xff]  ;;  %v9396_v30 = vld [vmem:[#allocation9 + $0x2e4] sm:$0xf] }
 0x327   :  { %v4506_v9 = vpop.f32.mrf.mxu3  ;;  %v4061_v47 = vadd.f32 %v10331_v1, %v4047_v13  ;;  %v4736_v39 = vmax.f32 %v10334_v53, 0.0  ;;  %v8380_v46 = vld [vmem:[#allocation9 + $0x1d0] sm:$0xf0]  ;;  %v9348_v58 = vld [vmem:[#allocation9 + $0x164] sm:$0xf] }
 0x328   :  { %5554 = vmatpush.bf16.msra.mxu2 %v8507_v37  ;;  %v8442_v37 = vld [vmem:[#allocation9 + $0x240] sm:$0xf]  ;;  %v4467_v55 = vadd.f32 %v4466_v26, %v4453_v14  ;;  %v4479_v43 = vadd.f32 %v4478_v22, %v4465_v17  ;;  %v8524_v13 = vld [vmem:[#allocation9 + $0x2f0] sm:$0xf0]  ;;  %v8383_v38 = vor.u32 %v9360_v60, %v8380_v46  ;;  %v9356_v26 = vld [vmem:[#allocation9 + $0x1a4] sm:$0xf] }
 0x329   :  { %v8443_v23 = vor.u32 %v9378_v10, %v8442_v37  ;;  %v4739_v7 = vmax.f32 %v4061_v47, 0.0  ;;  %v10216_v22 = vpack.c.bf16 %v4740_v28, %v4736_v39  ;;  %v8236_v61 = vld [vmem:[#allocation9 + $0xb0] sm:$0xf0]  ;;  %v8527_v42 = vor.u32 %v9396_v30, %v8524_v13  ;;  %v9392_v17 = vld [vmem:[#allocation9 + $0x2c4] sm:$0xf] }
 0x32a   :  { %5528 = vmatpush.bf16.msra.mxu0 %v8219_v52  ;;  %5542 = vmatpush.bf16.msra.mxu1 %v8347_v34  ;;  %v8268_v52 = vld [vmem:[#allocation9 + $0xf0] sm:$0xf0]  ;;  %v9364_v34 = vld [vmem:[#allocation9 + $0x1e4] sm:$0xf]  ;;  %v4493_v6 = vadd.f32 %v4492_v18, %v4479_v43  ;;  %v4481_v31 = vadd.f32 %v4480_v49, %v4467_v55  ;;  %v9367_v30 = vld [vmem:[#allocation9 + $0x1f4] sm:$0xf0] }
 0x32b   :  { %v8271_v35 = vor.u32 %v9332_v48, %v8268_v52  ;;  %v10214_v12 = vpack.c.bf16 %v4739_v7, %v4735_v54  ;;  %v8508_v18 = vld [vmem:[#allocation9 + $0x2d0] sm:$0xf0]  ;;  %v9320_v10 = vld [vmem:[#allocation9 + $0x84] sm:$0xf] }
 0x32c   :  { %5555 = vmatpush.bf16.msra.mxu2 %v8491_v29  ;;  %v9374_v29 = vld [vmem:[#allocation9 + $0x22c] sm:$0xf0]  ;;  %v4507_v16 = vadd.f32 %v4506_v9, %v4493_v6  ;;  %v8220_v47 = vld [vmem:[#allocation9 + $0x90] sm:$0xf0]  ;;  %v9352_v14 = vld [vmem:[#allocation9 + $0x184] sm:$0xf]  ;;  %v8511_v50 = vor.u32 %v9392_v17, %v8508_v18 }
 0x32d   :  { %v8427_v24 = vor.u32 %v9374_v29, %v8426_v40  ;;  %v8348_v5 = vld [vmem:[#allocation9 + $0x190] sm:$0xf0]  ;;  %v8223_v15 = vor.u32 %v9320_v10, %v8220_v47  ;;  %v9316_v55 = vld [vmem:[#allocation9 + $0x64] sm:$0xf]  ;;  %v8530_v18 = vld [vmem:[#allocation9 + $0x2e8] sm:$0xf] }
 0x32e   :  { %5529 = vmatpush.bf16.msra.mxu0 %v8203_v8  ;;  %5543 = vmatpush.bf16.msra.mxu1 %v8331_v20  ;;  %v8399_v8 = vor.u32 %v9364_v34, %v8396_v51  ;;  %v9328_v20 = vld [vmem:[#allocation9 + $0xc4] sm:$0xf]  ;;  %v4494_v27 = vpop.f32.mrf.mxu2  ;;  %v4737_v21 = vmax.f32 %v4507_v16, 0.0  ;;  %v8351_v3 = vor.u32 %v9352_v14, %v8348_v5  ;;  %v8332_v11 = vld [vmem:[#allocation9 + $0x170] sm:$0xf0] }
 0x32f   :  { %v4508_v59 = vpop.f32.mrf.mxu3  ;;  %v8255_v62 = vor.u32 %v9328_v20, %v8252_v57  ;;  %v9384_v43 = vld [vmem:[#allocation9 + $0x284] sm:$0xf]  ;;  %v8476_v52 = vld [vmem:[#allocation9 + $0x290] sm:$0xf0]  ;;  %v8335_v51 = vor.u32 %v9348_v58, %v8332_v11  ;;  %v9335_v16 = vld [vmem:[#allocation9 + $0xf4] sm:$0xf0] }
 0x330   :  { %5556 = vmatpush.bf16.msra.mxu2 %v8475_v45  ;;  %v4495_v45 = vadd.f32 %v4494_v27, %v4481_v31  ;;  %v9312_v44 = vld [vmem:[#allocation9 + $0x44] sm:$0xf]  ;;  %v8188_v54 = vld [vmem:[#allocation9 + $0x50] sm:$0xf0]  ;;  %v8479_v29 = vor.u32 %v9384_v43, %v8476_v52  ;;  %v8242_v14 = vld [vmem:[#allocation9 + $0xa8] sm:$0xf] }
 0x331   :  { %v9344_v7 = vld [vmem:[#allocation9 + $0x144] sm:$0xf]  ;;  %v8316_v40 = vld [vmem:[#allocation9 + $0x150] sm:$0xf0]  ;;  %v8191_v6 = vor.u32 %v9312_v44, %v8188_v54  ;;  %v9327_v5 = vld [vmem:[#allocation9 + $0xb4] sm:$0xf0] }
 0x332   :  { %5530 = vmatpush.bf16.msra.mxu0 %v8187_v32  ;;  %5544 = vmatpush.bf16.msra.mxu1 %v8315_v2  ;;  %v4509_v0 = vadd.f32 %v4508_v59, %v4495_v45  ;;  %v9324_v32 = vld [vmem:[#allocation9 + $0xa4] sm:$0xf]  ;;  %v8411_v2 = vor.u32 %v9370_v25, %v8410_v4  ;;  %v8460_v49 = vld [vmem:[#allocation9 + $0x270] sm:$0xf0]  ;;  %v8274_v4 = vld [vmem:[#allocation9 + $0xe8] sm:$0xf] }
 0x333   :  { %v8239_v9 = vor.u32 %v9324_v32, %v8236_v61  ;;  %v9380_v28 = vld [vmem:[#allocation9 + $0x264] sm:$0xf]  ;;  %v8172_v53 = vld [vmem:[#allocation9 + $0x30] sm:$0xf0]  ;;  %v8402_v59 = vld [vmem:[#allocation9 + $0x1e8] sm:$0xf]  ;;  %v8275_v32 = vor.u32 %v9335_v16, %v8274_v4 }
 0x334   :  { %5557 = vmatpush.bf16.msra.mxu2 %v8459_v36  ;;  %v8364_v36 = vld [vmem:[#allocation9 + $0x1b0] sm:$0xf0]  ;;  %v4741_v56 = vmax.f32 %v4509_v0, 0.0  ;;  %v9340_v39 = vld [vmem:[#allocation9 + $0x124] sm:$0xf] }
 0x335   :  { %v8367_v37 = vor.u32 %v9356_v26, %v8364_v36  ;;  %v8300_v31 = vld [vmem:[#allocation9 + $0x130] sm:$0xf0]  ;;  %v9304_v57 = vld [vmem:[#allocation9 + $0x4] sm:$0xf]  ;;  %v8258_v61 = vld [vmem:[#allocation9 + $0xc8] sm:$0xf] }
 0x336   :  { %5531 = vmatpush.bf16.msra.mxu0 %v8171_v19  ;;  %5545 = vmatpush.bf16.msra.mxu1 %v8299_v41  ;;  %v10220_v1 = vpack.c.bf16 %v4741_v56, %v4737_v21  ;;  %v9388_v19 = vld [vmem:[#allocation9 + $0x2a4] sm:$0xf]  ;;  %v8492_v41 = vld [vmem:[#allocation9 + $0x2b0] sm:$0xf0]  ;;  %v8303_v27 = vor.u32 %v9340_v39, %v8300_v31  ;;  %v9331_v36 = vld [vmem:[#allocation9 + $0xd4] sm:$0xf0] }
 0x337   :  { %v8495_v48 = vor.u32 %v9388_v19, %v8492_v41  ;;  %v8444_v20 = vld [vmem:[#allocation9 + $0x250] sm:$0xf0]  ;;  %v9336_v46 = vld [vmem:[#allocation9 + $0x104] sm:$0xf]  ;;  %v8386_v56 = vld [vmem:[#allocation9 + $0x1c8] sm:$0xf] }
 0x338   :  { %5558 = vmatpush.bf16.msra.mxu2 %v8443_v23  ;;  %v8204_v23 = vld [vmem:[#allocation9 + $0x70] sm:$0xf0]  ;;  %v9372_v13 = vld [vmem:[#allocation9 + $0x224] sm:$0xf]  ;;  %v8370_v19 = vld [vmem:[#allocation9 + $0x1a8] sm:$0xf] }
 0x339   :  { %v8207_v34 = vor.u32 %v9316_v55, %v8204_v23  ;;  %v8156_v60 = vld [vmem:[#allocation9 + $0x10] sm:$0xf0]  ;;  %v9368_v21 = vld [vmem:[#allocation9 + $0x204] sm:$0xf]  ;;  %v9359_v41 = vld [vmem:[#allocation9 + $0x1b4] sm:$0xf0]  ;;  %v8243_v55 = vor.u32 %v9327_v5, %v8242_v14 }
 0x33a   :  { %5532 = vmatpush.bf16.msra.mxu0 %v8155_v33  ;;  %5546 = vmatpush.bf16.msra.mxu1 %v8283_v63  ;;  %v8319_v33 = vor.u32 %v9344_v7, %v8316_v40  ;;  %v9308_v63 = vld [vmem:[#allocation9 + $0x24] sm:$0xf]  ;;  %v8284_v45 = vld [vmem:[#allocation9 + $0x110] sm:$0xf0]  ;;  %v8371_v23 = vor.u32 %v9359_v41, %v8370_v19  ;;  %v8226_v58 = vld [vmem:[#allocation9 + $0x88] sm:$0xf]  ;;  %v10226_v16 = vpop.f32.mrf.mxu0  ;;  %v10228_v19 = vpop.f32.mrf.mxu1 }
 0x33b   :  { %v8428_v0 = vld [vmem:[#allocation9 + $0x230] sm:$0xf0]  ;;  %v9323_v11 = vld [vmem:[#allocation9 + $0x94] sm:$0xf0]  ;;  %v8498_v44 = vld [vmem:[#allocation9 + $0x2a8] sm:$0xf] }
 0x33c   :  { %5559 = vmatpush.bf16.msra.mxu2 %v8427_v24  ;;  %v8175_v24 = vor.u32 %v9308_v63, %v8172_v53  ;;  %v8431_v26 = vor.u32 %v9372_v13, %v8428_v0  ;;  %v8412_v17 = vld [vmem:[#allocation9 + $0x210] sm:$0xf0]  ;;  %v9355_v52 = vld [vmem:[#allocation9 + $0x194] sm:$0xf0]  ;;  %v8227_v40 = vor.u32 %v9323_v11, %v8226_v58  ;;  %v8634_v53 = vld [vmem:[#allocation9 + $0x3c0] sm:$0xf] }
 0x33d   :  { %5533 = vmatmul.bf16.vlgmr.msra.gmra.mxu0 %v10214_v12  ;;  %5547 = vmatmul.bf16.vlgmr.msra.gmra.mxu1 %v10216_v22  ;;  %v8415_v47 = vor.u32 %v9368_v21, %v8412_v17  ;;  %v9391_v54 = vld [vmem:[#allocation9 + $0x2b4] sm:$0xf0]  ;;  %v9426_v39 = vld [vmem:[#allocation9 + $0x3cc] sm:$0xf0]  ;;  %v8482_v31 = vld [vmem:[#allocation9 + $0x288] sm:$0xf] }
 0x33e   :  { %5581 = vmatpush.bf16.msrb.mxu0 %v8271_v35  ;;  %5595 = vmatpush.bf16.msrb.mxu1 %v8399_v8  ;;  %v8463_v35 = vor.u32 %v9380_v28, %v8460_v49  ;;  %v9376_v8 = vld [vmem:[#allocation9 + $0x244] sm:$0xf]  ;;  %v8210_v28 = vld [vmem:[#allocation9 + $0x68] sm:$0xf]  ;;  %v9319_v49 = vld [vmem:[#allocation9 + $0x74] sm:$0xf0] }
 0x33f   :  { %v8447_v25 = vor.u32 %v9376_v8, %v8444_v20  ;;  %v9351_v63 = vld [vmem:[#allocation9 + $0x174] sm:$0xf0]  ;;  %v8635_v8 = vor.u32 %v9426_v39, %v8634_v53  ;;  %v8211_v20 = vor.u32 %v9319_v49, %v8210_v28  ;;  %v8618_v4 = vld [vmem:[#allocation9 + $0x3a0] sm:$0xf]  ;;  %v9333_v5 = vld [vmem:[#allocation9 + $0xec] sm:$0xf] }
 0x340   :  { %5560 = vmatpush.bf16.msra.mxu2 %v8411_v2  ;;  %v8403_v2 = vor.u32 %v9367_v30, %v8402_v59  ;;  %v8466_v59 = vld [vmem:[#allocation9 + $0x268] sm:$0xf]  ;;  %v9383_v30 = vld [vmem:[#allocation9 + $0x274] sm:$0xf0]  ;;  %v9361_v49 = vld [vmem:[#allocation9 + $0x1cc] sm:$0xf] }
 0x341   :  { %v9379_v21 = vld [vmem:[#allocation9 + $0x254] sm:$0xf0]  ;;  %v8434_v58 = vld [vmem:[#allocation9 + $0x228] sm:$0xf] }
 0x342   :  { %5582 = vmatpush.bf16.msrb.mxu0 %v8255_v62  ;;  %5596 = vmatpush.bf16.msrb.mxu1 %v8383_v38  ;;  %v8159_v62 = vor.u32 %v9304_v57, %v8156_v60  ;;  %v8287_v38 = vor.u32 %v9336_v46, %v8284_v45  ;;  %v9315_v57 = vld [vmem:[#allocation9 + $0x54] sm:$0xf0]  ;;  %v8322_v60 = vld [vmem:[#allocation9 + $0x148] sm:$0xf] }
 0x343   :  { %5561 = vmatmul.bf16.vlgmr.msra.gmra.mxu2 %v10220_v1  ;;  %v9347_v45 = vld [vmem:[#allocation9 + $0x154] sm:$0xf0]  ;;  %v8418_v53 = vld [vmem:[#allocation9 + $0x208] sm:$0xf] }
 0x344   :  { %5609 = vmatpush.bf16.msrb.mxu2 %v8527_v42  ;;  %v9363_v42 = vld [vmem:[#allocation9 + $0x1d4] sm:$0xf0] }
 0x345   :  { %v8387_v10 = vor.u32 %v9363_v42, %v8386_v56  ;;  %v9418_v56 = vld [vmem:[#allocation9 + $0x38c] sm:$0xf0]  ;;  %v8450_v42 = vld [vmem:[#allocation9 + $0x248] sm:$0xf]  ;;  %v9339_v14 = vld [vmem:[#allocation9 + $0x114] sm:$0xf0] }
 0x346   :  { %5583 = vmatpush.bf16.msrb.mxu0 %v8239_v9  ;;  %5597 = vmatpush.bf16.msrb.mxu1 %v8367_v37  ;;  %v9399_v9 = vld [vmem:[#allocation9 + $0x2f4] sm:$0xf0]  ;;  %v8259_v37 = vor.u32 %v9331_v36, %v8258_v61  ;;  %v8467_v61 = vor.u32 %v9383_v30, %v8466_v59  ;;  %v8602_v36 = vld [vmem:[#allocation9 + $0x380] sm:$0xf]  ;;  %v8451_v41 = vor.u32 %v9379_v21, %v8450_v42  ;;  %v8372_v59 = vld [vmem:[#allocation9 + $0x1b8] sm:$0xf0] }
 0x347   :  { %v8603_v17 = vor.u32 %v9418_v56, %v8602_v36  ;;  %v9375_v11 = vld [vmem:[#allocation9 + $0x234] sm:$0xf0]  ;;  %v9353_v36 = vld [vmem:[#allocation9 + $0x18c] sm:$0xf]  ;;  %v8538_v56 = vld [vmem:[#allocation9 + $0x300] sm:$0xf] }
 0x348   :  { %5610 = vmatpush.bf16.msrb.mxu2 %v8511_v50  ;;  %v8531_v50 = vor.u32 %v9399_v9, %v8530_v18  ;;  %v8162_v9 = vld [vmem:[#allocation9 + $0x8] sm:$0xf]  ;;  %v8435_v28 = vor.u32 %v9375_v11, %v8434_v58  ;;  %v9371_v39 = vld [vmem:[#allocation9 + $0x214] sm:$0xf0]  ;;  %v9402_v42 = vld [vmem:[#allocation9 + $0x30c] sm:$0xf0] }
 0x349   :  { %v8212_v58 = vld [vmem:[#allocation9 + $0x78] sm:$0xf0]  ;;  %v9349_v11 = vld [vmem:[#allocation9 + $0x16c] sm:$0xf] }
 0x34a   :  { %5584 = vmatpush.bf16.msrb.mxu0 %v8223_v15  ;;  %5598 = vmatpush.bf16.msrb.mxu1 %v8351_v3  ;;  %v8514_v15 = vld [vmem:[#allocation9 + $0x2c8] sm:$0xf]  ;;  %v9395_v3 = vld [vmem:[#allocation9 + $0x2d4] sm:$0xf0] }
 0x34b   :  { %v8515_v43 = vor.u32 %v9395_v3, %v8514_v15  ;;  %v9365_v15 = vld [vmem:[#allocation9 + $0x1ec] sm:$0xf]  ;;  %v8586_v3 = vld [vmem:[#allocation9 + $0x360] sm:$0xf] }
 0x34c   :  { %5611 = vmatpush.bf16.msrb.mxu2 %v8495_v48  ;;  %v8354_v48 = vld [vmem:[#allocation9 + $0x188] sm:$0xf] }
 0x34e   :  { %5585 = vmatpush.bf16.msrb.mxu0 %v8207_v34  ;;  %5599 = vmatpush.bf16.msrb.mxu1 %v8335_v51  ;;  %v8650_v34 = vld [vmem:[#allocation9 + $0x3e0] sm:$0xf]  ;;  %v9430_v51 = vld [vmem:[#allocation9 + $0x3ec] sm:$0xf0] }
 0x34f   :  { %v8651_v7 = vor.u32 %v9430_v51, %v8650_v34 }
 0x350   :  { %5612 = vmatpush.bf16.msrb.mxu2 %v8479_v29  ;;  %v8355_v29 = vor.u32 %v9355_v52, %v8354_v48  ;;  %v10230_v52 = vpop.f32.mrf.mxu0 }
 0x351   :  { %5567 = vmatpush.bf16.msra.mxu3 %v8651_v7  ;;  %v10232_v7 = vpop.f32.mrf.mxu2 }
 0x352   :  { %5586 = vmatpush.bf16.msrb.mxu0 %v8191_v6  ;;  %5600 = vmatpush.bf16.msrb.mxu1 %v8319_v33  ;;  %v8338_v6 = vld [vmem:[#allocation9 + $0x168] sm:$0xf]  ;;  %v8499_v33 = vor.u32 %v9391_v54, %v8498_v44  ;;  %v9329_v44 = vld [vmem:[#allocation9 + $0xcc] sm:$0xf]  ;;  %v8260_v54 = vld [vmem:[#allocation9 + $0xd8] sm:$0xf0] }
 0x354   :  { %5613 = vmatpush.bf16.msrb.mxu2 %v8463_v35  ;;  %v9387_v35 = vld [vmem:[#allocation9 + $0x294] sm:$0xf0] }
 0x355   :  { %5568 = vmatpush.bf16.msra.mxu3 %v8635_v8  ;;  %v8483_v46 = vor.u32 %v9387_v35, %v8482_v31  ;;  %v9397_v35 = vld [vmem:[#allocation9 + $0x2ec] sm:$0xf]  ;;  %v8532_v8 = vld [vmem:[#allocation9 + $0x2f8] sm:$0xf0] }
 0x356   :  { %5587 = vmatpush.bf16.msrb.mxu0 %v8175_v24  ;;  %5601 = vmatpush.bf16.msrb.mxu1 %v8303_v27  ;;  %v8339_v24 = vor.u32 %v9351_v63, %v8338_v6  ;;  %v8194_v27 = vld [vmem:[#allocation9 + $0x48] sm:$0xf]  ;;  %v8570_v6 = vld [vmem:[#allocation9 + $0x340] sm:$0xf]  ;;  %v8388_v63 = vld [vmem:[#allocation9 + $0x1d8] sm:$0xf0] }
 0x357   :  { %v8195_v0 = vor.u32 %v9315_v57, %v8194_v27  ;;  %v8391_v27 = vor.u32 %v9361_v49, %v8388_v63  ;;  %v8419_v57 = vor.u32 %v9371_v39, %v8418_v53  ;;  %v8196_v63 = vld [vmem:[#allocation9 + $0x58] sm:$0xf0]  ;;  %v9345_v53 = vld [vmem:[#allocation9 + $0x14c] sm:$0xf] }
 0x358   :  { %5614 = vmatpush.bf16.msrb.mxu2 %v8447_v25  ;;  %v9422_v25 = vld [vmem:[#allocation9 + $0x3ac] sm:$0xf0] }
 0x359   :  { %v8619_v13 = vor.u32 %v9422_v25, %v8618_v4  ;;  %v8535_v4 = vor.u32 %v9397_v35, %v8532_v8  ;;  %v9357_v25 = vld [vmem:[#allocation9 + $0x1ac] sm:$0xf]  ;;  %v8324_v8 = vld [vmem:[#allocation9 + $0x158] sm:$0xf0] }
 0x35a   :  { %5588 = vmatpush.bf16.msrb.mxu0 %v8159_v62  ;;  %5602 = vmatpush.bf16.msrb.mxu1 %v8287_v38  ;;  %v8323_v62 = vor.u32 %v9347_v45, %v8322_v60  ;;  %v8178_v38 = vld [vmem:[#allocation9 + $0x28] sm:$0xf]  ;;  %v8244_v60 = vld [vmem:[#allocation9 + $0xb8] sm:$0xf0]  ;;  %v9406_v45 = vld [vmem:[#allocation9 + $0x32c] sm:$0xf0] }
 0x35b   :  { %5569 = vmatpush.bf16.msra.mxu3 %v8619_v13  ;;  %v10237_v13 = vpop.f32.mrf.mxu1 }
 0x35c   :  { %5615 = vmatpush.bf16.msrb.mxu2 %v8431_v26  ;;  %v9343_v26 = vld [vmem:[#allocation9 + $0x134] sm:$0xf0] }
 0x35d   :  { %5589 = vmatmul.bf16.vlgmr.msrb.gmra.mxu0 %v10214_v12  ;;  %5603 = vmatmul.bf16.vlgmr.msrb.gmra.mxu1 %v10216_v22 }
 0x35e   :  { %5637 = vmatpush.bf16.msra.mxu0 %v8275_v32  ;;  %5651 = vmatpush.bf16.msra.mxu1 %v8403_v2  ;;  %v9311_v32 = vld [vmem:[#allocation9 + $0x34] sm:$0xf0]  ;;  %v8306_v2 = vld [vmem:[#allocation9 + $0x128] sm:$0xf] }
 0x35f   :  { %v8179_v18 = vor.u32 %v9311_v32, %v8178_v38  ;;  %5570 = vmatpush.bf16.msra.mxu3 %v8603_v17  ;;  %v10240_v38 = vpop.f32.mrf.mxu0  ;;  %v8356_v17 = vld [vmem:[#allocation9 + $0x198] sm:$0xf0] }
 0x360   :  { %5616 = vmatpush.bf16.msrb.mxu2 %v8415_v47  ;;  %v8307_v47 = vor.u32 %v9343_v26, %v8306_v2  ;;  %v9321_v2 = vld [vmem:[#allocation9 + $0x8c] sm:$0xf]  ;;  %v8375_v26 = vor.u32 %v9357_v25, %v8372_v59  ;;  %v8327_v25 = vor.u32 %v9345_v53, %v8324_v8  ;;  %v8180_v59 = vld [vmem:[#allocation9 + $0x38] sm:$0xf0] }
 0x362   :  { %5638 = vmatpush.bf16.msra.mxu0 %v8259_v37  ;;  %5652 = vmatpush.bf16.msra.mxu1 %v8387_v10  ;;  %v9307_v37 = vld [vmem:[#allocation9 + $0x14] sm:$0xf0]  ;;  %v8290_v10 = vld [vmem:[#allocation9 + $0x108] sm:$0xf] }
 0x363   :  { %5617 = vmatmul.bf16.vlgmr.msrb.gmra.mxu2 %v10220_v1  ;;  %v8291_v34 = vor.u32 %v9339_v14, %v8290_v10  ;;  %v10242_v10 = vpop.f32.mrf.mxu2  ;;  %v9389_v14 = vld [vmem:[#allocation9 + $0x2ac] sm:$0xf] }
 0x364   :  { %5665 = vmatpush.bf16.msra.mxu2 %v8531_v50  ;;  %v8276_v50 = vld [vmem:[#allocation9 + $0xf8] sm:$0xf0] }
 0x365   :  { %v8279_v51 = vor.u32 %v9333_v5, %v8276_v50  ;;  %v8500_v5 = vld [vmem:[#allocation9 + $0x2b8] sm:$0xf0] }
 0x366   :  { %5639 = vmatpush.bf16.msra.mxu0 %v8243_v55  ;;  %5653 = vmatpush.bf16.msra.mxu1 %v8371_v23  ;;  %v9414_v55 = vld [vmem:[#allocation9 + $0x36c] sm:$0xf0]  ;;  %v8404_v23 = vld [vmem:[#allocation9 + $0x1f8] sm:$0xf0] }
 0x367   :  { %v8587_v48 = vor.u32 %v9414_v55, %v8586_v3  ;;  %v8359_v55 = vor.u32 %v9353_v36, %v8356_v17  ;;  %v9377_v36 = vld [vmem:[#allocation9 + $0x24c] sm:$0xf] }
 0x368   :  { %5666 = vmatpush.bf16.msra.mxu2 %v8515_v43  ;;  %v8163_v43 = vor.u32 %v9307_v37, %v8162_v9  ;;  %v9428_v9 = vld [vmem:[#allocation9 + $0x3e4] sm:$0xf]  ;;  %v8652_v37 = vld [vmem:[#allocation9 + $0x3f0] sm:$0xf0] }
 0x369   :  { %5571 = vmatpush.bf16.msra.mxu3 %v8587_v48  ;;  %v8655_v50 = vor.u32 %v9428_v9, %v8652_v37  ;;  %v8503_v48 = vor.u32 %v9389_v14, %v8500_v5  ;;  %v9305_v37 = vld [vmem:[#allocation9 + $0xc] sm:$0xf] }
 0x36a   :  { %5640 = vmatpush.bf16.msra.mxu0 %v8227_v40  ;;  %5654 = vmatpush.bf16.msra.mxu1 %v8355_v29  ;;  %v10234_v40 = vpop.f32.mrf.mxu3  ;;  %v8407_v29 = vor.u32 %v9365_v15, %v8404_v23  ;;  %v9317_v23 = vld [vmem:[#allocation9 + $0x6c] sm:$0xf] }
 0x36b   :  { %v8215_v49 = vor.u32 %v9317_v23, %v8212_v58  ;;  %v9337_v14 = vld [vmem:[#allocation9 + $0x10c] sm:$0xf]  ;;  %v8436_v23 = vld [vmem:[#allocation9 + $0x238] sm:$0xf0] }
 0x36c   :  { %5667 = vmatpush.bf16.msra.mxu2 %v8499_v33  ;;  %v9410_v33 = vld [vmem:[#allocation9 + $0x34c] sm:$0xf0] }
 0x36d   :  { %v8571_v31 = vor.u32 %v9410_v33, %v8570_v6  ;;  %v9313_v33 = vld [vmem:[#allocation9 + $0x4c] sm:$0xf] }
 0x36e   :  { %5641 = vmatpush.bf16.msra.mxu0 %v8211_v20  ;;  %5655 = vmatpush.bf16.msra.mxu1 %v8339_v24  ;;  %v8263_v20 = vor.u32 %v9329_v44, %v8260_v54  ;;  %v9325_v24 = vld [vmem:[#allocation9 + $0xac] sm:$0xf]  ;;  %v10247_v44 = vpop.f32.mrf.mxu1 }
 0x36f   :  { %5572 = vmatpush.bf16.msra.mxu3 %v8571_v31  ;;  %v8247_v32 = vor.u32 %v9325_v24, %v8244_v60  ;;  %v9385_v54 = vld [vmem:[#allocation9 + $0x28c] sm:$0xf]  ;;  %v10250_v31 = vpop.f32.mrf.mxu0  ;;  %v8620_v24 = vld [vmem:[#allocation9 + $0x3b0] sm:$0xf0] }
 0x370   :  { %5668 = vmatpush.bf16.msra.mxu2 %v8483_v46  ;;  %v8554_v46 = vld [vmem:[#allocation9 + $0x320] sm:$0xf]  ;;  %v9381_v60 = vld [vmem:[#allocation9 + $0x26c] sm:$0xf] }
 0x371   :  { %v8555_v30 = vor.u32 %v9406_v45, %v8554_v46  ;;  %v8468_v46 = vld [vmem:[#allocation9 + $0x278] sm:$0xf0] }
 0x372   :  { %5642 = vmatpush.bf16.msra.mxu0 %v8195_v0  ;;  %5656 = vmatpush.bf16.msra.mxu1 %v8323_v62  ;;  %v9393_v0 = vld [vmem:[#allocation9 + $0x2cc] sm:$0xf]  ;;  %v8516_v62 = vld [vmem:[#allocation9 + $0x2d8] sm:$0xf0] }
 0x373   :  { %v8519_v21 = vor.u32 %v9393_v0, %v8516_v62  ;;  %5573 = vmatpush.bf16.msra.mxu3 %v8555_v30  ;;  %v9341_v30 = vld [vmem:[#allocation9 + $0x12c] sm:$0xf] }
 0x374   :  { %5669 = vmatpush.bf16.msra.mxu2 %v8467_v61  ;;  %v8228_v61 = vld [vmem:[#allocation9 + $0x98] sm:$0xf0] }
 0x375   :  { %v8231_v3 = vor.u32 %v9321_v2, %v8228_v61  ;;  %v8308_v2 = vld [vmem:[#allocation9 + $0x138] sm:$0xf0]  ;;  %v9416_v61 = vld [vmem:[#allocation9 + $0x384] sm:$0xf] }
 0x376   :  { %5643 = vmatpush.bf16.msra.mxu0 %v8179_v18  ;;  %5657 = vmatpush.bf16.msra.mxu1 %v8307_v47  ;;  %v8539_v18 = vor.u32 %v9402_v42, %v8538_v56  ;;  %v10244_v47 = vpop.f32.mrf.mxu3  ;;  %v8452_v56 = vld [vmem:[#allocation9 + $0x258] sm:$0xf0]  ;;  %v8311_v9 = vor.u32 %v9341_v30, %v8308_v2 }
 0x378   :  { %5670 = vmatpush.bf16.msra.mxu2 %v8451_v41  ;;  %v9478_v41 = vld [vmem:[#allocation7] sm:$0xf]  ;;  %5574 = vmatpush.bf16.msra.mxu3 %v8539_v18  ;;  %v4592_v18 = vpop.f32.mrf.mxu1 }
 0x379   :  { %v1274_v15 = vperm.slane %v9478_v41, 3  ;;  %v8292_v41 = vld [vmem:[#allocation9 + $0x118] sm:$0xf0] }
 0x37a   :  { %5644 = vmatpush.bf16.msra.mxu0 %v8163_v43  ;;  %5658 = vmatpush.bf16.msra.mxu1 %v8291_v34  ;;  %v8340_v43 = vld [vmem:[#allocation9 + $0x178] sm:$0xf0]  ;;  %v9424_v34 = vld [vmem:[#allocation9 + $0x3c4] sm:$0xf]  ;;  %v4632_v5 = vpop.f32.mrf.mxu0 }
 0x37b   :  { %v8343_v6 = vor.u32 %v9349_v11, %v8340_v43  ;;  %v4521_v39 = vadd.f32 %v10226_v16, %v1274_v15  ;;  %v9309_v16 = vld [vmem:[#allocation9 + $0x2c] sm:$0xf]  ;;  %v4523_v62 = vadd.f32 %v10230_v52, %v1274_v15  ;;  %v9412_v15 = vld [vmem:[#allocation9 + $0x364] sm:$0xf] }
 0x37c   :  { %5671 = vmatpush.bf16.msra.mxu2 %v8435_v28  ;;  %5623 = vmatpush.bf16.msrb.mxu3 %v8655_v50  ;;  %v8183_v17 = vor.u32 %v9309_v16, %v8180_v59  ;;  %v8455_v50 = vor.u32 %v9377_v36, %v8452_v56 }
 0x37d   :  { %5645 = vmatmul.bf16.vlgmr.msra.gmra.mxu0 %v10214_v12  ;;  %5659 = vmatmul.bf16.vlgmr.msra.gmra.mxu1 %v10216_v22  ;;  %v4535_v0 = vadd.f32 %v10228_v19, %v4521_v39  ;;  %v8164_v19 = vld [vmem:[#allocation9 + $0x18] sm:$0xf0]  ;;  %v4537_v52 = vadd.f32 %v10237_v13, %v4523_v62  ;;  %v8295_v13 = vor.u32 %v9337_v14, %v8292_v41 }
 0x37e   :  { %5693 = vmatpush.bf16.msrb.mxu0 %v8279_v51  ;;  %5707 = vmatpush.bf16.msrb.mxu1 %v8407_v29  ;;  %v8636_v51 = vld [vmem:[#allocation9 + $0x3d0] sm:$0xf0]  ;;  %v8484_v29 = vld [vmem:[#allocation9 + $0x298] sm:$0xf0] }
 0x37f   :  { %v8639_v28 = vor.u32 %v9424_v34, %v8636_v51  ;;  %v8487_v35 = vor.u32 %v9385_v54, %v8484_v29  ;;  %v4551_v11 = vadd.f32 %v10242_v10, %v4537_v52  ;;  %v9408_v29 = vld [vmem:[#allocation9 + $0x344] sm:$0xf] }
 0x380   :  { %5672 = vmatpush.bf16.msra.mxu2 %v8419_v57  ;;  %v10254_v57 = vpop.f32.mrf.mxu3  ;;  %v4646_v10 = vpop.f32.mrf.mxu1 }
 0x381   :  { %5624 = vmatpush.bf16.msrb.mxu3 %v8639_v28  ;;  %v8572_v28 = vld [vmem:[#allocation9 + $0x350] sm:$0xf0] }
 0x382   :  { %5694 = vmatpush.bf16.msrb.mxu0 %v8263_v20  ;;  %5708 = vmatpush.bf16.msrb.mxu1 %v8391_v27  ;;  %v9420_v20 = vld [vmem:[#allocation9 + $0x3a4] sm:$0xf]  ;;  %v10252_v27 = vpop.f32.mrf.mxu2 }
 0x383   :  { %5673 = vmatmul.bf16.vlgmr.msra.gmra.mxu2 %v10220_v1  ;;  %v8623_v45 = vor.u32 %v9420_v20, %v8620_v24  ;;  %v4634_v24 = vpop.f32.mrf.mxu0 }
 0x384   :  { %5721 = vmatpush.bf16.msrb.mxu2 %v8535_v4  ;;  %v8199_v4 = vor.u32 %v9313_v33, %v8196_v63  ;;  %v8575_v33 = vor.u32 %v9408_v29, %v8572_v28  ;;  %v9419_v29 = vld [vmem:[#allocation9 + $0x394] sm:$0xf0] }
 0x385   :  { %5625 = vmatpush.bf16.msrb.mxu3 %v8623_v45  ;;  %v8540_v45 = vld [vmem:[#allocation9 + $0x310] sm:$0xf0] }
 0x386   :  { %5695 = vmatpush.bf16.msrb.mxu0 %v8247_v32  ;;  %5709 = vmatpush.bf16.msrb.mxu1 %v8375_v26  ;;  %v8471_v32 = vor.u32 %v9381_v60, %v8468_v46  ;;  %v8604_v26 = vld [vmem:[#allocation9 + $0x390] sm:$0xf0] }
 0x387   :  { %v8607_v42 = vor.u32 %v9416_v61, %v8604_v26 }
 0x388   :  { %5722 = vmatpush.bf16.msrb.mxu2 %v8519_v21  ;;  %v4549_v21 = vadd.f32 %v10232_v7, %v4535_v0  ;;  %v4620_v34 = vpop.f32.mrf.mxu3  ;;  %v4648_v16 = vpop.f32.mrf.mxu1 }
 0x389   :  { %5626 = vmatpush.bf16.msrb.mxu3 %v8607_v42 }
 0x38a   :  { %5696 = vmatpush.bf16.msrb.mxu0 %v8231_v3  ;;  %5710 = vmatpush.bf16.msrb.mxu1 %v8359_v55  ;;  %v8588_v3 = vld [vmem:[#allocation9 + $0x370] sm:$0xf0]  ;;  %v9373_v55 = vld [vmem:[#allocation9 + $0x22c] sm:$0xf]  ;;  %v4563_v58 = vadd.f32 %v10234_v40, %v4549_v21  ;;  %v4606_v43 = vpop.f32.mrf.mxu2  ;;  %v4565_v40 = vadd.f32 %v10244_v47, %v4551_v11  ;;  %v8642_v11 = vld [vmem:[#allocation9 + $0x3c8] sm:$0xf] }
 0x38b   :  { %v8591_v7 = vor.u32 %v9412_v15, %v8588_v3  ;;  %v8439_v54 = vor.u32 %v9373_v55, %v8436_v23  ;;  %v8658_v15 = vld [vmem:[#allocation9 + $0x3e8] sm:$0xf]  ;;  %v9431_v3 = vld [vmem:[#allocation9 + $0x3f4] sm:$0xf0] }
 0x38c   :  { %5723 = vmatpush.bf16.msrb.mxu2 %v8503_v48  ;;  %v8167_v48 = vor.u32 %v9305_v37, %v8164_v19  ;;  %v4577_v51 = vadd.f32 %v10240_v38, %v4563_v58  ;;  %v4579_v53 = vadd.f32 %v10250_v31, %v4565_v40  ;;  %v9404_v38 = vld [vmem:[#allocation9 + $0x324] sm:$0xf]  ;;  %v8578_v40 = vld [vmem:[#allocation9 + $0x348] sm:$0xf] }
 0x38d   :  { %5627 = vmatpush.bf16.msrb.mxu3 %v8591_v7  ;;  %v8659_v7 = vor.u32 %v9431_v3, %v8658_v15  ;;  %v9443_v15 = vld [vmem:[#allocation12 + $0x58] sm:$0xff] }
 0x38e   :  { %5697 = vmatpush.bf16.msrb.mxu0 %v8215_v49  ;;  %5711 = vmatpush.bf16.msrb.mxu1 %v8343_v6  ;;  %v9369_v49 = vld [vmem:[#allocation9 + $0x20c] sm:$0xf]  ;;  %v8420_v6 = vld [vmem:[#allocation9 + $0x218] sm:$0xf0]  ;;  %v4591_v63 = vadd.f32 %v10247_v44, %v4577_v51  ;;  %v4593_v46 = vadd.f32 %v4592_v18, %v4579_v53  ;;  %v9400_v44 = vld [vmem:[#allocation9 + $0x304] sm:$0xf] }
 0x38f   :  { %v8423_v39 = vor.u32 %v9369_v49, %v8420_v6  ;;  %v8543_v31 = vor.u32 %v9400_v44, %v8540_v45  ;;  %v8594_v49 = vld [vmem:[#allocation9 + $0x368] sm:$0xf]  ;;  %v9415_v6 = vld [vmem:[#allocation9 + $0x374] sm:$0xf0]  ;;  %v8644_v44 = vld [vmem:[#allocation9 + $0x3d8] sm:$0xf0] }
 0x390   :  { %5724 = vmatpush.bf16.msrb.mxu2 %v8487_v35  ;;  %v8556_v35 = vld [vmem:[#allocation9 + $0x330] sm:$0xf0]  ;;  %v4605_v20 = vadd.f32 %v10252_v27, %v4591_v63  ;;  %v4674_v60 = vpop.f32.mrf.mxu3  ;;  %v8562_v53 = vld [vmem:[#allocation9 + $0x328] sm:$0xf]  ;;  %v9455_v3 = vld [vmem:[#allocation12 + $0xb8] sm:$0xff] }
 0x391   :  { %5628 = vmatpush.bf16.msrb.mxu3 %v8575_v33  ;;  %v8559_v8 = vor.u32 %v9404_v38, %v8556_v35  ;;  %v8595_v33 = vor.u32 %v9415_v6, %v8594_v49  ;;  %v8546_v35 = vld [vmem:[#allocation9 + $0x308] sm:$0xf] }
 0x392   :  { %5698 = vmatpush.bf16.msrb.mxu0 %v8199_v4  ;;  %5712 = vmatpush.bf16.msrb.mxu1 %v8327_v25  ;;  %v4660_v47 = vpop.f32.mrf.mxu2  ;;  %v4619_v4 = vadd.f32 %v10254_v57, %v4605_v20  ;;  %v4607_v25 = vadd.f32 %v4606_v43, %v4593_v46  ;;  %v9429_v20 = vld [vmem:[#allocation9 + $0x3ec] sm:$0xf] }
 0x393   :  { %v9425_v46 = vld [vmem:[#allocation9 + $0x3cc] sm:$0xf] }
 0x394   :  { %5725 = vmatpush.bf16.msrb.mxu2 %v8471_v32  ;;  %v4621_v27 = vadd.f32 %v4620_v34, %v4607_v25  ;;  %v8626_v34 = vld [vmem:[#allocation9 + $0x3a8] sm:$0xf]  ;;  %v8647_v45 = vor.u32 %v9425_v46, %v8644_v44 }
 0x395   :  { %5629 = vmatpush.bf16.msrb.mxu3 %v8559_v8  ;;  %v9403_v8 = vld [vmem:[#allocation9 + $0x314] sm:$0xf0] }
 0x396   :  { %5699 = vmatpush.bf16.msrb.mxu0 %v8183_v17  ;;  %5713 = vmatpush.bf16.msrb.mxu1 %v8311_v9 }
 0x398   :  { %5726 = vmatpush.bf16.msrb.mxu2 %v8455_v50  ;;  %v4676_v62 = vpop.f32.mrf.mxu3 }
 0x399   :  { %5630 = vmatpush.bf16.msrb.mxu3 %v8543_v31  ;;  %v9421_v31 = vld [vmem:[#allocation9 + $0x3ac] sm:$0xf] }
 0x39a   :  { %5700 = vmatpush.bf16.msrb.mxu0 %v8167_v48  ;;  %5714 = vmatpush.bf16.msrb.mxu1 %v8295_v13  ;;  %v4688_v59 = vpop.f32.mrf.mxu0  ;;  %v4662_v0 = vpop.f32.mrf.mxu2  ;;  %v9427_v48 = vld [vmem:[#allocation9 + $0x3d4] sm:$0xf0] }
 0x39b   :  { %v4702_v61 = vpop.f32.mrf.mxu1  ;;  %v8643_v43 = vor.u32 %v9427_v48, %v8642_v11  ;;  %v9423_v13 = vld [vmem:[#allocation9 + $0x3b4] sm:$0xf0]  ;;  %v10277_v11 = vld [vmem:[#allocation10] sm:$0xf]  ;;  %v9441_v48 = vld [vmem:[#allocation12 + $0x48] sm:$0xff] }
 0x39c   :  { %5727 = vmatpush.bf16.msrb.mxu2 %v8439_v54  ;;  %v8627_v51 = vor.u32 %v9423_v13, %v8626_v34  ;;  %v8610_v54 = vld [vmem:[#allocation9 + $0x388] sm:$0xf]  ;;  %v4877_v13 = vperm.slane %v10277_v11, 0  ;;  %v4878_v44 = vperm.slane %v10277_v11, 1 }
 0x39d   :  { %5701 = vmatmul.bf16.vlgmr.msrb.gmra.mxu0 %v10214_v12  ;;  %5715 = vmatmul.bf16.vlgmr.msrb.gmra.mxu1 %v10216_v22  ;;  %v4633_v12 = vadd.f32 %v4632_v5, %v4619_v4  ;;  %v4635_v22 = vadd.f32 %v4634_v24, %v4621_v27  ;;  %v8611_v28 = vor.u32 %v9419_v29, %v8610_v54  ;;  %v8660_v24 = vld [vmem:[#allocation9 + $0x3f8] sm:$0xf0]  ;;  %v9452_v54 = vld [vmem:[#allocation12 + $0xa0] sm:$0xff] }
 0x39e   :  { %v8628_v4 = vld [vmem:[#allocation9 + $0x3b8] sm:$0xf0] }
 0x39f   :  { %v4647_v30 = vadd.f32 %v4646_v10, %v4633_v12  ;;  %v4649_v2 = vadd.f32 %v4648_v16, %v4635_v22  ;;  %v9411_v10 = vld [vmem:[#allocation9 + $0x354] sm:$0xf0]  ;;  %v8631_v25 = vor.u32 %v9421_v31, %v8628_v4  ;;  %v9417_v12 = vld [vmem:[#allocation9 + $0x38c] sm:$0xf]  ;;  %v8612_v16 = vld [vmem:[#allocation9 + $0x398] sm:$0xf0] }
 0x3a0   :  { %5728 = vmatpush.bf16.msrb.mxu2 %v8423_v39  ;;  %v8579_v63 = vor.u32 %v9411_v10, %v8578_v40  ;;  %v9407_v39 = vld [vmem:[#allocation9 + $0x334] sm:$0xf0]  ;;  %v8615_v27 = vor.u32 %v9417_v12, %v8612_v16  ;;  %v9463_v12 = vld [vmem:[#allocation12 + $0xf8] sm:$0xff] }
 0x3a1   :  { %v4661_v32 = vadd.f32 %v4660_v47, %v4647_v30  ;;  %v4663_v36 = vadd.f32 %v4662_v0, %v4649_v2  ;;  %v8563_v38 = vor.u32 %v9407_v39, %v8562_v53  ;;  %v8547_v47 = vor.u32 %v9403_v8, %v8546_v35  ;;  %v8596_v30 = vld [vmem:[#allocation9 + $0x378] sm:$0xf0]  ;;  %v9409_v0 = vld [vmem:[#allocation9 + $0x34c] sm:$0xf]  ;;  %v9450_v53 = vld [vmem:[#allocation12 + $0x90] sm:$0xff] }
 0x3a2   :  { %v4690_v42 = vpop.f32.mrf.mxu0  ;;  %v9405_v2 = vld [vmem:[#allocation9 + $0x32c] sm:$0xf] }
 0x3a3   :  { %5729 = vmatmul.bf16.vlgmr.msrb.gmra.mxu2 %v10220_v1  ;;  %v4675_v26 = vadd.f32 %v4674_v60, %v4661_v32  ;;  %v4677_v17 = vadd.f32 %v4676_v62, %v4663_v36  ;;  %v4704_v37 = vpop.f32.mrf.mxu1  ;;  %v8663_v60 = vor.u32 %v9429_v20, %v8660_v24  ;;  %v8580_v62 = vld [vmem:[#allocation9 + $0x358] sm:$0xf0]  ;;  %v9401_v36 = vld [vmem:[#allocation9 + $0x30c] sm:$0xf] }
 0x3a4   :  { %v8583_v32 = vor.u32 %v9409_v0, %v8580_v62  ;;  %6049 = vmatpush.bf16.msra.mxu2 %v9455_v3 }
 0x3a5   :  { %v4689_v56 = vadd.f32 %v4688_v59, %v4675_v26  ;;  %v4691_v18 = vadd.f32 %v4690_v42, %v4677_v17  ;;  %v9413_v59 = vld [vmem:[#allocation9 + $0x36c] sm:$0xf] }
 0x3a6   :  { %v4716_v57 = vpop.f32.mrf.mxu2  ;;  %v4730_v21 = vpop.f32.mrf.mxu3  ;;  %v8599_v22 = vor.u32 %v9413_v59, %v8596_v30  ;;  %v9437_v17 = vld [vmem:[#allocation12 + $0x28] sm:$0xff]  ;;  %v9462_v59 = vld [vmem:[#allocation12 + $0xf0] sm:$0xff] }
 0x3a7   :  { %v4703_v1 = vadd.f32 %v4702_v61, %v4689_v56  ;;  %v4705_v19 = vadd.f32 %v4704_v37, %v4691_v18  ;;  %v8564_v61 = vld [vmem:[#allocation9 + $0x338] sm:$0xf0]  ;;  %v9434_v37 = vld [vmem:[#allocation12 + $0x10] sm:$0xff] }
 0x3a8   :  { %v8567_v26 = vor.u32 %v9405_v2, %v8564_v61  ;;  %v8548_v56 = vld [vmem:[#allocation9 + $0x318] sm:$0xf0] }
 0x3a9   :  { %v4717_v9 = vadd.f32 %v4716_v57, %v4703_v1  ;;  %v8551_v42 = vor.u32 %v9401_v36, %v8548_v56  ;;  %v9439_v57 = vld [vmem:[#allocation12 + $0x38] sm:$0xff]  ;;  %v9436_v1 = vld [vmem:[#allocation12 + $0x20] sm:$0xff] }
 0x3aa   :  { %6021 = vmatpush.bf16.msra.mxu0 %v9439_v57  ;;  %v9435_v18 = vld [vmem:[#allocation12 + $0x18] sm:$0xff]  ;;  %v9460_v56 = vld [vmem:[#allocation12 + $0xe0] sm:$0xff] }
 0x3ab   :  { %v4731_v52 = vadd.f32 %v4730_v21, %v4717_v9  ;;  %v9438_v21 = vld [vmem:[#allocation12 + $0x30] sm:$0xff]  ;;  %v9447_v9 = vld [vmem:[#allocation12 + $0x78] sm:$0xff] }
 0x3ac   :  { %6035 = vmatpush.bf16.msra.mxu1 %v9447_v9  ;;  %v4879_v9 = vperm.slane %v10277_v11, 2 }
 0x3ad   :  { %v4738_v55 = vmax.f32 %v4731_v52, 0.0  ;;  %v9445_v52 = vld [vmem:[#allocation12 + $0x68] sm:$0xff] }
 0x3ae   :  { %v4718_v14 = vpop.f32.mrf.mxu2  ;;  %v4732_v50 = vpop.f32.mrf.mxu3  ;;  %6022 = vmatpush.bf16.msra.mxu0 %v9438_v21 }
 0x3af   :  { %v4719_v5 = vadd.f32 %v4718_v14, %v4705_v19  ;;  %v9446_v19 = vld [vmem:[#allocation12 + $0x70] sm:$0xff]  ;;  %v9433_v14 = vld [vmem:[#allocation12 + $0x8] sm:$0xff] }
 0x3b0   :  { %6036 = vmatpush.bf16.msra.mxu1 %v9446_v19 }
 0x3b1   :  { %v4733_v41 = vadd.f32 %v4732_v50, %v4719_v5  ;;  %v9432_v5 = vld [vmem:[#allocation12] sm:$0xff] }
 0x3b2   :  { %6023 = vmatpush.bf16.msra.mxu0 %v9437_v17  ;;  %v9444_v50 = vld [vmem:[#allocation12 + $0x60] sm:$0xff] }
 0x3b3   :  { %v4742_v23 = vmax.f32 %v4733_v41, 0.0 }
 0x3b4   :  { %6037 = vmatpush.bf16.msra.mxu1 %v9445_v52 }
 0x3b5   :  { %v10271_v58 = vpack.c.bf16 %v4742_v23, %v4738_v55  ;;  %v9442_v55 = vld [vmem:[#allocation12 + $0x50] sm:$0xff] }
 0x3b6   :  { %6024 = vmatpush.bf16.msra.mxu0 %v9436_v1  ;;  %v9454_v23 = vld [vmem:[#allocation12 + $0xb0] sm:$0xff] }
 0x3b7   :  { %5575 = vmatmul.bf16.vlgmr.msra.gmra.mxu3 %v10271_v58  ;;  %6050 = vmatpush.bf16.msra.mxu2 %v9454_v23 }
 0x3b8   :  { %5679 = vmatpush.bf16.msra.mxu3 %v8659_v7  ;;  %6038 = vmatpush.bf16.msra.mxu1 %v9444_v50 }
 0x3ba   :  { %6025 = vmatpush.bf16.msra.mxu0 %v9435_v18  ;;  %v5534_v41 = vpop.f32.mrf.mxu0  ;;  %v5548_v7 = vpop.f32.mrf.mxu1 }
 0x3bb   :  { %v5535_v29 = vadd.f32 %v5534_v41, %v4877_v13 }
 0x3bc   :  { %5680 = vmatpush.bf16.msra.mxu3 %v8643_v43  ;;  %6039 = vmatpush.bf16.msra.mxu1 %v9443_v15  ;;  %v9453_v43 = vld [vmem:[#allocation12 + $0xa8] sm:$0xff]  ;;  %v9458_v15 = vld [vmem:[#allocation12 + $0xd0] sm:$0xff] }
 0x3bd   :  { %6051 = vmatpush.bf16.msra.mxu2 %v9453_v43 }
 0x3be   :  { %6026 = vmatpush.bf16.msra.mxu0 %v9434_v37 }
 0x3c0   :  { %5681 = vmatpush.bf16.msra.mxu3 %v8627_v51  ;;  %6040 = vmatpush.bf16.msra.mxu1 %v9442_v55  ;;  %v9440_v51 = vld [vmem:[#allocation12 + $0x40] sm:$0xff] }
 0x3c1   :  { %6052 = vmatpush.bf16.msra.mxu2 %v9452_v54  ;;  %v9456_v54 = vld [vmem:[#allocation12 + $0xc0] sm:$0xff] }
 0x3c2   :  { %6027 = vmatpush.bf16.msra.mxu0 %v9433_v14  ;;  %v5536_v34 = vpop.f32.mrf.mxu0  ;;  %v9459_v14 = vld [vmem:[#allocation12 + $0xd8] sm:$0xff] }
 0x3c3   :  { %v5537_v40 = vadd.f32 %v5536_v34, %v4877_v13 }
 0x3c4   :  { %5682 = vmatpush.bf16.msra.mxu3 %v8611_v28  ;;  %6041 = vmatpush.bf16.msra.mxu1 %v9441_v48  ;;  %v5550_v28 = vpop.f32.mrf.mxu1 }
 0x3c5   :  { %v5551_v39 = vadd.f32 %v5550_v28, %v5537_v40 }
 0x3c6   :  { %6028 = vmatpush.bf16.msra.mxu0 %v9432_v5 }
 0x3c7   :  { %5631 = vmatmul.bf16.vlgmr.msrb.gmra.mxu3 %v10271_v58 }
 0x3c8   :  { %5683 = vmatpush.bf16.msra.mxu3 %v8595_v33  ;;  %6042 = vmatpush.bf16.msra.mxu1 %v9440_v51  ;;  %v9451_v33 = vld [vmem:[#allocation12 + $0x98] sm:$0xff] }
 0x3c9   :  { %6053 = vmatpush.bf16.msra.mxu2 %v9451_v33 }
 0x3cc   :  { %5684 = vmatpush.bf16.msra.mxu3 %v8579_v63  ;;  %v5549_v63 = vadd.f32 %v5548_v7, %v5535_v29 }
 0x3cd   :  { %6054 = vmatpush.bf16.msra.mxu2 %v9450_v53 }
 0x3d0   :  { %5685 = vmatpush.bf16.msra.mxu3 %v8563_v38 }
 0x3d4   :  { %5686 = vmatpush.bf16.msra.mxu3 %v8547_v47 }
 0x3d7   :  { %5687 = vmatmul.bf16.vlgmr.msra.gmra.mxu3 %v10271_v58 }
 0x3d8   :  { %5735 = vmatpush.bf16.msrb.mxu3 %v8663_v60  ;;  %v9449_v60 = vld [vmem:[#allocation12 + $0x88] sm:$0xff] }
 0x3d9   :  { %6055 = vmatpush.bf16.msra.mxu2 %v9449_v60 }
 0x3da   :  { %v5590_v10 = vpop.f32.mrf.mxu0  ;;  %v5604_v8 = vpop.f32.mrf.mxu1 }
 0x3dc   :  { %5736 = vmatpush.bf16.msrb.mxu3 %v8647_v45 }
 0x3e0   :  { %5737 = vmatpush.bf16.msrb.mxu3 %v8631_v25  ;;  %v9448_v25 = vld [vmem:[#allocation12 + $0x80] sm:$0xff] }
 0x3e1   :  { %6056 = vmatpush.bf16.msra.mxu2 %v9448_v25 }
 0x3e2   :  { %v5592_v4 = vpop.f32.mrf.mxu0  ;;  %v5606_v0 = vpop.f32.mrf.mxu1 }
 0x3e4   :  { %5738 = vmatpush.bf16.msrb.mxu3 %v8615_v27  ;;  %v5591_v27 = vadd.f32 %v5590_v10, %v4878_v44 }
 0x3e6   :  { %v5605_v2 = vadd.f32 %v5604_v8, %v5591_v27  ;;  %v9476_v27 = vld [vmem:[#allocation13] ss:$0 sm:$0xff] }
 0x3e8   :  { %5739 = vmatpush.bf16.msrb.mxu3 %v8599_v22  ;;  %v5593_v22 = vadd.f32 %v5592_v4, %v4878_v44 }
 0x3ec   :  { %5740 = vmatpush.bf16.msrb.mxu3 %v8583_v32  ;;  %v9461_v32 = vld [vmem:[#allocation12 + $0xe8] sm:$0xff] }
 0x3f0   :  { %5741 = vmatpush.bf16.msrb.mxu3 %v8567_v26  ;;  %v5607_v26 = vadd.f32 %v5606_v0, %v5593_v22 }
 0x3f4   :  { %5742 = vmatpush.bf16.msrb.mxu3 %v8551_v42 }
 0x3f7   :  { %5743 = vmatmul.bf16.vlgmr.msrb.gmra.mxu3 %v10271_v58  ;;  %v5562_v58 = vpop.f32.mrf.mxu2 }
 0x3f8   :  { %v5563_v38 = vadd.f32 %v5562_v58, %v5549_v63  ;;  %6063 = vmatpush.bf16.msra.mxu3 %v9463_v12  ;;  %v9457_v58 = vld [vmem:[#allocation12 + $0xc8] sm:$0xff]  ;;  %v4880_v63 = vperm.slane %v10277_v11, 3 }
 0x3fa   :  { %v5646_v61 = vpop.f32.mrf.mxu0  ;;  %v5660_v1 = vpop.f32.mrf.mxu1 }
 0x3fb   :  { %v5647_v50 = vadd.f32 %v5646_v61, %v4879_v9 }
 0x3fc   :  { %6064 = vmatpush.bf16.msra.mxu3 %v9462_v59 }
 0x3fd   :  { %v5661_v55 = vadd.f32 %v5660_v1, %v5647_v50 }
 0x3ff   :  { %v5564_v49 = vpop.f32.mrf.mxu2 }
 0x400   :  { %v5565_v35 = vadd.f32 %v5564_v49, %v5551_v39  ;;  %6065 = vmatpush.bf16.msra.mxu3 %v9461_v32 }
 0x402   :  { %v5648_v5 = vpop.f32.mrf.mxu0  ;;  %v5662_v23 = vpop.f32.mrf.mxu1 }
 0x403   :  { %v5649_v3 = vadd.f32 %v5648_v5, %v4879_v9 }
 0x404   :  { %6066 = vmatpush.bf16.msra.mxu3 %v9460_v56 }
 0x405   :  { %v5663_v48 = vadd.f32 %v5662_v23, %v5649_v3 }
 0x407   :  { %v5618_v24 = vpop.f32.mrf.mxu2 }
 0x408   :  { %v5619_v36 = vadd.f32 %v5618_v24, %v5605_v2  ;;  %6067 = vmatpush.bf16.msra.mxu3 %v9459_v14 }
 0x40c   :  { %6068 = vmatpush.bf16.msra.mxu3 %v9458_v15 }
 0x40f   :  { %v5620_v62 = vpop.f32.mrf.mxu2 }
 0x410   :  { %v5621_v42 = vadd.f32 %v5620_v62, %v5607_v26  ;;  %6069 = vmatpush.bf16.msra.mxu3 %v9457_v58 }
 0x414   :  { %6070 = vmatpush.bf16.msra.mxu3 %v9456_v54 }
 0x417   :  { %v5674_v18 = vpop.f32.mrf.mxu2 }
 0x418   :  { %v5675_v43 = vadd.f32 %v5674_v18, %v5661_v55 }
 0x41a   :  { %v5702_v33 = vpop.f32.mrf.mxu0  ;;  %v5716_v40 = vpop.f32.mrf.mxu1 }
 0x41b   :  { %v5703_v39 = vadd.f32 %v5702_v33, %v4880_v63 }
 0x41d   :  { %v5717_v8 = vadd.f32 %v5716_v40, %v5703_v39 }
 0x41f   :  { %v5676_v7 = vpop.f32.mrf.mxu2 }
 0x420   :  { %v5677_v34 = vadd.f32 %v5676_v7, %v5663_v48 }
 0x422   :  { %v5704_v53 = vpop.f32.mrf.mxu0 }
 0x427   :  { %v5730_v10 = vpop.f32.mrf.mxu2 }
 0x428   :  { %v5731_v60 = vadd.f32 %v5730_v10, %v5717_v8 }
 0x42f   :  { %v5732_v24 = vpop.f32.mrf.mxu2 }
 0x43a   :  { %v5576_v6 = vpop.f32.mrf.mxu3 }
 0x43b   :  { %v5577_v20 = vadd.f32 %v5576_v6, %v5563_v38 }
 0x43d   :  { %v5749_v45 = vmax.f32 %v5577_v20, 0.0  ;;  %v5718_v20 = vpop.f32.mrf.mxu1 }
 0x442   :  { %v5578_v47 = vpop.f32.mrf.mxu3 }
 0x443   :  { %v5579_v46 = vadd.f32 %v5578_v47, %v5565_v35  ;;  %v5705_v35 = vadd.f32 %v5704_v53, %v4880_v63 }
 0x445   :  { %v5753_v31 = vmax.f32 %v5579_v46, 0.0  ;;  %v5719_v47 = vadd.f32 %v5718_v20, %v5705_v35 }
 0x447   :  { %v5757_v16 = vpack.c.bf16 %v5753_v31, %v5749_v45  ;;  %v5733_v46 = vadd.f32 %v5732_v24, %v5719_v47 }
 0x449   :  { %6029 = vmatmul.bf16.vlgmr.msra.gmra.mxu0 %v5757_v16 }
 0x44a   :  { %v5632_v30 = vpop.f32.mrf.mxu3 }
 0x44b   :  { %v5633_v57 = vadd.f32 %v5632_v30, %v5619_v36 }
 0x44d   :  { %v5750_v37 = vmax.f32 %v5633_v57, 0.0 }
 0x452   :  { %v5634_v21 = vpop.f32.mrf.mxu3 }
 0x453   :  { %v5635_v17 = vadd.f32 %v5634_v21, %v5621_v42 }
 0x455   :  { %v5754_v19 = vmax.f32 %v5635_v17, 0.0 }
 0x457   :  { %v5758_v52 = vpack.c.bf16 %v5754_v19, %v5750_v37 }
 0x459   :  { %6043 = vmatmul.bf16.vlgmr.msra.gmra.mxu1 %v5758_v52 }
 0x45a   :  { %v5688_v41 = vpop.f32.mrf.mxu3 }
 0x45b   :  { %v5689_v13 = vadd.f32 %v5688_v41, %v5675_v43 }
 0x45d   :  { %v5751_v28 = vmax.f32 %v5689_v13, 0.0 }
 0x462   :  { %v5690_v51 = vpop.f32.mrf.mxu3 }
 0x463   :  { %v5691_v29 = vadd.f32 %v5690_v51, %v5677_v34 }
 0x465   :  { %v5755_v49 = vmax.f32 %v5691_v29, 0.0 }
 0x467   :  { %v5759_v6 = vpack.c.bf16 %v5755_v49, %v5751_v28 }
 0x469   :  { %6057 = vmatmul.bf16.vlgmr.msra.gmra.mxu2 %v5759_v6 }
 0x47a   :  { %v5744_v38 = vpop.f32.mrf.mxu3 }
 0x47b   :  { %v5745_v44 = vadd.f32 %v5744_v38, %v5731_v60 }
 0x47d   :  { %v5752_v4 = vmax.f32 %v5745_v44, 0.0 }
 0x482   :  { %v5746_v45 = vpop.f32.mrf.mxu3 }
 0x483   :  { %v5747_v31 = vadd.f32 %v5746_v45, %v5733_v46 }
 0x485   :  { %v5756_v25 = vmax.f32 %v5747_v31, 0.0 }
 0x487   :  { %v5760_v12 = vpack.c.bf16 %v5756_v25, %v5752_v4 }
 0x489   :  { %6071 = vmatmul.bf16.vlgmr.msra.gmra.mxu3 %v5760_v12 }
 0x4c6   :  { %v6030_v16 = vpop.f32.mrf.mxu0 }
 0x4c7   :  { %v6031_v30 = vadd.f32 %v9476_v27, %v6030_v16 }
 0x4ce   :  { %v6032_v62 = vpop.f32.mrf.mxu0 }
 0x4cf   :  { %v6033_v26 = vadd.f32 %v9476_v27, %v6032_v62 }
 0x4d6   :  { %v6044_v11 = vpop.f32.mrf.mxu1 }
 0x4d7   :  { %v6045_v22 = vadd.f32 %v6044_v11, %v6031_v30 }
 0x4de   :  { %v6046_v61 = vpop.f32.mrf.mxu1 }
 0x4df   :  { %v6047_v56 = vadd.f32 %v6046_v61, %v6033_v26 }
 0x4ec   :  { %v6058_v59 = vpop.f32.mrf.mxu2 }
 0x4ed   :  { %v6059_v0 = vadd.f32 %v6058_v59, %v6045_v22 }
 0x4f4   :  { %v6060_v36 = vpop.f32.mrf.mxu2 }
 0x4f5   :  { %v6061_v42 = vadd.f32 %v6060_v36, %v6047_v56 }
 0x50c   :  { %v6072_v32 = vpop.f32.mrf.mxu3 }
 0x50d   :  { %v6073_v2 = vadd.f32 %v6072_v32, %v6059_v0 }
 0x50f   :  { %6077 = vst [vmem:[%s10298_s9] sm:$0xff] %v6073_v2 }
 0x514   :  { %v6074_v57 = vpop.f32.mrf.mxu3 }
 0x515   :  { %v6075_v21 = vadd.f32 %v6074_v57, %v6061_v42 }
 0x517   :  { %6078 = vst [vmem:[%s10298_s9 + $0x8] sm:$0xff] %v6075_v21 }
 0x518   :  { %6083 = vsyncpa [#allocation3], 1 }
 0x519   :  { %6084 = vsyncpa [#allocation5], 1 }
 0x51a   :  { %6085 = vsyncpa [#allocation8], 1 }
 0x51b   :  { %6086 = vsyncpa [#allocation11], 1 }
 0x51c   :  { %6087 = vsyncpa [#allocation14], 1 }

</bundles_post_ra>
